<compile_context>
chip_gen: v7x
topology: tpu7x:2x2x1
jax: 0.10.0
libtpu: 0.0.40
codegen_flags: <defaults>
</compile_context>

<pallas_src>
import functools

import jax
import jax.numpy as jnp
from jax.experimental import pallas as pl
from jax.experimental.pallas import tpu as pltpu

_LANE = 128


def _round_up(v, m):
    return ((v + m - 1) // m) * m


def _pad_to(arr, shape):
    widths = [(0, t - s) for s, t in zip(arr.shape, shape)]
    if all(w == (0, 0) for w in widths):
        return arr
    return jnp.pad(arr, widths)


def _prepare_operands(x, a_norm, weights, biases):
    """Zero-pad to (8,128)-friendly shapes and relation-stack A / W into MXU operands."""
    n, _ = x.shape
    num_rels = a_norm.shape[0]
    n_p = _round_up(n, _LANE)

    layer_cfg = []
    for w in weights:
        f_in, f_out = int(w.shape[1]), int(w.shape[2])
        fi_p, fo_p = _round_up(f_in, _LANE), _round_up(f_out, _LANE)
        # Contraction order from the padded (hardware) dims, tie-broken on the true dims:
        #   True  -> aggregate first: (A@H)@W   (the N^2 matmul contracts over the smaller side)
        #   False -> project first:   A@(H@W)
        order = (fi_p < fo_p) or (fi_p == fo_p and f_in <= f_out)
        layer_cfg.append((order, fi_p, fo_p))
    layer_cfg = tuple(layer_cfg)

    x_p = _pad_to(x, (n_p, layer_cfg[0][1])).astype(jnp.bfloat16)

    a_pad = _pad_to(a_norm, (num_rels, n_p, n_p)).astype(jnp.bfloat16)
    # Relation-stacked adjacency (built once, wrapper side; unused form is DCE'd under jit):
    #   a_stack[r*Np + d, s] = A[r][d, s]   (aggregate-first layers)
    #   a_cat  [d, r*Np + s] = A[r][d, s]   (project-first layers)
    a_stack = a_pad.reshape(num_rels * n_p, n_p)
    a_cat = jnp.transpose(a_pad, (1, 0, 2)).reshape(n_p, num_rels * n_p)

    w_ops, b_ops = [], []
    for (order, fi_p, fo_p), w, b in zip(layer_cfg, weights, biases):
        w_p = _pad_to(w, (num_rels, fi_p, fo_p)).astype(jnp.bfloat16)
        if order:
            w_ops.append(w_p.reshape(num_rels * fi_p, fo_p))                          # [R*Fi, Fo]
        else:
            w_ops.append(jnp.transpose(w_p, (1, 0, 2)).reshape(fi_p, num_rels * fo_p))  # [Fi, R*Fo]
        # Bias hoisted: summed over relations once here, added once per layer in-kernel.
        b_ops.append(_pad_to(b.sum(axis=0)[None, :].astype(jnp.float32), (1, fo_p)))

    return n_p, num_rels, layer_cfg, x_p, a_stack, a_cat, w_ops, b_ops


def _rgcn5_fused_kernel(*refs, layer_cfg, num_rels, n_pad, has_stack, has_cat):
    """Fully fused RGCN forward.

    refs = (x, [a_stack], [a_cat], w_1..w_L, b_1..b_L, out, [shuf_a], [shuf_b])
    """
    idx = 0
    x_ref = refs[idx]; idx += 1
    a_stack_ref = None
    a_cat_ref = None
    if has_stack:
        a_stack_ref = refs[idx]; idx += 1
    if has_cat:
        a_cat_ref = refs[idx]; idx += 1
    n_layers = len(layer_cfg)
    w_refs = refs[idx:idx + n_layers]; idx += n_layers
    b_refs = refs[idx:idx + n_layers]; idx += n_layers
    o_ref = refs[idx]; idx += 1
    shuf_a_ref = None
    shuf_b_ref = None
    if has_stack:
        shuf_a_ref = refs[idx]; idx += 1
    if has_cat:
        shuf_b_ref = refs[idx]; idx += 1

    h = x_ref[...]  # bf16 [Np, F0_p]; stays resident across all layers (no HBM round-trip)

    for li, (order, fi_p, fo_p) in enumerate(layer_cfg):
        if order:
            # Aggregate-then-project: ONE big [R*Np, Np] x [Np, Fi] MXU matmul over all relations.
            t = jnp.dot(a_stack_ref[...], h, preferred_element_type=jnp.float32)  # [R*Np, Fi] f32
            # Relation shuffle (R, Np, Fi) -> (Np, R*Fi) via R static tile-aligned slice copies.
            for r in range(num_rels):
                shuf_a_ref[:, r * fi_p:(r + 1) * fi_p] = (
                    t[r * n_pad:(r + 1) * n_pad, :].astype(jnp.bfloat16))
            # ONE [Np, R*Fi] x [R*Fi, Fo] matmul folds the relation sum into the MXU accumulator.
            acc = jnp.dot(shuf_a_ref[:, :num_rels * fi_p], w_refs[li][...],
                          preferred_element_type=jnp.float32)                      # [Np, Fo] f32
        else:
            # Project-then-aggregate: ONE [Np, Fi] x [Fi, R*Fo] matmul over all relations.
            u = jnp.dot(h, w_refs[li][...], preferred_element_type=jnp.float32)    # [Np, R*Fo] f32
            # Relation shuffle (Np, R*Fo) -> (R*Np, Fo).
            for r in range(num_rels):
                shuf_b_ref[r * n_pad:(r + 1) * n_pad, :fo_p] = (
                    u[:, r * fo_p:(r + 1) * fo_p].astype(jnp.bfloat16))
            # ONE big [Np, R*Np] x [R*Np, Fo] matmul; relation sum folded into the contraction.
            acc = jnp.dot(a_cat_ref[...], shuf_b_ref[:, :fo_p],
                          preferred_element_type=jnp.float32)                      # [Np, Fo] f32

        acc = acc + b_refs[li][...]  # bias already summed over relations, f32 [1, Fo]

        if li < n_layers - 1:
            h = jnp.maximum(acc, 0.0).astype(jnp.bfloat16)
        else:
            o_ref[...] = acc.astype(o_ref.dtype)


def _pick_vmem_limit_bytes(resident_bytes):
    """VMEM limit derived from the actual buffer sizes, capped per TPU generation."""
    cap = 128 * 1024 * 1024
    try:
        cap = int(getattr(pltpu.get_tpu_info(), "vmem_capacity_bytes", cap))
    except Exception:
        pass
    want = 2 * int(resident_bytes) + (16 << 20)          # 2x resident + headroom for temporaries
    return int(max(32 << 20, min(want, (cap * 4) // 5)))  # never above ~80% of physical VMEM


def rgcn5conv_forward(x, a_norm, weights, biases):
    """x: [N, F0], a_norm: [R, N, N], weights[i]: [R, F_in, F_out], biases[i]: [R, F_out]."""
    n = x.shape[0]
    out_f = weights[-1].shape[2]
    (n_p, num_rels, layer_cfg, x_p, a_stack, a_cat, w_ops, b_ops) = _prepare_operands(
        x, a_norm, weights, biases)

    has_stack = any(o for o, _, _ in layer_cfg)
    has_cat = not all(o for o, _, _ in layer_cfg)

    inputs = [x_p]
    if has_stack:
        inputs.append(a_stack)
    if has_cat:
        inputs.append(a_cat)
    inputs += list(w_ops) + list(b_ops)

    out_fo_p = layer_cfg[-1][2]
    out_shape = jax.ShapeDtypeStruct((n_p, out_fo_p), jnp.float32)

    scratch_shapes = []
    scratch_bytes = 0
    if has_stack:
        fi_max = max(fi_p for o, fi_p, _ in layer_cfg if o)
        scratch_shapes.append(pltpu.VMEM((n_p, num_rels * fi_max), jnp.bfloat16))
        scratch_bytes += n_p * num_rels * fi_max * 2
    if has_cat:
        fo_max = max(fo_p for o, _, fo_p in layer_cfg if not o)
        scratch_shapes.append(pltpu.VMEM((num_rels * n_p, fo_max), jnp.bfloat16))
        scratch_bytes += num_rels * n_p * fo_max * 2

    in_bytes = sum(a.size * a.dtype.itemsize for a in inputs)
    out_bytes = n_p * out_fo_p * 4
    resident_bytes = in_bytes + out_bytes + scratch_bytes

    flops = 0
    for order, fi_p, fo_p in layer_cfg:
        nsq = fi_p if order else fo_p
        flops += 2 * num_rels * n_p * (n_p * nsq + fi_p * fo_p)
    cost = pl.CostEstimate(flops=int(flops), transcendentals=0,
                           bytes_accessed=int(in_bytes + out_bytes))

    kernel = functools.partial(
        _rgcn5_fused_kernel, layer_cfg=layer_cfg, num_rels=num_rels, n_pad=n_p,
        has_stack=has_stack, has_cat=has_cat)

    # No grid: a single invocation with every operand as a single (non-double-buffered)
    # VMEM-resident block -- the "Buffered(1) for constant inputs" request.
    vmem_spec = pl.BlockSpec(memory_space=pltpu.MemorySpace.VMEM)
    out = pl.pallas_call(
        kernel,
        out_shape=out_shape,
        in_specs=[vmem_spec] * len(inputs),
        out_specs=vmem_spec,
        scratch_shapes=scratch_shapes,
        compiler_params=pltpu.CompilerParams(
            vmem_limit_bytes=_pick_vmem_limit_bytes(resident_bytes)),
        cost_estimate=cost,
    )(*inputs)
    return out[:n, :out_f]


def rgcn5conv_reference_f32(x, a_norm, weights, biases):
    """Pure-f32 plain-JAX reference with the exact PyTorch/DGL module semantics."""
    h = x
    n_layers = len(weights)
    for i in range(n_layers):
        out = jnp.zeros((h.shape[0], weights[i].shape[2]), jnp.float32)
        for r in range(a_norm.shape[0]):
            out = out + a_norm[r] @ (h @ weights[i][r]) + biases[i][r][None, :]
        h = jnp.maximum(out, 0.0) if i < n_layers - 1 else out
    return h


def rgcn5conv_matched_reference(x, a_norm, weights, biases):
    """Plain-JAX reference replicating the kernel's relation-stacked bf16/f32 numerics."""
    n = x.shape[0]
    out_f = weights[-1].shape[2]
    (n_p, num_rels, layer_cfg, x_p, a_stack, a_cat, w_ops, b_ops) = _prepare_operands(
        x, a_norm, weights, biases)
    h = x_p
    acc = None
    n_layers = len(layer_cfg)
    for li, (order, fi_p, fo_p) in enumerate(layer_cfg):
        if order:
            t = jnp.dot(a_stack, h, preferred_element_type=jnp.float32).astype(jnp.bfloat16)
            t = jnp.concatenate([t[r * n_p:(r + 1) * n_p, :] for r in range(num_rels)], axis=1)
            acc = jnp.dot(t, w_ops[li], preferred_element_type=jnp.float32)
        else:
            u = jnp.dot(h, w_ops[li], preferred_element_type=jnp.float32).astype(jnp.bfloat16)
            u = jnp.concatenate([u[:, r * fo_p:(r + 1) * fo_p] for r in range(num_rels)], axis=0)
            acc = jnp.dot(a_cat, u, preferred_element_type=jnp.float32)
        acc = acc + b_ops[li]
        if li < n_layers - 1:
            h = jnp.maximum(acc, 0.0).astype(jnp.bfloat16)
    return acc[:n, :out_f]


def build_normalized_adjacency(key, num_rels, num_nodes, edge_prob=0.15):
    """Dense random adjacency per relation with DGL GraphConv norm='both' applied."""
    adj = (jax.random.uniform(key, (num_rels, num_nodes, num_nodes)) < edge_prob
           ).astype(jnp.float32)  # adj[r, dst, src] = 1 if edge src -> dst under relation r
    in_deg = jnp.clip(adj.sum(axis=2), 1.0, None)   # [R, N_dst]
    out_deg = jnp.clip(adj.sum(axis=1), 1.0, None)  # [R, N_src]
    return adj * (1.0 / jnp.sqrt(in_deg))[:, :, None] * (1.0 / jnp.sqrt(out_deg))[:, None, :]


if __name__ == "__main__":
    # Small, module-consistent shapes.
    NUM_NODES = 64
    NUM_RELS = 3
    IN_FEATS, HID_FEATS, OUT_FEATS = 16, 32, 8

    # Layer dims exactly as in RGCN5conv.__init__: in -> hid -> 2*hid -> 4*hid -> 2*hid -> out
    layer_dims = [
        (IN_FEATS, HID_FEATS),
        (HID_FEATS, HID_FEATS * 2),
        (HID_FEATS * 2, HID_FEATS * 4),
        (HID_FEATS * 4, HID_FEATS * 2),
        (HID_FEATS * 2, OUT_FEATS),
    ]

    key = jax.random.PRNGKey(0)
    k_graph, k_feat, *k_layers = jax.random.split(key, 2 + len(layer_dims))

    a_norm = build_normalized_adjacency(k_graph, NUM_RELS, NUM_NODES)
    x = jax.random.normal(k_feat, (NUM_NODES, IN_FEATS), dtype=jnp.float32)

    weights, biases = [], []
    for (f_in, f_out), kl in zip(layer_dims, k_layers):
        kw, kb = jax.random.split(kl)
        w = jax.random.normal(kw, (NUM_RELS, f_in, f_out), dtype=jnp.float32) / jnp.sqrt(float(f_in))
        b = 0.01 * jax.random.normal(kb, (NUM_RELS, f_out), dtype=jnp.float32)
        weights.append(w)
        biases.append(b)

    fwd = jax.jit(rgcn5conv_forward)
    out = jax.block_until_ready(fwd(x, a_norm, weights, biases))

    assert out.shape == (NUM_NODES, OUT_FEATS)

    # Structural correctness vs a numerics-matched (bf16, relation-stacked) plain-JAX reference.
    ref_matched = rgcn5conv_matched_reference(x, a_norm, weights, biases)
    assert bool(jnp.allclose(out, ref_matched, atol=5e-3, rtol=5e-3)), \
        "Pallas kernel mismatch vs bf16-matched reference"

    # Loose sanity vs the exact f32 module semantics (bf16 MXU inputs relax the tolerance).
    ref_f32 = rgcn5conv_reference_f32(x, a_norm, weights, biases)
    scale = float(jnp.max(jnp.abs(ref_f32)))
    max_err = float(jnp.max(jnp.abs(out - ref_f32)))
    assert max_err <= 0.1 * scale + 1e-2, f"bf16 path drifted too far from f32 reference ({max_err})"

    print("KERNEL_OK")
</pallas_src>

<mosaic_0001>
module attributes {stable_mosaic.version = 11 : i64} {
  func.func @_rgcn5_fused_kernel(%arg0: memref<128x128xbf16, #tpu.memory_space<vmem>>, %arg1: memref<384x128xbf16, #tpu.memory_space<vmem>>, %arg2: memref<128x384xbf16, #tpu.memory_space<vmem>>, %arg3: memref<384x128xbf16, #tpu.memory_space<vmem>>, %arg4: memref<384x128xbf16, #tpu.memory_space<vmem>>, %arg5: memref<384x128xbf16, #tpu.memory_space<vmem>>, %arg6: memref<128x384xbf16, #tpu.memory_space<vmem>>, %arg7: memref<128x384xbf16, #tpu.memory_space<vmem>>, %arg8: memref<1x128xf32, #tpu.memory_space<vmem>>, %arg9: memref<1x128xf32, #tpu.memory_space<vmem>>, %arg10: memref<1x128xf32, #tpu.memory_space<vmem>>, %arg11: memref<1x128xf32, #tpu.memory_space<vmem>>, %arg12: memref<1x128xf32, #tpu.memory_space<vmem>>, %arg13: memref<128x128xf32, #tpu.memory_space<vmem>>, %arg14: memref<128x384xbf16, #tpu.memory_space<vmem>>, %arg15: memref<384x128xbf16, #tpu.memory_space<vmem>>) attributes {dimension_semantics = [], scalar_prefetch = 0 : i64, scratch_operands = 2 : i64, tpu.core_type = #tpu.core_type<tc>} {
    %c0 = arith.constant 0 : index
    %c0_0 = arith.constant 0 : index
    %0 = vector.load %arg0[%c0, %c0_0] : memref<128x128xbf16, #tpu.memory_space<vmem>>, vector<128x128xbf16>
    %c0_1 = arith.constant 0 : index
    %c0_2 = arith.constant 0 : index
    %1 = vector.load %arg1[%c0_1, %c0_2] : memref<384x128xbf16, #tpu.memory_space<vmem>>, vector<384x128xbf16>
    %cst = arith.constant dense<0.000000e+00> : vector<384x128xf32>
    %2 = tpu.matmul %1, %0, %cst {dimension_numbers = #tpu.dot_dimension_numbers<[1], [0], [0], [1], [0, 0, 1, 1], [], []>} : vector<384x128xbf16>, vector<128x128xbf16>, vector<384x128xf32> -> vector<384x128xf32>
    %3 = vector.extract_strided_slice %2 {offsets = [0, 0], sizes = [128, 128], strides = [1, 1]} : vector<384x128xf32> to vector<128x128xf32>
    %4 = arith.truncf %3 : vector<128x128xf32> to vector<128x128xbf16>
    %c0_3 = arith.constant 0 : index
    %c0_4 = arith.constant 0 : index
    %5 = vector.load %arg14[%c0_3, %c0_4] : memref<128x384xbf16, #tpu.memory_space<vmem>>, vector<128x128xbf16>
    tpu.vector_store %arg14[%c0_3, %c0_4], %4 {strides = array<i32>} : memref<128x384xbf16, #tpu.memory_space<vmem>>, vector<128x128xbf16>,
    %6 = vector.extract_strided_slice %2 {offsets = [128, 0], sizes = [128, 128], strides = [1, 1]} : vector<384x128xf32> to vector<128x128xf32>
    %7 = arith.truncf %6 : vector<128x128xf32> to vector<128x128xbf16>
    %c0_5 = arith.constant 0 : index
    %c128 = arith.constant 128 : index
    %8 = vector.load %arg14[%c0_5, %c128] : memref<128x384xbf16, #tpu.memory_space<vmem>>, vector<128x128xbf16>
    tpu.vector_store %arg14[%c0_5, %c128], %7 {strides = array<i32>} : memref<128x384xbf16, #tpu.memory_space<vmem>>, vector<128x128xbf16>,
    %9 = vector.extract_strided_slice %2 {offsets = [256, 0], sizes = [128, 128], strides = [1, 1]} : vector<384x128xf32> to vector<128x128xf32>
    %10 = arith.truncf %9 : vector<128x128xf32> to vector<128x128xbf16>
    %c0_6 = arith.constant 0 : index
    %c256 = arith.constant 256 : index
    %11 = vector.load %arg14[%c0_6, %c256] : memref<128x384xbf16, #tpu.memory_space<vmem>>, vector<128x128xbf16>
    tpu.vector_store %arg14[%c0_6, %c256], %10 {strides = array<i32>} : memref<128x384xbf16, #tpu.memory_space<vmem>>, vector<128x128xbf16>,
    %c0_7 = arith.constant 0 : index
    %c0_8 = arith.constant 0 : index
    %12 = vector.load %arg14[%c0_7, %c0_8] : memref<128x384xbf16, #tpu.memory_space<vmem>>, vector<128x384xbf16>
    %c0_9 = arith.constant 0 : index
    %c0_10 = arith.constant 0 : index
    %13 = vector.load %arg3[%c0_9, %c0_10] : memref<384x128xbf16, #tpu.memory_space<vmem>>, vector<384x128xbf16>
    %cst_11 = arith.constant dense<0.000000e+00> : vector<128x128xf32>
    %14 = tpu.matmul %12, %13, %cst_11 {dimension_numbers = #tpu.dot_dimension_numbers<[1], [0], [0], [1], [0, 0, 1, 1], [], []>} : vector<128x384xbf16>, vector<384x128xbf16>, vector<128x128xf32> -> vector<128x128xf32>
    %c0_12 = arith.constant 0 : index
    %c0_13 = arith.constant 0 : index
    %15 = vector.load %arg8[%c0_12, %c0_13] : memref<1x128xf32, #tpu.memory_space<vmem>>, vector<1x128xf32>
    %16 = vector.broadcast %15 : vector<1x128xf32> to vector<128x128xf32>
    %17 = arith.addf %14, %16 : vector<128x128xf32>
    %cst_14 = arith.constant 0.000000e+00 : f32
    %18 = vector.broadcast %cst_14 : f32 to vector<128x128xf32>
    %19 = arith.maximumf %17, %18 : vector<128x128xf32>
    %20 = arith.truncf %19 : vector<128x128xf32> to vector<128x128xbf16>
    %c0_15 = arith.constant 0 : index
    %c0_16 = arith.constant 0 : index
    %21 = vector.load %arg1[%c0_15, %c0_16] : memref<384x128xbf16, #tpu.memory_space<vmem>>, vector<384x128xbf16>
    %cst_17 = arith.constant dense<0.000000e+00> : vector<384x128xf32>
    %22 = tpu.matmul %21, %20, %cst_17 {dimension_numbers = #tpu.dot_dimension_numbers<[1], [0], [0], [1], [0, 0, 1, 1], [], []>} : vector<384x128xbf16>, vector<128x128xbf16>, vector<384x128xf32> -> vector<384x128xf32>
    %23 = vector.extract_strided_slice %22 {offsets = [0, 0], sizes = [128, 128], strides = [1, 1]} : vector<384x128xf32> to vector<128x128xf32>
    %24 = arith.truncf %23 : vector<128x128xf32> to vector<128x128xbf16>
    %c0_18 = arith.constant 0 : index
    %c0_19 = arith.constant 0 : index
    %25 = vector.load %arg14[%c0_18, %c0_19] : memref<128x384xbf16, #tpu.memory_space<vmem>>, vector<128x128xbf16>
    tpu.vector_store %arg14[%c0_18, %c0_19], %24 {strides = array<i32>} : memref<128x384xbf16, #tpu.memory_space<vmem>>, vector<128x128xbf16>,
    %26 = vector.extract_strided_slice %22 {offsets = [128, 0], sizes = [128, 128], strides = [1, 1]} : vector<384x128xf32> to vector<128x128xf32>
    %27 = arith.truncf %26 : vector<128x128xf32> to vector<128x128xbf16>
    %c0_20 = arith.constant 0 : index
    %c128_21 = arith.constant 128 : index
    %28 = vector.load %arg14[%c0_20, %c128_21] : memref<128x384xbf16, #tpu.memory_space<vmem>>, vector<128x128xbf16>
    tpu.vector_store %arg14[%c0_20, %c128_21], %27 {strides = array<i32>} : memref<128x384xbf16, #tpu.memory_space<vmem>>, vector<128x128xbf16>,
    %29 = vector.extract_strided_slice %22 {offsets = [256, 0], sizes = [128, 128], strides = [1, 1]} : vector<384x128xf32> to vector<128x128xf32>
    %30 = arith.truncf %29 : vector<128x128xf32> to vector<128x128xbf16>
    %c0_22 = arith.constant 0 : index
    %c256_23 = arith.constant 256 : index
    %31 = vector.load %arg14[%c0_22, %c256_23] : memref<128x384xbf16, #tpu.memory_space<vmem>>, vector<128x128xbf16>
    tpu.vector_store %arg14[%c0_22, %c256_23], %30 {strides = array<i32>} : memref<128x384xbf16, #tpu.memory_space<vmem>>, vector<128x128xbf16>,
    %c0_24 = arith.constant 0 : index
    %c0_25 = arith.constant 0 : index
    %32 = vector.load %arg14[%c0_24, %c0_25] : memref<128x384xbf16, #tpu.memory_space<vmem>>, vector<128x384xbf16>
    %c0_26 = arith.constant 0 : index
    %c0_27 = arith.constant 0 : index
    %33 = vector.load %arg4[%c0_26, %c0_27] : memref<384x128xbf16, #tpu.memory_space<vmem>>, vector<384x128xbf16>
    %cst_28 = arith.constant dense<0.000000e+00> : vector<128x128xf32>
    %34 = tpu.matmul %32, %33, %cst_28 {dimension_numbers = #tpu.dot_dimension_numbers<[1], [0], [0], [1], [0, 0, 1, 1], [], []>} : vector<128x384xbf16>, vector<384x128xbf16>, vector<128x128xf32> -> vector<128x128xf32>
    %c0_29 = arith.constant 0 : index
    %c0_30 = arith.constant 0 : index
    %35 = vector.load %arg9[%c0_29, %c0_30] : memref<1x128xf32, #tpu.memory_space<vmem>>, vector<1x128xf32>
    %36 = vector.broadcast %35 : vector<1x128xf32> to vector<128x128xf32>
    %37 = arith.addf %34, %36 : vector<128x128xf32>
    %cst_31 = arith.constant 0.000000e+00 : f32
    %38 = vector.broadcast %cst_31 : f32 to vector<128x128xf32>
    %39 = arith.maximumf %37, %38 : vector<128x128xf32>
    %40 = arith.truncf %39 : vector<128x128xf32> to vector<128x128xbf16>
    %c0_32 = arith.constant 0 : index
    %c0_33 = arith.constant 0 : index
    %41 = vector.load %arg1[%c0_32, %c0_33] : memref<384x128xbf16, #tpu.memory_space<vmem>>, vector<384x128xbf16>
    %cst_34 = arith.constant dense<0.000000e+00> : vector<384x128xf32>
    %42 = tpu.matmul %41, %40, %cst_34 {dimension_numbers = #tpu.dot_dimension_numbers<[1], [0], [0], [1], [0, 0, 1, 1], [], []>} : vector<384x128xbf16>, vector<128x128xbf16>, vector<384x128xf32> -> vector<384x128xf32>
    %43 = vector.extract_strided_slice %42 {offsets = [0, 0], sizes = [128, 128], strides = [1, 1]} : vector<384x128xf32> to vector<128x128xf32>
    %44 = arith.truncf %43 : vector<128x128xf32> to vector<128x128xbf16>
    %c0_35 = arith.constant 0 : index
    %c0_36 = arith.constant 0 : index
    %45 = vector.load %arg14[%c0_35, %c0_36] : memref<128x384xbf16, #tpu.memory_space<vmem>>, vector<128x128xbf16>
    tpu.vector_store %arg14[%c0_35, %c0_36], %44 {strides = array<i32>} : memref<128x384xbf16, #tpu.memory_space<vmem>>, vector<128x128xbf16>,
    %46 = vector.extract_strided_slice %42 {offsets = [128, 0], sizes = [128, 128], strides = [1, 1]} : vector<384x128xf32> to vector<128x128xf32>
    %47 = arith.truncf %46 : vector<128x128xf32> to vector<128x128xbf16>
    %c0_37 = arith.constant 0 : index
    %c128_38 = arith.constant 128 : index
    %48 = vector.load %arg14[%c0_37, %c128_38] : memref<128x384xbf16, #tpu.memory_space<vmem>>, vector<128x128xbf16>
    tpu.vector_store %arg14[%c0_37, %c128_38], %47 {strides = array<i32>} : memref<128x384xbf16, #tpu.memory_space<vmem>>, vector<128x128xbf16>,
    %49 = vector.extract_strided_slice %42 {offsets = [256, 0], sizes = [128, 128], strides = [1, 1]} : vector<384x128xf32> to vector<128x128xf32>
    %50 = arith.truncf %49 : vector<128x128xf32> to vector<128x128xbf16>
    %c0_39 = arith.constant 0 : index
    %c256_40 = arith.constant 256 : index
    %51 = vector.load %arg14[%c0_39, %c256_40] : memref<128x384xbf16, #tpu.memory_space<vmem>>, vector<128x128xbf16>
    tpu.vector_store %arg14[%c0_39, %c256_40], %50 {strides = array<i32>} : memref<128x384xbf16, #tpu.memory_space<vmem>>, vector<128x128xbf16>,
    %c0_41 = arith.constant 0 : index
    %c0_42 = arith.constant 0 : index
    %52 = vector.load %arg14[%c0_41, %c0_42] : memref<128x384xbf16, #tpu.memory_space<vmem>>, vector<128x384xbf16>
    %c0_43 = arith.constant 0 : index
    %c0_44 = arith.constant 0 : index
    %53 = vector.load %arg5[%c0_43, %c0_44] : memref<384x128xbf16, #tpu.memory_space<vmem>>, vector<384x128xbf16>
    %cst_45 = arith.constant dense<0.000000e+00> : vector<128x128xf32>
    %54 = tpu.matmul %52, %53, %cst_45 {dimension_numbers = #tpu.dot_dimension_numbers<[1], [0], [0], [1], [0, 0, 1, 1], [], []>} : vector<128x384xbf16>, vector<384x128xbf16>, vector<128x128xf32> -> vector<128x128xf32>
    %c0_46 = arith.constant 0 : index
    %c0_47 = arith.constant 0 : index
    %55 = vector.load %arg10[%c0_46, %c0_47] : memref<1x128xf32, #tpu.memory_space<vmem>>, vector<1x128xf32>
    %56 = vector.broadcast %55 : vector<1x128xf32> to vector<128x128xf32>
    %57 = arith.addf %54, %56 : vector<128x128xf32>
    %cst_48 = arith.constant 0.000000e+00 : f32
    %58 = vector.broadcast %cst_48 : f32 to vector<128x128xf32>
    %59 = arith.maximumf %57, %58 : vector<128x128xf32>
    %60 = arith.truncf %59 : vector<128x128xf32> to vector<128x128xbf16>
    %c0_49 = arith.constant 0 : index
    %c0_50 = arith.constant 0 : index
    %61 = vector.load %arg6[%c0_49, %c0_50] : memref<128x384xbf16, #tpu.memory_space<vmem>>, vector<128x384xbf16>
    %cst_51 = arith.constant dense<0.000000e+00> : vector<128x384xf32>
    %62 = tpu.matmul %60, %61, %cst_51 {dimension_numbers = #tpu.dot_dimension_numbers<[1], [0], [0], [1], [0, 0, 1, 1], [], []>} : vector<128x128xbf16>, vector<128x384xbf16>, vector<128x384xf32> -> vector<128x384xf32>
    %63 = vector.extract_strided_slice %62 {offsets = [0, 0], sizes = [128, 128], strides = [1, 1]} : vector<128x384xf32> to vector<128x128xf32>
    %64 = arith.truncf %63 : vector<128x128xf32> to vector<128x128xbf16>
    %c0_52 = arith.constant 0 : index
    %c0_53 = arith.constant 0 : index
    %65 = vector.load %arg15[%c0_52, %c0_53] : memref<384x128xbf16, #tpu.memory_space<vmem>>, vector<128x128xbf16>
    tpu.vector_store %arg15[%c0_52, %c0_53], %64 {strides = array<i32>} : memref<384x128xbf16, #tpu.memory_space<vmem>>, vector<128x128xbf16>,
    %66 = vector.extract_strided_slice %62 {offsets = [0, 128], sizes = [128, 128], strides = [1, 1]} : vector<128x384xf32> to vector<128x128xf32>
    %67 = arith.truncf %66 : vector<128x128xf32> to vector<128x128xbf16>
    %c128_54 = arith.constant 128 : index
    %c0_55 = arith.constant 0 : index
    %68 = vector.load %arg15[%c128_54, %c0_55] : memref<384x128xbf16, #tpu.memory_space<vmem>>, vector<128x128xbf16>
    tpu.vector_store %arg15[%c128_54, %c0_55], %67 {strides = array<i32>} : memref<384x128xbf16, #tpu.memory_space<vmem>>, vector<128x128xbf16>,
    %69 = vector.extract_strided_slice %62 {offsets = [0, 256], sizes = [128, 128], strides = [1, 1]} : vector<128x384xf32> to vector<128x128xf32>
    %70 = arith.truncf %69 : vector<128x128xf32> to vector<128x128xbf16>
    %c256_56 = arith.constant 256 : index
    %c0_57 = arith.constant 0 : index
    %71 = vector.load %arg15[%c256_56, %c0_57] : memref<384x128xbf16, #tpu.memory_space<vmem>>, vector<128x128xbf16>
    tpu.vector_store %arg15[%c256_56, %c0_57], %70 {strides = array<i32>} : memref<384x128xbf16, #tpu.memory_space<vmem>>, vector<128x128xbf16>,
    %c0_58 = arith.constant 0 : index
    %c0_59 = arith.constant 0 : index
    %72 = vector.load %arg2[%c0_58, %c0_59] : memref<128x384xbf16, #tpu.memory_space<vmem>>, vector<128x384xbf16>
    %c0_60 = arith.constant 0 : index
    %c0_61 = arith.constant 0 : index
    %73 = vector.load %arg15[%c0_60, %c0_61] : memref<384x128xbf16, #tpu.memory_space<vmem>>, vector<384x128xbf16>
    %cst_62 = arith.constant dense<0.000000e+00> : vector<128x128xf32>
    %74 = tpu.matmul %72, %73, %cst_62 {dimension_numbers = #tpu.dot_dimension_numbers<[1], [0], [0], [1], [0, 0, 1, 1], [], []>} : vector<128x384xbf16>, vector<384x128xbf16>, vector<128x128xf32> -> vector<128x128xf32>
    %c0_63 = arith.constant 0 : index
    %c0_64 = arith.constant 0 : index
    %75 = vector.load %arg11[%c0_63, %c0_64] : memref<1x128xf32, #tpu.memory_space<vmem>>, vector<1x128xf32>
    %76 = vector.broadcast %75 : vector<1x128xf32> to vector<128x128xf32>
    %77 = arith.addf %74, %76 : vector<128x128xf32>
    %cst_65 = arith.constant 0.000000e+00 : f32
    %78 = vector.broadcast %cst_65 : f32 to vector<128x128xf32>
    %79 = arith.maximumf %77, %78 : vector<128x128xf32>
    %80 = arith.truncf %79 : vector<128x128xf32> to vector<128x128xbf16>
    %c0_66 = arith.constant 0 : index
    %c0_67 = arith.constant 0 : index
    %81 = vector.load %arg7[%c0_66, %c0_67] : memref<128x384xbf16, #tpu.memory_space<vmem>>, vector<128x384xbf16>
    %cst_68 = arith.constant dense<0.000000e+00> : vector<128x384xf32>
    %82 = tpu.matmul %80, %81, %cst_68 {dimension_numbers = #tpu.dot_dimension_numbers<[1], [0], [0], [1], [0, 0, 1, 1], [], []>} : vector<128x128xbf16>, vector<128x384xbf16>, vector<128x384xf32> -> vector<128x384xf32>
    %83 = vector.extract_strided_slice %82 {offsets = [0, 0], sizes = [128, 128], strides = [1, 1]} : vector<128x384xf32> to vector<128x128xf32>
    %84 = arith.truncf %83 : vector<128x128xf32> to vector<128x128xbf16>
    %c0_69 = arith.constant 0 : index
    %c0_70 = arith.constant 0 : index
    %85 = vector.load %arg15[%c0_69, %c0_70] : memref<384x128xbf16, #tpu.memory_space<vmem>>, vector<128x128xbf16>
    tpu.vector_store %arg15[%c0_69, %c0_70], %84 {strides = array<i32>} : memref<384x128xbf16, #tpu.memory_space<vmem>>, vector<128x128xbf16>,
    %86 = vector.extract_strided_slice %82 {offsets = [0, 128], sizes = [128, 128], strides = [1, 1]} : vector<128x384xf32> to vector<128x128xf32>
    %87 = arith.truncf %86 : vector<128x128xf32> to vector<128x128xbf16>
    %c128_71 = arith.constant 128 : index
    %c0_72 = arith.constant 0 : index
    %88 = vector.load %arg15[%c128_71, %c0_72] : memref<384x128xbf16, #tpu.memory_space<vmem>>, vector<128x128xbf16>
    tpu.vector_store %arg15[%c128_71, %c0_72], %87 {strides = array<i32>} : memref<384x128xbf16, #tpu.memory_space<vmem>>, vector<128x128xbf16>,
    %89 = vector.extract_strided_slice %82 {offsets = [0, 256], sizes = [128, 128], strides = [1, 1]} : vector<128x384xf32> to vector<128x128xf32>
    %90 = arith.truncf %89 : vector<128x128xf32> to vector<128x128xbf16>
    %c256_73 = arith.constant 256 : index
    %c0_74 = arith.constant 0 : index
    %91 = vector.load %arg15[%c256_73, %c0_74] : memref<384x128xbf16, #tpu.memory_space<vmem>>, vector<128x128xbf16>
    tpu.vector_store %arg15[%c256_73, %c0_74], %90 {strides = array<i32>} : memref<384x128xbf16, #tpu.memory_space<vmem>>, vector<128x128xbf16>,
    %c0_75 = arith.constant 0 : index
    %c0_76 = arith.constant 0 : index
    %92 = vector.load %arg2[%c0_75, %c0_76] : memref<128x384xbf16, #tpu.memory_space<vmem>>, vector<128x384xbf16>
    %c0_77 = arith.constant 0 : index
    %c0_78 = arith.constant 0 : index
    %93 = vector.load %arg15[%c0_77, %c0_78] : memref<384x128xbf16, #tpu.memory_space<vmem>>, vector<384x128xbf16>
    %cst_79 = arith.constant dense<0.000000e+00> : vector<128x128xf32>
    %94 = tpu.matmul %92, %93, %cst_79 {dimension_numbers = #tpu.dot_dimension_numbers<[1], [0], [0], [1], [0, 0, 1, 1], [], []>} : vector<128x384xbf16>, vector<384x128xbf16>, vector<128x128xf32> -> vector<128x128xf32>
    %c0_80 = arith.constant 0 : index
    %c0_81 = arith.constant 0 : index
    %95 = vector.load %arg12[%c0_80, %c0_81] : memref<1x128xf32, #tpu.memory_space<vmem>>, vector<1x128xf32>
    %96 = vector.broadcast %95 : vector<1x128xf32> to vector<128x128xf32>
    %97 = arith.addf %94, %96 : vector<128x128xf32>
    %c0_82 = arith.constant 0 : index
    %c0_83 = arith.constant 0 : index
    %98 = vector.load %arg13[%c0_82, %c0_83] : memref<128x128xf32, #tpu.memory_space<vmem>>, vector<128x128xf32>
    tpu.vector_store %arg13[%c0_82, %c0_83], %97 {strides = array<i32>} : memref<128x128xf32, #tpu.memory_space<vmem>>, vector<128x128xf32>,
    return
  }
}

</mosaic_0001>

<bundles_post_ra>
// kernel: rgcn5conv_forward.1
= control target key start
LH: loop header
LB: loop body
LE: loop exit
PB: predicated region body
PF: predicated region fallthrough
CT: control target
= control target key end

     0   :  { %s7162_s0 = inlined_call_operand.vmem [shape: bf16[128,128], index: 0, kind: input, shape index: {}]   ;;  %s7163_s1 = inlined_call_operand.vmem [shape: bf16[384,128], index: 1, kind: input, shape index: {}]   ;;  %s7164_s3 = inlined_call_operand.vmem [shape: bf16[384,128], index: 3, kind: input, shape index: {}]   ;;  %s7165_s8 = inlined_call_operand.vmem [shape: f32[1,128], index: 8, kind: input, shape index: {}]   ;;  %s7166_s4 = inlined_call_operand.vmem [shape: bf16[384,128], index: 4, kind: input, shape index: {}]   ;;  %s7167_s9 = inlined_call_operand.vmem [shape: f32[1,128], index: 9, kind: input, shape index: {}]   ;;  %s7168_s5 = inlined_call_operand.vmem [shape: bf16[384,128], index: 5, kind: input, shape index: {}]   ;;  %s7169_s6 = inlined_call_operand.vmem [shape: bf16[128,384], index: 6, kind: input, shape index: {}]   ;;  %s7170_s10 = inlined_call_operand.vmem [shape: f32[1,128], index: 10, kind: input, shape index: {}]   ;;  %s7171_s2 = inlined_call_operand.vmem [shape: bf16[128,384], index: 2, kind: input, shape index: {}]   ;;  %s7172_s7 = inlined_call_operand.vmem [shape: bf16[128,384], index: 7, kind: input, shape index: {}]   ;;  %s7173_s11 = inlined_call_operand.vmem [shape: f32[1,128], index: 11, kind: input, shape index: {}]   ;;  %s7174_s12 = inlined_call_operand.vmem [shape: f32[1,128], index: 12, kind: input, shape index: {}]   ;;  %s7175_s13 = inlined_call_operand.vmem [shape: f32[128,128], index: 13, kind: output, shape index: {}]  }
   0x1   :  { %v5675_v0 = vld [vmem:[%s7162_s0] sm:$0xff]   ;;  %v5676_v1 = vld [vmem:[%s7162_s0 + $0x8] sm:$0xff]   ;;  %v5677_v2 = vld [vmem:[%s7162_s0 + $0x10] sm:$0xff]  }
   0x2   :  { %5258 = vmatprep.subr.bf16.mxu0 %v5675_v0  ;;  %v5678_v3 = vld [vmem:[%s7162_s0 + $0x18] sm:$0xff]   ;;  %v5683_v4 = vld [vmem:[%s7163_s1] sm:$0xff]   ;;  %v5680_v6 = vld [vmem:[%s7162_s0 + $0x28] sm:$0xff]  }
   0x3   :  { %5259 = vmatpush3.bf16.msra.mxu0 %v5675_v0  ;;  %5274 = vmatprep.mubr.bf16.mxu0 %v5683_v4  ;;  %v5679_v5 = vld [vmem:[%s7162_s0 + $0x20] sm:$0xff]   ;;  %v5681_v7 = vld [vmem:[%s7162_s0 + $0x30] sm:$0xff]   ;;  %v5682_v8 = vld [vmem:[%s7162_s0 + $0x38] sm:$0xff]  }
   0x4   :  { %5260 = vmatprep.subr.bf16.mxu0 %v5676_v1  ;;  %v5684_v9 = vld [vmem:[%s7163_s1 + $0x8] sm:$0xff]   ;;  %v5685_v10 = vld [vmem:[%s7163_s1 + $0x10] sm:$0xff]   ;;  %v5686_v11 = vld [vmem:[%s7163_s1 + $0x18] sm:$0xff]  }
   0x5   :  { %v5687_v12 = vld [vmem:[%s7163_s1 + $0x20] sm:$0xff]   ;;  %v5688_v13 = vld [vmem:[%s7163_s1 + $0x28] sm:$0xff]   ;;  %v5689_v14 = vld [vmem:[%s7163_s1 + $0x30] sm:$0xff]  }
   0x6   :  { %v5690_v15 = vld [vmem:[%s7163_s1 + $0x38] sm:$0xff]   ;;  %v5691_v16 = vld [vmem:[%s7163_s1 + $0x40] sm:$0xff]   ;;  %v5692_v17 = vld [vmem:[%s7163_s1 + $0x48] sm:$0xff]  }
   0x7   :  { %5261 = vmatpush3.bf16.msra.mxu0 %v5676_v1  ;;  %v5693_v18 = vld [vmem:[%s7163_s1 + $0x50] sm:$0xff]   ;;  %v5694_v19 = vld [vmem:[%s7163_s1 + $0x58] sm:$0xff]   ;;  %v5695_v20 = vld [vmem:[%s7163_s1 + $0x60] sm:$0xff]  }
   0x8   :  { %5262 = vmatprep.subr.bf16.mxu0 %v5677_v2  ;;  %v5696_v21 = vld [vmem:[%s7163_s1 + $0x68] sm:$0xff]   ;;  %v5697_v22 = vld [vmem:[%s7163_s1 + $0x70] sm:$0xff]   ;;  %v5698_v23 = vld [vmem:[%s7163_s1 + $0x78] sm:$0xff]  }
   0x9   :  { %v5699_v24 = vld [vmem:[%s7163_s1 + $0x80] sm:$0xff]   ;;  %v5700_v25 = vld [vmem:[%s7163_s1 + $0x88] sm:$0xff]   ;;  %v5701_v26 = vld [vmem:[%s7163_s1 + $0x90] sm:$0xff]  }
   0xa   :  { %v5702_v27 = vld [vmem:[%s7163_s1 + $0x98] sm:$0xff]   ;;  %v5703_v28 = vld [vmem:[%s7163_s1 + $0xa0] sm:$0xff]   ;;  %v5704_v29 = vld [vmem:[%s7163_s1 + $0xa8] sm:$0xff]  }
   0xb   :  { %5263 = vmatpush3.bf16.msra.mxu0 %v5677_v2  ;;  %v5705_v30 = vld [vmem:[%s7163_s1 + $0xb0] sm:$0xff]   ;;  %v5706_v31 = vld [vmem:[%s7163_s1 + $0xb8] sm:$0xff]   ;;  %v5707_v32 = vld [vmem:[%s7164_s3 + $0x40] sm:$0xff]  }
   0xc   :  { %5264 = vmatprep.subr.bf16.mxu0 %v5678_v3  ;;  %v5708_v33 = vld [vmem:[%s7164_s3] sm:$0xff]   ;;  %4762 = vmatprep.subr.bf16.mxu1 %v5707_v32  ;;  %v5709_v34 = vld [vmem:[%s7164_s3 + $0x48] sm:$0xff]   ;;  %v5711_v36 = vld [vmem:[%s7164_s3 + $0x50] sm:$0xff]  }
   0xd   :  { %4763 = vmatpush3.bf16.msra.mxu1 %v5708_v33  ;;  %v5710_v35 = vld [vmem:[%s7164_s3 + $0x8] sm:$0xff]   ;;  %v5712_v37 = vld [vmem:[%s7164_s3 + $0x10] sm:$0xff]   ;;  %v5713_v38 = vld [vmem:[%s7164_s3 + $0x58] sm:$0xff]  }
   0xe   :  { %4764 = vmatprep.subr.bf16.mxu1 %v5709_v34  ;;  %v5714_v39 = vld [vmem:[%s7164_s3 + $0x18] sm:$0xff]   ;;  %v5715_v40 = vld [vmem:[%s7164_s3 + $0x60] sm:$0xff]   ;;  %v5717_v42 = vld [vmem:[%s7164_s3 + $0x68] sm:$0xff]  }
   0xf   :  { %5265 = vmatpush3.bf16.msra.mxu0 %v5678_v3  ;;  %v5716_v41 = vld [vmem:[%s7164_s3 + $0x20] sm:$0xff]   ;;  %v5718_v43 = vld [vmem:[%s7164_s3 + $0x28] sm:$0xff]   ;;  %v5719_v44 = vld [vmem:[%s7164_s3 + $0x70] sm:$0xff]  }
  0x10   :  { %5266 = vmatprep.subr.bf16.mxu0 %v5679_v5  ;;  %v5720_v45 = vld [vmem:[%s7164_s3 + $0x30] sm:$0xff]   ;;  %v5721_v46 = vld [vmem:[%s7164_s3 + $0x78] sm:$0xff]   ;;  %v5723_v48 = vld [vmem:[%s7164_s3 + $0x80] sm:$0xff]  }
  0x11   :  { %4765 = vmatpush3.bf16.msra.mxu1 %v5710_v35  ;;  %v5722_v47 = vld [vmem:[%s7164_s3 + $0x38] sm:$0xff]   ;;  %v5729_v34 = vld [vmem:[%s7164_s3 + $0xb0] sm:$0xff]  }
  0x12   :  { %4766 = vmatprep.subr.bf16.mxu1 %v5711_v36 }
  0x13   :  { %5267 = vmatpush3.bf16.msra.mxu0 %v5679_v5 }
  0x14   :  { %5268 = vmatprep.subr.bf16.mxu0 %v5680_v6 }
  0x15   :  { %4767 = vmatpush3.bf16.msra.mxu1 %v5712_v37 }
  0x16   :  { %4768 = vmatprep.subr.bf16.mxu1 %v5713_v38 }
  0x17   :  { %5269 = vmatpush3.bf16.msra.mxu0 %v5680_v6 }
  0x18   :  { %5270 = vmatprep.subr.bf16.mxu0 %v5681_v7 }
  0x19   :  { %4769 = vmatpush3.bf16.msra.mxu1 %v5714_v39  ;;  %v5730_v39 = vld [vmem:[%s7164_s3 + $0xb8] sm:$0xff]  }
  0x1a   :  { %4770 = vmatprep.subr.bf16.mxu1 %v5715_v40 }
  0x1b   :  { %5271 = vmatpush3.bf16.msra.mxu0 %v5681_v7 }
  0x1c   :  { %5272 = vmatprep.subr.bf16.mxu0 %v5682_v8 }
  0x1d   :  { %4771 = vmatpush3.bf16.msra.mxu1 %v5716_v41 }
  0x1e   :  { %4772 = vmatprep.subr.bf16.mxu1 %v5717_v42 }
  0x1f   :  { %5273 = vmatpush3.bf16.msra.mxu0 %v5682_v8 }
  0x21   :  { %4773 = vmatpush3.bf16.msra.mxu1 %v5718_v43 }
  0x22   :  { %5275 = vmatmul.mubr.bf16.vlgmr.msra.gmra.mrb[0].mxu0 %v5684_v9  ;;  %4774 = vmatprep.subr.bf16.mxu1 %v5719_v44 }
  0x23   :  { %5278 = vmatprep.mubr.bf16.mxu0 %v5685_v10 }
  0x25   :  { %4775 = vmatpush3.bf16.msra.mxu1 %v5720_v45 }
  0x26   :  { %4776 = vmatprep.subr.bf16.mxu1 %v5721_v46 }
  0x29   :  { %4777 = vmatpush3.bf16.msra.mxu1 %v5722_v47 }
  0x2a   :  { %5279 = vmatmul.mubr.bf16.gmra.mrb[4].mxu0 %v5686_v11  ;;  %5322 = vmatprep.subr.bf16.mxu1 %v5723_v48 }
  0x2b   :  { %5282 = vmatprep.mubr.bf16.mxu0 %v5687_v12 }
  0x32   :  { %5283 = vmatmul.mubr.bf16.gmra.mrb[8].mxu0 %v5688_v13 }
  0x33   :  { %5286 = vmatprep.mubr.bf16.mxu0 %v5689_v14 }
  0x3a   :  { %5287 = vmatmul.mubr.bf16.gmra.mrb[12].mxu0 %v5690_v15  ;;  %v5724_v15 = vld [vmem:[%s7164_s3 + $0x88] sm:$0xff]  }
  0x3b   :  { %5290 = vmatprep.mubr.bf16.mxu0 %v5691_v16 }
  0x42   :  { %5291 = vmatmul.mubr.bf16.gmra.mrb[16].mxu0 %v5692_v17 }
  0x43   :  { %5294 = vmatprep.mubr.bf16.mxu0 %v5693_v18  ;;  %v5725_v18 = vld [vmem:[%s7164_s3 + $0x90] sm:$0xff]  }
  0x4a   :  { %5295 = vmatmul.mubr.bf16.gmra.mrb[20].mxu0 %v5694_v19 }
  0x4b   :  { %5298 = vmatprep.mubr.bf16.mxu0 %v5695_v20 }
  0x52   :  { %5299 = vmatmul.mubr.bf16.gmra.mrb[24].mxu0 %v5696_v21 }
  0x53   :  { %5302 = vmatprep.mubr.bf16.mxu0 %v5697_v22 }
  0x5a   :  { %5303 = vmatmul.mubr.bf16.gmra.mrb[28].mxu0 %v5698_v23  ;;  %v5726_v23 = vld [vmem:[%s7164_s3 + $0x98] sm:$0xff]  }
  0x5b   :  { %5306 = vmatprep.mubr.bf16.mxu0 %v5699_v24 }
  0x62   :  { %5307 = vmatmul.mubr.bf16.gmra.mrb[32].mxu0 %v5700_v25 }
  0x63   :  { %5310 = vmatprep.mubr.bf16.mxu0 %v5701_v26  ;;  %v5727_v26 = vld [vmem:[%s7164_s3 + $0xa0] sm:$0xff]  }
  0x6a   :  { %5311 = vmatmul.mubr.bf16.gmra.mrb[36].mxu0 %v5702_v27 }
  0x6b   :  { %5314 = vmatprep.mubr.bf16.mxu0 %v5703_v28 }
  0x72   :  { %5315 = vmatmul.mubr.bf16.gmra.mrb[40].mxu0 %v5704_v29 }
  0x73   :  { %5318 = vmatprep.mubr.bf16.mxu0 %v5705_v30 }
  0x7a   :  { %5319 = vmatmul.mubr.bf16.gmra.mrb[44].mxu0 %v5706_v31  ;;  %v5728_v31 = vld [vmem:[%s7164_s3 + $0xa8] sm:$0xff]  }
  0xf5   :  { %v5276_v49 = vpop.f32.mrb[0].mxu0 }
  0xf6   :  { %v335_v50 = vpop.f32.mrb[1].mxu0 }
  0xf7   :  { %v5277_v51 = vpop.f32.mrb[2].mxu0 }
  0xf8   :  { %v527_v52 = vpack.c.bf16 %v5277_v51, %v5276_v49  ;;  %v338_v53 = vpop.f32.mrb[3].mxu0 }
  0xf9   :  { %v526_v54 = vpack.c.bf16 %v338_v53, %v335_v50 }
  0xfd   :  { %v6149_v55 = vpop.f32.mrb[4].mxu0 }
  0xfe   :  { %v351_v56 = vpop.f32.mrb[5].mxu0 }
  0xff   :  { %v6151_v57 = vpop.f32.mrb[6].mxu0 }
 0x100   :  { %v529_v58 = vpack.c.bf16 %v6151_v57, %v6149_v55  ;;  %v354_v59 = vpop.f32.mrb[7].mxu0 }
 0x101   :  { %v528_v60 = vpack.c.bf16 %v354_v59, %v351_v56 }
 0x105   :  { %v6155_v61 = vpop.f32.mrb[8].mxu0 }
 0x106   :  { %v6157_v62 = vpop.f32.mrb[9].mxu0 }
 0x107   :  { %v6159_v63 = vpop.f32.mrb[10].mxu0 }
 0x108   :  { %v531_v0 = vpack.c.bf16 %v6159_v63, %v6155_v61  ;;  %v6163_v1 = vpop.f32.mrb[11].mxu0  ;;  %v5731_v61 = vld [vmem:[%s7163_s1] sm:$0xff]  }
 0x109   :  { %v530_v2 = vpack.c.bf16 %v6163_v1, %v6157_v62  ;;  %5370 = vmatprep.mubr.bf16.mxu0 %v5731_v61 }
 0x10d   :  { %v6167_v3 = vpop.f32.mrb[12].mxu0 }
 0x10e   :  { %v6169_v4 = vpop.f32.mrb[13].mxu0 }
 0x10f   :  { %v6171_v5 = vpop.f32.mrb[14].mxu0 }
 0x110   :  { %v533_v6 = vpack.c.bf16 %v6171_v5, %v6167_v3  ;;  %v6175_v7 = vpop.f32.mrb[15].mxu0 }
 0x111   :  { %v532_v8 = vpack.c.bf16 %v6175_v7, %v6169_v4 }
 0x115   :  { %v5292_v9 = vpop.f32.mrb[16].mxu0 }
 0x116   :  { %v399_v10 = vpop.f32.mrb[17].mxu0 }
 0x117   :  { %v5293_v11 = vpop.f32.mrb[18].mxu0 }
 0x118   :  { %v543_v12 = vpack.c.bf16 %v5293_v11, %v5292_v9  ;;  %v402_v13 = vpop.f32.mrb[19].mxu0 }
 0x119   :  { %v542_v14 = vpack.c.bf16 %v402_v13, %v399_v10 }
 0x11b   :  { %829 = vmatprep.mubr.bf16.mxu1 %v542_v14 }
 0x11c   :  { %830 = vmatmul.mubr.bf16.vlgmr.msra.gmra.mrb[0].mxu1 %v526_v54 }
 0x11d   :  { %837 = vmatprep.mubr.bf16.mxu1 %v543_v12  ;;  %v5296_v16 = vpop.f32.mrb[20].mxu0  ;;  %5323 = vmatpush3.bf16.msra.mxu1 %v5723_v48 }
 0x11e   :  { %v415_v17 = vpop.f32.mrb[21].mxu0  ;;  %5324 = vmatprep.subr.bf16.mxu1 %v5724_v15 }
 0x11f   :  { %v5297_v19 = vpop.f32.mrb[22].mxu0 }
 0x120   :  { %v545_v20 = vpack.c.bf16 %v5297_v19, %v5296_v16  ;;  %v418_v21 = vpop.f32.mrb[23].mxu0 }
 0x121   :  { %v544_v22 = vpack.c.bf16 %v418_v21, %v415_v17  ;;  %5325 = vmatpush3.bf16.msra.mxu1 %v5724_v15 }
 0x122   :  { %5326 = vmatprep.subr.bf16.mxu1 %v5725_v18 }
 0x124   :  { %838 = vmatmul.mubr.bf16.gmra.mrb[4].mxu1 %v527_v52 }
 0x125   :  { %845 = vmatprep.mubr.bf16.mxu1 %v544_v22  ;;  %v5300_v24 = vpop.f32.mrb[24].mxu0  ;;  %5327 = vmatpush3.bf16.msra.mxu1 %v5725_v18 }
 0x126   :  { %v431_v25 = vpop.f32.mrb[25].mxu0  ;;  %5328 = vmatprep.subr.bf16.mxu1 %v5726_v23 }
 0x127   :  { %v5301_v27 = vpop.f32.mrb[26].mxu0 }
 0x128   :  { %v547_v28 = vpack.c.bf16 %v5301_v27, %v5300_v24  ;;  %v434_v29 = vpop.f32.mrb[27].mxu0 }
 0x129   :  { %v546_v30 = vpack.c.bf16 %v434_v29, %v431_v25  ;;  %5329 = vmatpush3.bf16.msra.mxu1 %v5726_v23 }
 0x12a   :  { %5330 = vmatprep.subr.bf16.mxu1 %v5727_v26 }
 0x12c   :  { %846 = vmatmul.mubr.bf16.gmra.mrb[8].mxu1 %v528_v60 }
 0x12d   :  { %853 = vmatprep.mubr.bf16.mxu1 %v545_v20  ;;  %v5304_v32 = vpop.f32.mrb[28].mxu0  ;;  %5331 = vmatpush3.bf16.msra.mxu1 %v5727_v26 }
 0x12e   :  { %v447_v33 = vpop.f32.mrb[29].mxu0  ;;  %5332 = vmatprep.subr.bf16.mxu1 %v5728_v31 }
 0x12f   :  { %v5305_v35 = vpop.f32.mrb[30].mxu0 }
 0x130   :  { %v549_v36 = vpack.c.bf16 %v5305_v35, %v5304_v32  ;;  %v450_v37 = vpop.f32.mrb[31].mxu0 }
 0x131   :  { %v548_v38 = vpack.c.bf16 %v450_v37, %v447_v33  ;;  %5333 = vmatpush3.bf16.msra.mxu1 %v5728_v31 }
 0x132   :  { %5334 = vmatprep.subr.bf16.mxu1 %v5729_v34 }
 0x134   :  { %854 = vmatmul.mubr.bf16.gmra.mrb[12].mxu1 %v529_v58 }
 0x135   :  { %861 = vmatprep.mubr.bf16.mxu1 %v546_v30  ;;  %v5308_v40 = vpop.f32.mrb[32].mxu0  ;;  %5335 = vmatpush3.bf16.msra.mxu1 %v5729_v34 }
 0x136   :  { %v463_v41 = vpop.f32.mrb[33].mxu0  ;;  %5336 = vmatprep.subr.bf16.mxu1 %v5730_v39 }
 0x137   :  { %v5309_v42 = vpop.f32.mrb[34].mxu0 }
 0x138   :  { %v559_v43 = vpack.c.bf16 %v5309_v42, %v5308_v40  ;;  %v466_v44 = vpop.f32.mrb[35].mxu0 }
 0x139   :  { %v558_v45 = vpack.c.bf16 %v466_v44, %v463_v41  ;;  %5337 = vmatpush3.bf16.msra.mxu1 %v5730_v39 }
 0x13c   :  { %862 = vmatmul.mubr.bf16.gmra.mrb[16].mxu1 %v530_v2 }
 0x13d   :  { %869 = vmatprep.mubr.bf16.mxu1 %v547_v28  ;;  %v5312_v46 = vpop.f32.mrb[36].mxu0 }
 0x13e   :  { %v479_v47 = vpop.f32.mrb[37].mxu0 }
 0x13f   :  { %v5313_v48 = vpop.f32.mrb[38].mxu0 }
 0x140   :  { %v561_v49 = vpack.c.bf16 %v5313_v48, %v5312_v46  ;;  %v482_v50 = vpop.f32.mrb[39].mxu0 }
 0x141   :  { %v560_v51 = vpack.c.bf16 %v482_v50, %v479_v47 }
 0x144   :  { %870 = vmatmul.mubr.bf16.gmra.mrb[20].mxu1 %v531_v0 }
 0x145   :  { %877 = vmatprep.mubr.bf16.mxu1 %v548_v38  ;;  %v5316_v52 = vpop.f32.mrb[40].mxu0 }
 0x146   :  { %v495_v53 = vpop.f32.mrb[41].mxu0 }
 0x147   :  { %v5317_v54 = vpop.f32.mrb[42].mxu0 }
 0x148   :  { %v563_v55 = vpack.c.bf16 %v5317_v54, %v5316_v52  ;;  %v498_v56 = vpop.f32.mrb[43].mxu0 }
 0x149   :  { %v562_v57 = vpack.c.bf16 %v498_v56, %v495_v53 }
 0x14c   :  { %878 = vmatmul.mubr.bf16.gmra.mrb[24].mxu1 %v532_v8 }
 0x14d   :  { %885 = vmatprep.mubr.bf16.mxu1 %v549_v36  ;;  %v5320_v58 = vpop.f32.mrb[44].mxu0 }
 0x14e   :  { %v511_v59 = vpop.f32.mrb[45].mxu0 }
 0x14f   :  { %v5321_v60 = vpop.f32.mrb[46].mxu0 }
 0x150   :  { %v565_v62 = vpack.c.bf16 %v5321_v60, %v5320_v58  ;;  %v514_v1 = vpop.f32.mrb[47].mxu0 }
 0x151   :  { %v564_v2 = vpack.c.bf16 %v514_v1, %v511_v59 }
 0x154   :  { %886 = vmatmul.mubr.bf16.gmra.mrb[28].mxu1 %v533_v6 }
 0x155   :  { %5338 = vmatprep.mubr.bf16.mxu1 %v558_v45 }
 0x15c   :  { %5339 = vmatmul.mubr.bf16.vlgmr.msra.gmra.mrb[32].mxu1 %v559_v43 }
 0x15d   :  { %5342 = vmatprep.mubr.bf16.mxu1 %v560_v51 }
 0x164   :  { %5343 = vmatmul.mubr.bf16.gmra.mrb[36].mxu1 %v561_v49  ;;  %v6233_v49 = vld [vmem:[%s7165_s8] ss:$0 sm:$0xff] }
 0x165   :  { %5346 = vmatprep.mubr.bf16.mxu1 %v562_v57 }
 0x16c   :  { %5347 = vmatmul.mubr.bf16.gmra.mrb[40].mxu1 %v563_v55 }
 0x16d   :  { %5350 = vmatprep.mubr.bf16.mxu1 %v564_v2 }
 0x174   :  { %5351 = vmatmul.mubr.bf16.gmra.mrb[44].mxu1 %v565_v62 }
 0x1ef   :  { %v4778_v63 = vpop.f32.mrb[0].mxu1 }
 0x1f0   :  { %v4779_v0 = vpop.f32.mrb[1].mxu1 }
 0x1f1   :  { %v4780_v4 = vadd.f32 %v4779_v0, %v4778_v63  ;;  %v4781_v7 = vpop.f32.mrb[2].mxu1 }
 0x1f2   :  { %v4782_v8 = vpop.f32.mrb[3].mxu1 }
 0x1f3   :  { %v4783_v3 = vadd.f32 %v4782_v8, %v4781_v7  ;;  %v832_v52 = vadd.f32 %v4780_v4, %v6233_v49 }
 0x1f5   :  { %v835_v58 = vadd.f32 %v4783_v3, %v6233_v49 }
 0x1f7   :  { %v4784_v5 = vpop.f32.mrb[4].mxu1 }
 0x1f8   :  { %v4785_v6 = vpop.f32.mrb[5].mxu1 }
 0x1f9   :  { %v4786_v9 = vadd.f32 %v4785_v6, %v4784_v5  ;;  %v4787_v10 = vpop.f32.mrb[6].mxu1 }
 0x1fa   :  { %v4788_v11 = vpop.f32.mrb[7].mxu1 }
 0x1fb   :  { %v4789_v12 = vadd.f32 %v4788_v11, %v4787_v10  ;;  %v840_v50 = vadd.f32 %v4786_v9, %v6233_v49 }
 0x1fd   :  { %v843_v55 = vadd.f32 %v4789_v12, %v6233_v49 }
 0x1ff   :  { %v4790_v13 = vpop.f32.mrb[8].mxu1 }
 0x200   :  { %v4791_v14 = vpop.f32.mrb[9].mxu1 }
 0x201   :  { %v4792_v15 = vadd.f32 %v4791_v14, %v4790_v13  ;;  %v4793_v16 = vpop.f32.mrb[10].mxu1 }
 0x202   :  { %v4794_v17 = vpop.f32.mrb[11].mxu1 }
 0x203   :  { %v4795_v18 = vadd.f32 %v4794_v17, %v4793_v16  ;;  %v848_v5 = vadd.f32 %v4792_v15, %v6233_v49 }
 0x205   :  { %v851_v12 = vadd.f32 %v4795_v18, %v6233_v49 }
 0x207   :  { %v4796_v19 = vpop.f32.mrb[12].mxu1 }
 0x208   :  { %v4797_v20 = vpop.f32.mrb[13].mxu1 }
 0x209   :  { %v4798_v21 = vadd.f32 %v4797_v20, %v4796_v19  ;;  %v4799_v22 = vpop.f32.mrb[14].mxu1 }
 0x20a   :  { %v4800_v23 = vpop.f32.mrb[15].mxu1 }
 0x20b   :  { %v4801_v24 = vadd.f32 %v4800_v23, %v4799_v22  ;;  %v856_v7 = vadd.f32 %v4798_v21, %v6233_v49 }
 0x20d   :  { %v859_v10 = vadd.f32 %v4801_v24, %v6233_v49 }
 0x20f   :  { %v4802_v25 = vpop.f32.mrb[16].mxu1 }
 0x210   :  { %v4803_v26 = vpop.f32.mrb[17].mxu1 }
 0x211   :  { %v6218_v27 = vadd.f32 %v4803_v26, %v4802_v25  ;;  %v4805_v28 = vpop.f32.mrb[18].mxu1 }
 0x212   :  { %v4806_v29 = vpop.f32.mrb[19].mxu1 }
 0x213   :  { %v6220_v30 = vadd.f32 %v4806_v29, %v4805_v28  ;;  %v864_v25 = vadd.f32 %v6218_v27, %v6233_v49 }
 0x217   :  { %v4808_v31 = vpop.f32.mrb[20].mxu1 }
 0x218   :  { %v4809_v32 = vpop.f32.mrb[21].mxu1 }
 0x219   :  { %v4810_v33 = vadd.f32 %v4809_v32, %v4808_v31  ;;  %v4811_v34 = vpop.f32.mrb[22].mxu1  ;;  %v867_v32 = vadd.f32 %v6220_v30, %v6233_v49 }
 0x21a   :  { %v4812_v35 = vpop.f32.mrb[23].mxu1 }
 0x21b   :  { %v4813_v36 = vadd.f32 %v4812_v35, %v4811_v34  ;;  %v872_v15 = vadd.f32 %v4810_v33, %v6233_v49 }
 0x21d   :  { %v875_v28 = vadd.f32 %v4813_v36, %v6233_v49 }
 0x21f   :  { %v4814_v37 = vpop.f32.mrb[24].mxu1 }
 0x220   :  { %v4815_v38 = vpop.f32.mrb[25].mxu1 }
 0x221   :  { %v6222_v39 = vadd.f32 %v4815_v38, %v4814_v37  ;;  %v4817_v40 = vpop.f32.mrb[26].mxu1 }
 0x222   :  { %v4818_v41 = vpop.f32.mrb[27].mxu1 }
 0x223   :  { %v6224_v42 = vadd.f32 %v4818_v41, %v4817_v40 }
 0x227   :  { %v4820_v43 = vpop.f32.mrb[28].mxu1 }
 0x228   :  { %v4821_v44 = vpop.f32.mrb[29].mxu1 }
 0x229   :  { %v6226_v45 = vadd.f32 %v4821_v44, %v4820_v43  ;;  %v4823_v46 = vpop.f32.mrb[30].mxu1 }
 0x22a   :  { %v4824_v47 = vpop.f32.mrb[31].mxu1 }
 0x22b   :  { %v6228_v48 = vadd.f32 %v4824_v47, %v4823_v46  ;;  %v888_v36 = vadd.f32 %v6226_v45, %v6233_v49  ;;  %v880_v46 = vadd.f32 %v6222_v39, %v6233_v49 }
 0x22f   :  { %v5340_v51 = vpop.f32.mrb[32].mxu1 }
 0x230   :  { %v937_v53 = vadd.f32 %v5340_v51, %v840_v50  ;;  %v928_v54 = vpop.f32.mrb[33].mxu1  ;;  %v891_v50 = vadd.f32 %v6228_v48, %v6233_v49  ;;  %v5732_v48 = vld [vmem:[%s7163_s1 + $0x8] sm:$0xff]  }
 0x231   :  { %v929_v56 = vadd.f32 %v928_v54, %v832_v52  ;;  %v5341_v57 = vpop.f32.mrb[34].mxu1 }
 0x232   :  { %v940_v59 = vadd.f32 %v5341_v57, %v843_v55  ;;  %v931_v60 = vpop.f32.mrb[35].mxu1  ;;  %v993_v1 = vmax.f32 %v937_v53, 0.0  ;;  %v883_v53 = vadd.f32 %v6224_v42, %v6233_v49  ;;  %v5733_v42 = vld [vmem:[%s7163_s1 + $0x10] sm:$0xff]   ;;  %v5734_v49 = vld [vmem:[%s7163_s1 + $0x18] sm:$0xff]  }
 0x233   :  { %v932_v62 = vadd.f32 %v931_v60, %v835_v58  ;;  %v991_v61 = vmax.f32 %v929_v56, 0.0 }
 0x234   :  { %v994_v2 = vmax.f32 %v940_v59, 0.0 }
 0x235   :  { %v992_v63 = vmax.f32 %v932_v62, 0.0  ;;  %v5735_v62 = vld [vmem:[%s7163_s1 + $0x20] sm:$0xff]  }
 0x236   :  { %v1008_v0 = vpack.c.bf16 %v994_v2, %v993_v1  ;;  %v5736_v1 = vld [vmem:[%s7163_s1 + $0x28] sm:$0xff]   ;;  %v5737_v2 = vld [vmem:[%s7163_s1 + $0x30] sm:$0xff]  }
 0x237   :  { %v1007_v8 = vpack.c.bf16 %v992_v63, %v991_v61  ;;  %v5344_v4 = vpop.f32.mrb[36].mxu1  ;;  %v5738_v61 = vld [vmem:[%s7163_s1 + $0x38] sm:$0xff]   ;;  %v5739_v63 = vld [vmem:[%s7163_s1 + $0x40] sm:$0xff]  }
 0x238   :  { %v953_v6 = vadd.f32 %v5344_v4, %v856_v7  ;;  %v944_v9 = vpop.f32.mrb[37].mxu1  ;;  %v5741_v7 = vld [vmem:[%s7163_s1 + $0x50] sm:$0xff]   ;;  %v5743_v4 = vld [vmem:[%s7163_s1 + $0x60] sm:$0xff]  }
 0x239   :  { %v945_v11 = vadd.f32 %v944_v9, %v848_v5  ;;  %v5345_v3 = vpop.f32.mrb[38].mxu1  ;;  %5354 = vmatprep.subr.bf16.mxu0 %v1007_v8  ;;  %v5744_v5 = vld [vmem:[%s7163_s1 + $0x68] sm:$0xff]   ;;  %v5746_v9 = vld [vmem:[%s7163_s1 + $0x78] sm:$0xff]  }
 0x23a   :  { %v956_v13 = vadd.f32 %v5345_v3, %v859_v10  ;;  %v947_v14 = vpop.f32.mrb[39].mxu1  ;;  %5355 = vmatpush3.bf16.msra.mxu0 %v1007_v8  ;;  %v997_v17 = vmax.f32 %v953_v6, 0.0  ;;  %v5742_v8 = vld [vmem:[%s7163_s1 + $0x58] sm:$0xff]   ;;  %v5745_v6 = vld [vmem:[%s7163_s1 + $0x70] sm:$0xff]   ;;  %v5747_v10 = vld [vmem:[%s7163_s1 + $0x80] sm:$0xff]  }
 0x23b   :  { %v948_v16 = vadd.f32 %v947_v14, %v851_v12  ;;  %5356 = vmatprep.subr.bf16.mxu0 %v1008_v0  ;;  %v995_v20 = vmax.f32 %v945_v11, 0.0  ;;  %v5748_v11 = vld [vmem:[%s7163_s1 + $0x88] sm:$0xff]   ;;  %v5749_v3 = vld [vmem:[%s7163_s1 + $0x90] sm:$0xff]   ;;  %v5750_v12 = vld [vmem:[%s7163_s1 + $0x98] sm:$0xff]  }
 0x23c   :  { %v998_v19 = vmax.f32 %v956_v13, 0.0  ;;  %v5751_v13 = vld [vmem:[%s7163_s1 + $0xa0] sm:$0xff]   ;;  %v5752_v14 = vld [vmem:[%s7163_s1 + $0xa8] sm:$0xff]  }
 0x23d   :  { %v996_v21 = vmax.f32 %v948_v16, 0.0  ;;  %v5753_v16 = vld [vmem:[%s7163_s1 + $0xb0] sm:$0xff]  }
 0x23e   :  { %v1010_v22 = vpack.c.bf16 %v998_v19, %v997_v17  ;;  %5357 = vmatpush3.bf16.msra.mxu0 %v1008_v0  ;;  %v5740_v0 = vld [vmem:[%s7163_s1 + $0x48] sm:$0xff]   ;;  %v5754_v17 = vld [vmem:[%s7163_s1 + $0xb8] sm:$0xff]   ;;  %v5755_v19 = vld [vmem:[%s7166_s4 + $0x40] sm:$0xff]  }
 0x23f   :  { %v1009_v23 = vpack.c.bf16 %v996_v21, %v995_v20  ;;  %v5348_v24 = vpop.f32.mrb[40].mxu1  ;;  %v5756_v20 = vld [vmem:[%s7166_s4] sm:$0xff]   ;;  %4874 = vmatprep.subr.bf16.mxu1 %v5755_v19  ;;  %v5757_v21 = vld [vmem:[%s7166_s4 + $0x48] sm:$0xff]  }
 0x240   :  { %v969_v26 = vadd.f32 %v5348_v24, %v872_v15  ;;  %v960_v18 = vpop.f32.mrb[41].mxu1  ;;  %4875 = vmatpush3.bf16.msra.mxu1 %v5756_v20  ;;  %v5759_v15 = vld [vmem:[%s7166_s4 + $0x50] sm:$0xff]   ;;  %v5761_v24 = vld [vmem:[%s7166_s4 + $0x58] sm:$0xff]  }
 0x241   :  { %v961_v29 = vadd.f32 %v960_v18, %v864_v25  ;;  %v5349_v31 = vpop.f32.mrb[42].mxu1  ;;  %5358 = vmatprep.subr.bf16.mxu0 %v1009_v23  ;;  %4876 = vmatprep.subr.bf16.mxu1 %v5757_v21  ;;  %v5762_v25 = vld [vmem:[%s7166_s4 + $0x18] sm:$0xff]   ;;  %v5764_v18 = vld [vmem:[%s7166_s4 + $0x20] sm:$0xff]   ;;  %v5777_v21 = vld [vmem:[%s7166_s4 + $0xb0] sm:$0xff]  }
 0x242   :  { %v972_v34 = vadd.f32 %v5349_v31, %v875_v28  ;;  %v963_v35 = vpop.f32.mrb[43].mxu1  ;;  %5359 = vmatpush3.bf16.msra.mxu0 %v1009_v23  ;;  %v1001_v33 = vmax.f32 %v969_v26, 0.0  ;;  %v5760_v23 = vld [vmem:[%s7166_s4 + $0x10] sm:$0xff]   ;;  %v5763_v26 = vld [vmem:[%s7166_s4 + $0x60] sm:$0xff]   ;;  %v5765_v28 = vld [vmem:[%s7166_s4 + $0x68] sm:$0xff]  }
 0x243   :  { %v964_v37 = vadd.f32 %v963_v35, %v867_v32  ;;  %5360 = vmatprep.subr.bf16.mxu0 %v1010_v22  ;;  %v999_v40 = vmax.f32 %v961_v29, 0.0  ;;  %v5766_v29 = vld [vmem:[%s7166_s4 + $0x28] sm:$0xff]   ;;  %v5767_v31 = vld [vmem:[%s7166_s4 + $0x70] sm:$0xff]   ;;  %v5770_v35 = vld [vmem:[%s7166_s4 + $0x38] sm:$0xff]  }
 0x244   :  { %v1002_v38 = vmax.f32 %v972_v34, 0.0  ;;  %v5768_v32 = vld [vmem:[%s7166_s4 + $0x30] sm:$0xff]   ;;  %v5769_v34 = vld [vmem:[%s7166_s4 + $0x78] sm:$0xff]  }
 0x245   :  { %v1000_v41 = vmax.f32 %v964_v37, 0.0  ;;  %v5771_v37 = vld [vmem:[%s7166_s4 + $0x80] sm:$0xff]  }
 0x246   :  { %v1012_v27 = vpack.c.bf16 %v1002_v38, %v1001_v33  ;;  %5361 = vmatpush3.bf16.msra.mxu0 %v1010_v22  ;;  %v5758_v22 = vld [vmem:[%s7166_s4 + $0x8] sm:$0xff]  }
 0x247   :  { %v1011_v43 = vpack.c.bf16 %v1000_v41, %v999_v40  ;;  %v5352_v44 = vpop.f32.mrb[44].mxu1  ;;  %4877 = vmatpush3.bf16.msra.mxu1 %v5758_v22 }
 0x248   :  { %v985_v30 = vadd.f32 %v5352_v44, %v888_v36  ;;  %v976_v47 = vpop.f32.mrb[45].mxu1  ;;  %4878 = vmatprep.subr.bf16.mxu1 %v5759_v15 }
 0x249   :  { %v977_v51 = vadd.f32 %v976_v47, %v880_v46  ;;  %v5353_v52 = vpop.f32.mrb[46].mxu1  ;;  %5362 = vmatprep.subr.bf16.mxu0 %v1011_v43 }
 0x24a   :  { %v988_v54 = vadd.f32 %v5353_v52, %v891_v50  ;;  %v979_v55 = vpop.f32.mrb[47].mxu1  ;;  %5363 = vmatpush3.bf16.msra.mxu0 %v1011_v43  ;;  %v1005_v56 = vmax.f32 %v985_v30, 0.0 }
 0x24b   :  { %v980_v45 = vadd.f32 %v979_v55, %v883_v53  ;;  %5364 = vmatprep.subr.bf16.mxu0 %v1012_v27  ;;  %v1003_v58 = vmax.f32 %v977_v51, 0.0  ;;  %4879 = vmatpush3.bf16.msra.mxu1 %v5760_v23 }
 0x24c   :  { %v1006_v57 = vmax.f32 %v988_v54, 0.0  ;;  %4880 = vmatprep.subr.bf16.mxu1 %v5761_v24 }
 0x24d   :  { %v1004_v39 = vmax.f32 %v980_v45, 0.0 }
 0x24e   :  { %v1014_v59 = vpack.c.bf16 %v1006_v57, %v1005_v56  ;;  %5365 = vmatpush3.bf16.msra.mxu0 %v1012_v27 }
 0x24f   :  { %v1013_v60 = vpack.c.bf16 %v1004_v39, %v1003_v58  ;;  %4881 = vmatpush3.bf16.msra.mxu1 %v5762_v25  ;;  %v5778_v25 = vld [vmem:[%s7166_s4 + $0xb8] sm:$0xff]  }
 0x250   :  { %4882 = vmatprep.subr.bf16.mxu1 %v5763_v26 }
 0x251   :  { %5366 = vmatprep.subr.bf16.mxu0 %v1013_v60 }
 0x252   :  { %5367 = vmatpush3.bf16.msra.mxu0 %v1013_v60 }
 0x253   :  { %5368 = vmatprep.subr.bf16.mxu0 %v1014_v59  ;;  %4883 = vmatpush3.bf16.msra.mxu1 %v5764_v18 }
 0x254   :  { %4884 = vmatprep.subr.bf16.mxu1 %v5765_v28 }
 0x256   :  { %5369 = vmatpush3.bf16.msra.mxu0 %v1014_v59 }
 0x257   :  { %4885 = vmatpush3.bf16.msra.mxu1 %v5766_v29 }
 0x258   :  { %4886 = vmatprep.subr.bf16.mxu1 %v5767_v31 }
 0x259   :  { %5371 = vmatmul.mubr.bf16.vlgmr.msra.gmra.mrb[48].mxu0 %v5732_v48 }
 0x25a   :  { %5374 = vmatprep.mubr.bf16.mxu0 %v5733_v42 }
 0x25b   :  { %4887 = vmatpush3.bf16.msra.mxu1 %v5768_v32 }
 0x25c   :  { %4888 = vmatprep.subr.bf16.mxu1 %v5769_v34 }
 0x25f   :  { %4889 = vmatpush3.bf16.msra.mxu1 %v5770_v35 }
 0x260   :  { %5418 = vmatprep.subr.bf16.mxu1 %v5771_v37 }
 0x261   :  { %5375 = vmatmul.mubr.bf16.gmra.mrb[52].mxu0 %v5734_v49 }
 0x262   :  { %5378 = vmatprep.mubr.bf16.mxu0 %v5735_v62 }
 0x269   :  { %5379 = vmatmul.mubr.bf16.gmra.mrb[56].mxu0 %v5736_v1 }
 0x26a   :  { %5382 = vmatprep.mubr.bf16.mxu0 %v5737_v2 }
 0x271   :  { %5383 = vmatmul.mubr.bf16.gmra.mrb[60].mxu0 %v5738_v61  ;;  %v5772_v61 = vld [vmem:[%s7166_s4 + $0x88] sm:$0xff]  }
 0x272   :  { %5386 = vmatprep.mubr.bf16.mxu0 %v5739_v63 }
 0x279   :  { %5387 = vmatmul.mubr.bf16.gmra.mrb[64].mxu0 %v5740_v0 }
 0x27a   :  { %5390 = vmatprep.mubr.bf16.mxu0 %v5741_v7  ;;  %v5773_v7 = vld [vmem:[%s7166_s4 + $0x90] sm:$0xff]  }
 0x281   :  { %5391 = vmatmul.mubr.bf16.gmra.mrb[68].mxu0 %v5742_v8 }
 0x282   :  { %5394 = vmatprep.mubr.bf16.mxu0 %v5743_v4 }
 0x289   :  { %5395 = vmatmul.mubr.bf16.gmra.mrb[72].mxu0 %v5744_v5 }
 0x28a   :  { %5398 = vmatprep.mubr.bf16.mxu0 %v5745_v6 }
 0x291   :  { %5399 = vmatmul.mubr.bf16.gmra.mrb[76].mxu0 %v5746_v9  ;;  %v5774_v9 = vld [vmem:[%s7166_s4 + $0x98] sm:$0xff]  }
 0x292   :  { %5402 = vmatprep.mubr.bf16.mxu0 %v5747_v10 }
 0x299   :  { %5403 = vmatmul.mubr.bf16.gmra.mrb[80].mxu0 %v5748_v11 }
 0x29a   :  { %5406 = vmatprep.mubr.bf16.mxu0 %v5749_v3  ;;  %v5775_v3 = vld [vmem:[%s7166_s4 + $0xa0] sm:$0xff]  }
 0x2a1   :  { %5407 = vmatmul.mubr.bf16.gmra.mrb[84].mxu0 %v5750_v12 }
 0x2a2   :  { %5410 = vmatprep.mubr.bf16.mxu0 %v5751_v13 }
 0x2a9   :  { %5411 = vmatmul.mubr.bf16.gmra.mrb[88].mxu0 %v5752_v14 }
 0x2aa   :  { %5414 = vmatprep.mubr.bf16.mxu0 %v5753_v16 }
 0x2b1   :  { %5415 = vmatmul.mubr.bf16.gmra.mrb[92].mxu0 %v5754_v17  ;;  %v5776_v17 = vld [vmem:[%s7166_s4 + $0xa8] sm:$0xff]  }
 0x32c   :  { %v5372_v33 = vpop.f32.mrb[48].mxu0 }
 0x32d   :  { %v1241_v38 = vpop.f32.mrb[49].mxu0 }
 0x32e   :  { %v5373_v40 = vpop.f32.mrb[50].mxu0 }
 0x32f   :  { %v1433_v41 = vpack.c.bf16 %v5373_v40, %v5372_v33  ;;  %v1244_v27 = vpop.f32.mrb[51].mxu0 }
 0x330   :  { %v1432_v36 = vpack.c.bf16 %v1244_v27, %v1241_v38 }
 0x334   :  { %v6377_v43 = vpop.f32.mrb[52].mxu0 }
 0x335   :  { %v1257_v44 = vpop.f32.mrb[53].mxu0 }
 0x336   :  { %v6379_v46 = vpop.f32.mrb[54].mxu0 }
 0x337   :  { %v1435_v30 = vpack.c.bf16 %v6379_v46, %v6377_v43  ;;  %v1260_v47 = vpop.f32.mrb[55].mxu0 }
 0x338   :  { %v1434_v50 = vpack.c.bf16 %v1260_v47, %v1257_v44 }
 0x33c   :  { %v6383_v51 = vpop.f32.mrb[56].mxu0 }
 0x33d   :  { %v6385_v52 = vpop.f32.mrb[57].mxu0 }
 0x33e   :  { %v6387_v53 = vpop.f32.mrb[58].mxu0 }
 0x33f   :  { %v1437_v54 = vpack.c.bf16 %v6387_v53, %v6383_v51  ;;  %v6391_v55 = vpop.f32.mrb[59].mxu0  ;;  %v5779_v51 = vld [vmem:[%s7163_s1] sm:$0xff]  }
 0x340   :  { %v1436_v45 = vpack.c.bf16 %v6391_v55, %v6385_v52  ;;  %5466 = vmatprep.mubr.bf16.mxu0 %v5779_v51  ;;  %v5803_v51 = vld [vmem:[%s7168_s5 + $0x40] sm:$0xff]  }
 0x344   :  { %v6395_v56 = vpop.f32.mrb[60].mxu0 }
 0x345   :  { %v6397_v57 = vpop.f32.mrb[61].mxu0 }
 0x346   :  { %v6399_v58 = vpop.f32.mrb[62].mxu0 }
 0x347   :  { %v1439_v39 = vpack.c.bf16 %v6399_v58, %v6395_v56  ;;  %v6403_v59 = vpop.f32.mrb[63].mxu0 }
 0x348   :  { %v1438_v60 = vpack.c.bf16 %v6403_v59, %v6397_v57 }
 0x34c   :  { %v5388_v48 = vpop.f32.mrb[64].mxu0 }
 0x34d   :  { %v1305_v42 = vpop.f32.mrb[65].mxu0 }
 0x34e   :  { %v5389_v49 = vpop.f32.mrb[66].mxu0 }
 0x34f   :  { %v1449_v62 = vpack.c.bf16 %v5389_v49, %v5388_v48  ;;  %v1308_v1 = vpop.f32.mrb[67].mxu0 }
 0x350   :  { %v1448_v2 = vpack.c.bf16 %v1308_v1, %v1305_v42 }
 0x352   :  { %1735 = vmatprep.mubr.bf16.mxu1 %v1448_v2 }
 0x353   :  { %1736 = vmatmul.mubr.bf16.vlgmr.msra.gmra.mrb[48].mxu1 %v1432_v36 }
 0x354   :  { %1743 = vmatprep.mubr.bf16.mxu1 %v1449_v62  ;;  %v5392_v63 = vpop.f32.mrb[68].mxu0  ;;  %5419 = vmatpush3.bf16.msra.mxu1 %v5771_v37 }
 0x355   :  { %v1321_v0 = vpop.f32.mrb[69].mxu0  ;;  %5420 = vmatprep.subr.bf16.mxu1 %v5772_v61 }
 0x356   :  { %v5393_v8 = vpop.f32.mrb[70].mxu0 }
 0x357   :  { %v1451_v4 = vpack.c.bf16 %v5393_v8, %v5392_v63  ;;  %v1324_v5 = vpop.f32.mrb[71].mxu0 }
 0x358   :  { %v1450_v6 = vpack.c.bf16 %v1324_v5, %v1321_v0  ;;  %5421 = vmatpush3.bf16.msra.mxu1 %v5772_v61 }
 0x359   :  { %5422 = vmatprep.subr.bf16.mxu1 %v5773_v7 }
 0x35b   :  { %1744 = vmatmul.mubr.bf16.gmra.mrb[52].mxu1 %v1433_v41 }
 0x35c   :  { %1751 = vmatprep.mubr.bf16.mxu1 %v1450_v6  ;;  %v5396_v10 = vpop.f32.mrb[72].mxu0  ;;  %5423 = vmatpush3.bf16.msra.mxu1 %v5773_v7 }
 0x35d   :  { %v1337_v11 = vpop.f32.mrb[73].mxu0  ;;  %5424 = vmatprep.subr.bf16.mxu1 %v5774_v9 }
 0x35e   :  { %v5397_v12 = vpop.f32.mrb[74].mxu0 }
 0x35f   :  { %v1453_v13 = vpack.c.bf16 %v5397_v12, %v5396_v10  ;;  %v1340_v14 = vpop.f32.mrb[75].mxu0 }
 0x360   :  { %v1452_v16 = vpack.c.bf16 %v1340_v14, %v1337_v11  ;;  %5425 = vmatpush3.bf16.msra.mxu1 %v5774_v9 }
 0x361   :  { %5426 = vmatprep.subr.bf16.mxu1 %v5775_v3 }
 0x363   :  { %1752 = vmatmul.mubr.bf16.gmra.mrb[56].mxu1 %v1434_v50 }
 0x364   :  { %1759 = vmatprep.mubr.bf16.mxu1 %v1451_v4  ;;  %v5400_v19 = vpop.f32.mrb[76].mxu0  ;;  %5427 = vmatpush3.bf16.msra.mxu1 %v5775_v3 }
 0x365   :  { %v1353_v20 = vpop.f32.mrb[77].mxu0  ;;  %5428 = vmatprep.subr.bf16.mxu1 %v5776_v17 }
 0x366   :  { %v5401_v22 = vpop.f32.mrb[78].mxu0 }
 0x367   :  { %v1455_v15 = vpack.c.bf16 %v5401_v22, %v5400_v19  ;;  %v1356_v23 = vpop.f32.mrb[79].mxu0 }
 0x368   :  { %v1454_v24 = vpack.c.bf16 %v1356_v23, %v1353_v20  ;;  %5429 = vmatpush3.bf16.msra.mxu1 %v5776_v17 }
 0x369   :  { %5430 = vmatprep.subr.bf16.mxu1 %v5777_v21 }
 0x36b   :  { %1760 = vmatmul.mubr.bf16.gmra.mrb[60].mxu1 %v1435_v30 }
 0x36c   :  { %1767 = vmatprep.mubr.bf16.mxu1 %v1452_v16  ;;  %v5404_v26 = vpop.f32.mrb[80].mxu0  ;;  %5431 = vmatpush3.bf16.msra.mxu1 %v5777_v21 }
 0x36d   :  { %v1369_v18 = vpop.f32.mrb[81].mxu0  ;;  %5432 = vmatprep.subr.bf16.mxu1 %v5778_v25 }
 0x36e   :  { %v5405_v28 = vpop.f32.mrb[82].mxu0 }
 0x36f   :  { %v1465_v29 = vpack.c.bf16 %v5405_v28, %v5404_v26  ;;  %v1372_v31 = vpop.f32.mrb[83].mxu0 }
 0x370   :  { %v1464_v32 = vpack.c.bf16 %v1372_v31, %v1369_v18  ;;  %5433 = vmatpush3.bf16.msra.mxu1 %v5778_v25 }
 0x371   :  { %4986 = vmatprep.subr.bf16.mxu1 %v5803_v51 }
 0x373   :  { %1768 = vmatmul.mubr.bf16.gmra.mrb[64].mxu1 %v1436_v45 }
 0x374   :  { %1775 = vmatprep.mubr.bf16.mxu1 %v1453_v13  ;;  %v5408_v34 = vpop.f32.mrb[84].mxu0 }
 0x375   :  { %v1385_v35 = vpop.f32.mrb[85].mxu0 }
 0x376   :  { %v5409_v37 = vpop.f32.mrb[86].mxu0 }
 0x377   :  { %v1467_v33 = vpack.c.bf16 %v5409_v37, %v5408_v34  ;;  %v1388_v38 = vpop.f32.mrb[87].mxu0 }
 0x378   :  { %v1466_v40 = vpack.c.bf16 %v1388_v38, %v1385_v35 }
 0x37b   :  { %1776 = vmatmul.mubr.bf16.gmra.mrb[68].mxu1 %v1437_v54 }
 0x37c   :  { %1783 = vmatprep.mubr.bf16.mxu1 %v1454_v24  ;;  %v5412_v41 = vpop.f32.mrb[88].mxu0 }
 0x37d   :  { %v1401_v27 = vpop.f32.mrb[89].mxu0 }
 0x37e   :  { %v5413_v36 = vpop.f32.mrb[90].mxu0 }
 0x37f   :  { %v1469_v43 = vpack.c.bf16 %v5413_v36, %v5412_v41  ;;  %v1404_v44 = vpop.f32.mrb[91].mxu0 }
 0x380   :  { %v1468_v46 = vpack.c.bf16 %v1404_v44, %v1401_v27 }
 0x383   :  { %1784 = vmatmul.mubr.bf16.gmra.mrb[72].mxu1 %v1438_v60 }
 0x384   :  { %1791 = vmatprep.mubr.bf16.mxu1 %v1455_v15  ;;  %v5416_v30 = vpop.f32.mrb[92].mxu0 }
 0x385   :  { %v1417_v47 = vpop.f32.mrb[93].mxu0 }
 0x386   :  { %v5417_v50 = vpop.f32.mrb[94].mxu0 }
 0x387   :  { %v1471_v52 = vpack.c.bf16 %v5417_v50, %v5416_v30  ;;  %v1420_v55 = vpop.f32.mrb[95].mxu0 }
 0x388   :  { %v1470_v45 = vpack.c.bf16 %v1420_v55, %v1417_v47 }
 0x38b   :  { %1792 = vmatmul.mubr.bf16.gmra.mrb[76].mxu1 %v1439_v39 }
 0x38c   :  { %5434 = vmatprep.mubr.bf16.mxu1 %v1464_v32 }
 0x393   :  { %5435 = vmatmul.mubr.bf16.vlgmr.msra.gmra.mrb[80].mxu1 %v1465_v29 }
 0x394   :  { %5438 = vmatprep.mubr.bf16.mxu1 %v1466_v40 }
 0x39b   :  { %5439 = vmatmul.mubr.bf16.gmra.mrb[84].mxu1 %v1467_v33  ;;  %v6469_v33 = vld [vmem:[%s7167_s9] ss:$0 sm:$0xff] }
 0x39c   :  { %5442 = vmatprep.mubr.bf16.mxu1 %v1468_v46 }
 0x3a3   :  { %5443 = vmatmul.mubr.bf16.gmra.mrb[88].mxu1 %v1469_v43 }
 0x3a4   :  { %5446 = vmatprep.mubr.bf16.mxu1 %v1470_v45 }
 0x3ab   :  { %5447 = vmatmul.mubr.bf16.gmra.mrb[92].mxu1 %v1471_v52 }
 0x426   :  { %v4890_v53 = vpop.f32.mrb[48].mxu1 }
 0x427   :  { %v4891_v54 = vpop.f32.mrb[49].mxu1 }
 0x428   :  { %v4892_v57 = vadd.f32 %v4891_v54, %v4890_v53  ;;  %v4893_v59 = vpop.f32.mrb[50].mxu1  ;;  %v5804_v54 = vld [vmem:[%s7168_s5] sm:$0xff]  }
 0x429   :  { %v4894_v60 = vpop.f32.mrb[51].mxu1  ;;  %4987 = vmatpush3.bf16.msra.mxu1 %v5804_v54  ;;  %v5783_v54 = vld [vmem:[%s7163_s1 + $0x20] sm:$0xff]  }
 0x42a   :  { %v4895_v56 = vadd.f32 %v4894_v60, %v4893_v59  ;;  %v1738_v41 = vadd.f32 %v4892_v57, %v6469_v33  ;;  %v5805_v59 = vld [vmem:[%s7168_s5 + $0x48] sm:$0xff]  }
 0x42b   :  { %4988 = vmatprep.subr.bf16.mxu1 %v5805_v59  ;;  %v5785_v59 = vld [vmem:[%s7163_s1 + $0x30] sm:$0xff]  }
 0x42c   :  { %v1741_v30 = vadd.f32 %v4895_v56, %v6469_v33 }
 0x42e   :  { %v4896_v58 = vpop.f32.mrb[52].mxu1 }
 0x42f   :  { %v4897_v39 = vpop.f32.mrb[53].mxu1 }
 0x430   :  { %v4898_v48 = vadd.f32 %v4897_v39, %v4896_v58  ;;  %v4899_v42 = vpop.f32.mrb[54].mxu1  ;;  %v5806_v58 = vld [vmem:[%s7168_s5 + $0x8] sm:$0xff]  }
 0x431   :  { %v4900_v49 = vpop.f32.mrb[55].mxu1  ;;  %4989 = vmatpush3.bf16.msra.mxu1 %v5806_v58  ;;  %v5788_v58 = vld [vmem:[%s7163_s1 + $0x48] sm:$0xff]  }
 0x432   :  { %v4901_v62 = vadd.f32 %v4900_v49, %v4899_v42  ;;  %v1746_v38 = vadd.f32 %v4898_v48, %v6469_v33  ;;  %v5807_v49 = vld [vmem:[%s7168_s5 + $0x50] sm:$0xff]  }
 0x433   :  { %4990 = vmatprep.subr.bf16.mxu1 %v5807_v49  ;;  %v5792_v49 = vld [vmem:[%s7163_s1 + $0x68] sm:$0xff]  }
 0x434   :  { %v1749_v43 = vadd.f32 %v4901_v62, %v6469_v33 }
 0x436   :  { %v4902_v1 = vpop.f32.mrb[56].mxu1 }
 0x437   :  { %v4903_v2 = vpop.f32.mrb[57].mxu1 }
 0x438   :  { %v6446_v61 = vadd.f32 %v4903_v2, %v4902_v1  ;;  %v4905_v63 = vpop.f32.mrb[58].mxu1 }
 0x439   :  { %v4906_v0 = vpop.f32.mrb[59].mxu1 }
 0x43a   :  { %v6448_v7 = vadd.f32 %v4906_v0, %v4905_v63  ;;  %v1754_v42 = vadd.f32 %v6446_v61, %v6469_v33 }
 0x43e   :  { %v4908_v8 = vpop.f32.mrb[60].mxu1 }
 0x43f   :  { %v4909_v4 = vpop.f32.mrb[61].mxu1 }
 0x440   :  { %v4910_v5 = vadd.f32 %v4909_v4, %v4908_v8  ;;  %v4911_v6 = vpop.f32.mrb[62].mxu1  ;;  %v1757_v8 = vadd.f32 %v6448_v7, %v6469_v33 }
 0x441   :  { %v4912_v9 = vpop.f32.mrb[63].mxu1 }
 0x442   :  { %v4913_v10 = vadd.f32 %v4912_v9, %v4911_v6  ;;  %v1762_v56 = vadd.f32 %v4910_v5, %v6469_v33 }
 0x444   :  { %v1765_v2 = vadd.f32 %v4913_v10, %v6469_v33 }
 0x446   :  { %v4914_v11 = vpop.f32.mrb[64].mxu1 }
 0x447   :  { %v4915_v3 = vpop.f32.mrb[65].mxu1 }
 0x448   :  { %v6450_v12 = vadd.f32 %v4915_v3, %v4914_v11  ;;  %v4917_v13 = vpop.f32.mrb[66].mxu1 }
 0x449   :  { %v4918_v14 = vpop.f32.mrb[67].mxu1 }
 0x44a   :  { %v6452_v16 = vadd.f32 %v4918_v14, %v4917_v13  ;;  %v1770_v7 = vadd.f32 %v6450_v12, %v6469_v33 }
 0x44e   :  { %v4920_v17 = vpop.f32.mrb[68].mxu1 }
 0x44f   :  { %v4921_v19 = vpop.f32.mrb[69].mxu1 }
 0x450   :  { %v6454_v20 = vadd.f32 %v4921_v19, %v4920_v17  ;;  %v4923_v21 = vpop.f32.mrb[70].mxu1 }
 0x451   :  { %v4924_v22 = vpop.f32.mrb[71].mxu1 }
 0x452   :  { %v6456_v15 = vadd.f32 %v4924_v22, %v4923_v21  ;;  %v1778_v10 = vadd.f32 %v6454_v20, %v6469_v33 }
 0x454   :  { %v1781_v22 = vadd.f32 %v6456_v15, %v6469_v33 }
 0x456   :  { %v4926_v23 = vpop.f32.mrb[72].mxu1 }
 0x457   :  { %v4927_v24 = vpop.f32.mrb[73].mxu1 }
 0x458   :  { %v6458_v25 = vadd.f32 %v4927_v24, %v4926_v23  ;;  %v4929_v26 = vpop.f32.mrb[74].mxu1 }
 0x459   :  { %v4930_v18 = vpop.f32.mrb[75].mxu1 }
 0x45a   :  { %v6460_v28 = vadd.f32 %v4930_v18, %v4929_v26  ;;  %v1773_v26 = vadd.f32 %v6452_v16, %v6469_v33 }
 0x45e   :  { %v4932_v29 = vpop.f32.mrb[76].mxu1 }
 0x45f   :  { %v4933_v31 = vpop.f32.mrb[77].mxu1 }
 0x460   :  { %v6462_v32 = vadd.f32 %v4933_v31, %v4932_v29  ;;  %v4935_v34 = vpop.f32.mrb[78].mxu1 }
 0x461   :  { %v4936_v35 = vpop.f32.mrb[79].mxu1 }
 0x462   :  { %v6464_v37 = vadd.f32 %v4936_v35, %v4935_v34  ;;  %v1794_v15 = vadd.f32 %v6462_v32, %v6469_v33 }
 0x466   :  { %v5436_v40 = vpop.f32.mrb[80].mxu1 }
 0x467   :  { %v1843_v27 = vadd.f32 %v5436_v40, %v1746_v38  ;;  %v1834_v36 = vpop.f32.mrb[81].mxu1 }
 0x468   :  { %v1835_v44 = vadd.f32 %v1834_v36, %v1738_v41  ;;  %v5437_v46 = vpop.f32.mrb[82].mxu1 }
 0x469   :  { %v1899_v47 = vmax.f32 %v1843_v27, 0.0  ;;  %v1846_v50 = vadd.f32 %v5437_v46, %v1749_v43  ;;  %v1837_v52 = vpop.f32.mrb[83].mxu1  ;;  %v1786_v27 = vadd.f32 %v6458_v25, %v6469_v33  ;;  %v1797_v43 = vadd.f32 %v6464_v37, %v6469_v33  ;;  %v5780_v37 = vld [vmem:[%s7163_s1 + $0x8] sm:$0xff]  }
 0x46a   :  { %v1897_v55 = vmax.f32 %v1835_v44, 0.0  ;;  %v1838_v45 = vadd.f32 %v1837_v52, %v1741_v30  ;;  %v1789_v30 = vadd.f32 %v6460_v28, %v6469_v33  ;;  %v5781_v28 = vld [vmem:[%s7163_s1 + $0x10] sm:$0xff]   ;;  %v5782_v33 = vld [vmem:[%s7163_s1 + $0x18] sm:$0xff]  }
 0x46b   :  { %v1900_v53 = vmax.f32 %v1846_v50, 0.0 }
 0x46c   :  { %v1898_v57 = vmax.f32 %v1838_v45, 0.0 }
 0x46d   :  { %v1914_v60 = vpack.c.bf16 %v1900_v53, %v1899_v47 }
 0x46e   :  { %v1913_v39 = vpack.c.bf16 %v1898_v57, %v1897_v55  ;;  %v5440_v48 = vpop.f32.mrb[84].mxu1  ;;  %v5784_v57 = vld [vmem:[%s7163_s1 + $0x28] sm:$0xff]  }
 0x46f   :  { %v1859_v62 = vadd.f32 %v5440_v48, %v1762_v56  ;;  %v1850_v1 = vpop.f32.mrb[85].mxu1  ;;  %v5787_v56 = vld [vmem:[%s7163_s1 + $0x40] sm:$0xff]   ;;  %v5790_v48 = vld [vmem:[%s7163_s1 + $0x58] sm:$0xff]  }
 0x470   :  { %v1851_v63 = vadd.f32 %v1850_v1, %v1754_v42  ;;  %v5441_v0 = vpop.f32.mrb[86].mxu1  ;;  %5450 = vmatprep.subr.bf16.mxu0 %v1913_v39  ;;  %v5791_v42 = vld [vmem:[%s7163_s1 + $0x60] sm:$0xff]   ;;  %v5794_v1 = vld [vmem:[%s7163_s1 + $0x78] sm:$0xff]  }
 0x471   :  { %v1862_v4 = vadd.f32 %v5441_v0, %v1765_v2  ;;  %v1853_v5 = vpop.f32.mrb[87].mxu1  ;;  %5451 = vmatpush3.bf16.msra.mxu0 %v1913_v39  ;;  %v1903_v6 = vmax.f32 %v1859_v62, 0.0  ;;  %v5789_v39 = vld [vmem:[%s7163_s1 + $0x50] sm:$0xff]   ;;  %v5795_v2 = vld [vmem:[%s7163_s1 + $0x80] sm:$0xff]  }
 0x472   :  { %v1854_v61 = vadd.f32 %v1853_v5, %v1757_v8  ;;  %5452 = vmatprep.subr.bf16.mxu0 %v1914_v60  ;;  %v1901_v11 = vmax.f32 %v1851_v63, 0.0  ;;  %v5793_v62 = vld [vmem:[%s7163_s1 + $0x70] sm:$0xff]   ;;  %v5796_v63 = vld [vmem:[%s7163_s1 + $0x88] sm:$0xff]   ;;  %v5798_v8 = vld [vmem:[%s7163_s1 + $0x98] sm:$0xff]  }
 0x473   :  { %v1904_v9 = vmax.f32 %v1862_v4, 0.0  ;;  %v5797_v0 = vld [vmem:[%s7163_s1 + $0x90] sm:$0xff]   ;;  %v5799_v4 = vld [vmem:[%s7163_s1 + $0xa0] sm:$0xff]   ;;  %v5800_v5 = vld [vmem:[%s7163_s1 + $0xa8] sm:$0xff]  }
 0x474   :  { %v1902_v3 = vmax.f32 %v1854_v61, 0.0  ;;  %v5801_v61 = vld [vmem:[%s7163_s1 + $0xb0] sm:$0xff]  }
 0x475   :  { %v1916_v13 = vpack.c.bf16 %v1904_v9, %v1903_v6  ;;  %5453 = vmatpush3.bf16.msra.mxu0 %v1914_v60  ;;  %v5786_v60 = vld [vmem:[%s7163_s1 + $0x38] sm:$0xff]   ;;  %v5808_v6 = vld [vmem:[%s7168_s5 + $0x10] sm:$0xff]  }
 0x476   :  { %v1915_v14 = vpack.c.bf16 %v1902_v3, %v1901_v11  ;;  %v5444_v17 = vpop.f32.mrb[88].mxu1  ;;  %v5802_v9 = vld [vmem:[%s7163_s1 + $0xb8] sm:$0xff]   ;;  %4991 = vmatpush3.bf16.msra.mxu1 %v5808_v6 }
 0x477   :  { %v1875_v19 = vadd.f32 %v5444_v17, %v1778_v10  ;;  %v1866_v21 = vpop.f32.mrb[89].mxu1  ;;  %v5809_v11 = vld [vmem:[%s7168_s5 + $0x58] sm:$0xff]   ;;  %v5812_v10 = vld [vmem:[%s7168_s5 + $0x20] sm:$0xff]   ;;  %v5814_v17 = vld [vmem:[%s7168_s5 + $0x28] sm:$0xff]  }
 0x478   :  { %v1867_v23 = vadd.f32 %v1866_v21, %v1770_v7  ;;  %v5445_v24 = vpop.f32.mrb[90].mxu1  ;;  %5454 = vmatprep.subr.bf16.mxu0 %v1915_v14  ;;  %4992 = vmatprep.subr.bf16.mxu1 %v5809_v11  ;;  %v5810_v3 = vld [vmem:[%s7168_s5 + $0x18] sm:$0xff]   ;;  %v5815_v7 = vld [vmem:[%s7168_s5 + $0x70] sm:$0xff]  }
 0x479   :  { %v1878_v18 = vadd.f32 %v5445_v24, %v1781_v22  ;;  %v1869_v29 = vpop.f32.mrb[91].mxu1  ;;  %5455 = vmatpush3.bf16.msra.mxu0 %v1915_v14  ;;  %v1907_v31 = vmax.f32 %v1875_v19, 0.0  ;;  %v5813_v14 = vld [vmem:[%s7168_s5 + $0x68] sm:$0xff]   ;;  %v5816_v19 = vld [vmem:[%s7168_s5 + $0x30] sm:$0xff]   ;;  %v5817_v21 = vld [vmem:[%s7168_s5 + $0x78] sm:$0xff]  }
 0x47a   :  { %v1870_v20 = vadd.f32 %v1869_v29, %v1773_v26  ;;  %5456 = vmatprep.subr.bf16.mxu0 %v1916_v13  ;;  %v1905_v35 = vmax.f32 %v1867_v23, 0.0  ;;  %4993 = vmatpush3.bf16.msra.mxu1 %v5810_v3  ;;  %v5818_v22 = vld [vmem:[%s7168_s5 + $0x38] sm:$0xff]   ;;  %v5819_v23 = vld [vmem:[%s7168_s5 + $0x80] sm:$0xff]  }
 0x47b   :  { %v1908_v34 = vmax.f32 %v1878_v18, 0.0  ;;  %v5826_v3 = vld [vmem:[%s7168_s5 + $0xb8] sm:$0xff]  }
 0x47c   :  { %v1906_v12 = vmax.f32 %v1870_v20, 0.0 }
 0x47d   :  { %v1918_v38 = vpack.c.bf16 %v1908_v34, %v1907_v31  ;;  %5457 = vmatpush3.bf16.msra.mxu0 %v1916_v13  ;;  %v5811_v13 = vld [vmem:[%s7168_s5 + $0x60] sm:$0xff]  }
 0x47e   :  { %v1917_v40 = vpack.c.bf16 %v1906_v12, %v1905_v35  ;;  %v5448_v41 = vpop.f32.mrb[92].mxu1  ;;  %4994 = vmatprep.subr.bf16.mxu1 %v5811_v13 }
 0x47f   :  { %v1891_v16 = vadd.f32 %v5448_v41, %v1794_v15  ;;  %v1882_v36 = vpop.f32.mrb[93].mxu1  ;;  %4995 = vmatpush3.bf16.msra.mxu1 %v5812_v10 }
 0x480   :  { %v1883_v44 = vadd.f32 %v1882_v36, %v1786_v27  ;;  %v5449_v46 = vpop.f32.mrb[94].mxu1  ;;  %5458 = vmatprep.subr.bf16.mxu0 %v1917_v40  ;;  %4996 = vmatprep.subr.bf16.mxu1 %v5813_v14 }
 0x481   :  { %v1894_v47 = vadd.f32 %v5449_v46, %v1797_v43  ;;  %v1885_v50 = vpop.f32.mrb[95].mxu1  ;;  %5459 = vmatpush3.bf16.msra.mxu0 %v1917_v40  ;;  %v1911_v52 = vmax.f32 %v1891_v16, 0.0 }
 0x482   :  { %v1886_v32 = vadd.f32 %v1885_v50, %v1789_v30  ;;  %5460 = vmatprep.subr.bf16.mxu0 %v1918_v38  ;;  %v1909_v45 = vmax.f32 %v1883_v44, 0.0 }
 0x483   :  { %v1912_v55 = vmax.f32 %v1894_v47, 0.0  ;;  %4997 = vmatpush3.bf16.msra.mxu1 %v5814_v17 }
 0x484   :  { %v1910_v25 = vmax.f32 %v1886_v32, 0.0  ;;  %4998 = vmatprep.subr.bf16.mxu1 %v5815_v7 }
 0x485   :  { %v1920_v51 = vpack.c.bf16 %v1912_v55, %v1911_v52  ;;  %5461 = vmatpush3.bf16.msra.mxu0 %v1918_v38 }
 0x486   :  { %v1919_v53 = vpack.c.bf16 %v1910_v25, %v1909_v45 }
 0x487   :  { %4999 = vmatpush3.bf16.msra.mxu1 %v5816_v19 }
 0x488   :  { %5462 = vmatprep.subr.bf16.mxu0 %v1919_v53  ;;  %5000 = vmatprep.subr.bf16.mxu1 %v5817_v21 }
 0x489   :  { %5463 = vmatpush3.bf16.msra.mxu0 %v1919_v53 }
 0x48a   :  { %5464 = vmatprep.subr.bf16.mxu0 %v1920_v51 }
 0x48b   :  { %5001 = vmatpush3.bf16.msra.mxu1 %v5818_v22 }
 0x48c   :  { %5514 = vmatprep.subr.bf16.mxu1 %v5819_v23 }
 0x48d   :  { %5465 = vmatpush3.bf16.msra.mxu0 %v1920_v51 }
 0x490   :  { %5467 = vmatmul.mubr.bf16.vlgmr.msra.gmra.mrb[96].mxu0 %v5780_v37 }
 0x491   :  { %5470 = vmatprep.mubr.bf16.mxu0 %v5781_v28  ;;  %v5820_v28 = vld [vmem:[%s7168_s5 + $0x88] sm:$0xff]  }
 0x498   :  { %5471 = vmatmul.mubr.bf16.gmra.mrb[100].mxu0 %v5782_v33 }
 0x499   :  { %5474 = vmatprep.mubr.bf16.mxu0 %v5783_v54 }
 0x4a0   :  { %5475 = vmatmul.mubr.bf16.gmra.mrb[104].mxu0 %v5784_v57  ;;  %v5821_v57 = vld [vmem:[%s7168_s5 + $0x90] sm:$0xff]  }
 0x4a1   :  { %5478 = vmatprep.mubr.bf16.mxu0 %v5785_v59 }
 0x4a8   :  { %5479 = vmatmul.mubr.bf16.gmra.mrb[108].mxu0 %v5786_v60 }
 0x4a9   :  { %5482 = vmatprep.mubr.bf16.mxu0 %v5787_v56 }
 0x4b0   :  { %5483 = vmatmul.mubr.bf16.gmra.mrb[112].mxu0 %v5788_v58 }
 0x4b1   :  { %5486 = vmatprep.mubr.bf16.mxu0 %v5789_v39  ;;  %v5822_v39 = vld [vmem:[%s7168_s5 + $0x98] sm:$0xff]  }
 0x4b8   :  { %5487 = vmatmul.mubr.bf16.gmra.mrb[116].mxu0 %v5790_v48 }
 0x4b9   :  { %5490 = vmatprep.mubr.bf16.mxu0 %v5791_v42 }
 0x4c0   :  { %5491 = vmatmul.mubr.bf16.gmra.mrb[120].mxu0 %v5792_v49  ;;  %v5823_v49 = vld [vmem:[%s7168_s5 + $0xa0] sm:$0xff]  }
 0x4c1   :  { %5494 = vmatprep.mubr.bf16.mxu0 %v5793_v62 }
 0x4c8   :  { %5495 = vmatmul.mubr.bf16.gmra.mrb[124].mxu0 %v5794_v1 }
 0x4c9   :  { %5498 = vmatprep.mubr.bf16.mxu0 %v5795_v2 }
 0x4d0   :  { %5499 = vmatmul.mubr.bf16.gmra.mrb[128].mxu0 %v5796_v63 }
 0x4d1   :  { %5502 = vmatprep.mubr.bf16.mxu0 %v5797_v0  ;;  %v5824_v0 = vld [vmem:[%s7168_s5 + $0xa8] sm:$0xff]  }
 0x4d8   :  { %5503 = vmatmul.mubr.bf16.gmra.mrb[132].mxu0 %v5798_v8 }
 0x4d9   :  { %5506 = vmatprep.mubr.bf16.mxu0 %v5799_v4 }
 0x4e0   :  { %5507 = vmatmul.mubr.bf16.gmra.mrb[136].mxu0 %v5800_v5  ;;  %v5825_v5 = vld [vmem:[%s7168_s5 + $0xb0] sm:$0xff]  }
 0x4e1   :  { %5510 = vmatprep.mubr.bf16.mxu0 %v5801_v61 }
 0x4e8   :  { %5511 = vmatmul.mubr.bf16.gmra.mrb[140].mxu0 %v5802_v9 }
 0x563   :  { %v5468_v24 = vpop.f32.mrb[96].mxu0 }
 0x564   :  { %v2147_v26 = vpop.f32.mrb[97].mxu0 }
 0x565   :  { %v5469_v18 = vpop.f32.mrb[98].mxu0 }
 0x566   :  { %v2339_v29 = vpack.c.bf16 %v5469_v18, %v5468_v24  ;;  %v2150_v20 = vpop.f32.mrb[99].mxu0 }
 0x567   :  { %v2338_v31 = vpack.c.bf16 %v2150_v20, %v2147_v26 }
 0x56b   :  { %v6617_v34 = vpop.f32.mrb[100].mxu0 }
 0x56c   :  { %v2163_v35 = vpop.f32.mrb[101].mxu0 }
 0x56d   :  { %v6619_v12 = vpop.f32.mrb[102].mxu0 }
 0x56e   :  { %v2341_v38 = vpack.c.bf16 %v6619_v12, %v6617_v34  ;;  %v2166_v15 = vpop.f32.mrb[103].mxu0 }
 0x56f   :  { %v2340_v40 = vpack.c.bf16 %v2166_v15, %v2163_v35 }
 0x573   :  { %v6623_v41 = vpop.f32.mrb[104].mxu0 }
 0x574   :  { %v6625_v27 = vpop.f32.mrb[105].mxu0 }
 0x575   :  { %v6627_v16 = vpop.f32.mrb[106].mxu0 }
 0x576   :  { %v2343_v36 = vpack.c.bf16 %v6627_v16, %v6623_v41  ;;  %v6631_v43 = vpop.f32.mrb[107].mxu0  ;;  %v5829_v41 = vld [vmem:[%s7169_s6 + $0x4] ss:$12 sps:$4 sm:$0xff]   ;;  %v5827_v16 = vld [vmem:[%s7169_s6] ss:$12 sps:$4 sm:$0xff]  }
 0x577   :  { %v2342_v44 = vpack.c.bf16 %v6631_v43, %v6625_v27  ;;  %2987 = vmatprep.subr.bf16.mxu0 %v5829_v41 }
 0x578   :  { %2988 = vmatpush1.bf16.msra.mxu0 %v5827_v16 }
 0x57b   :  { %v6635_v46 = vpop.f32.mrb[108].mxu0 }
 0x57c   :  { %v6637_v30 = vpop.f32.mrb[109].mxu0 }
 0x57d   :  { %v6639_v47 = vpop.f32.mrb[110].mxu0 }
 0x57e   :  { %v2345_v50 = vpack.c.bf16 %v6639_v47, %v6635_v46  ;;  %v6643_v32 = vpop.f32.mrb[111].mxu0  ;;  %v5831_v46 = vld [vmem:[%s7169_s6 + $0x18] ss:$12 sps:$4 sm:$0xff]   ;;  %v5834_v47 = vld [vmem:[%s7169_s6 + $0x20] ss:$12 sps:$4 sm:$0xff]  }
 0x57f   :  { %v2344_v52 = vpack.c.bf16 %v6643_v32, %v6637_v30  ;;  %v5833_v30 = vld [vmem:[%s7169_s6 + $0x1c] ss:$12 sps:$4 sm:$0xff]  }
 0x580   :  { %2989 = vmatprep.subr.bf16.mxu0 %v5833_v30  ;;  %v5835_v32 = vld [vmem:[%s7169_s6 + $0x30] ss:$12 sps:$4 sm:$0xff]  }
 0x581   :  { %2990 = vmatpush1.bf16.msra.mxu0 %v5831_v46 }
 0x583   :  { %v5484_v55 = vpop.f32.mrb[112].mxu0 }
 0x584   :  { %v2211_v45 = vpop.f32.mrb[113].mxu0 }
 0x585   :  { %v5485_v25 = vpop.f32.mrb[114].mxu0 }
 0x586   :  { %v2355_v51 = vpack.c.bf16 %v5485_v25, %v5484_v55  ;;  %v2214_v53 = vpop.f32.mrb[115].mxu0  ;;  %v5839_v55 = vld [vmem:[%s7169_s6 + $0x48] ss:$12 sps:$4 sm:$0xff]   ;;  %v5842_v25 = vld [vmem:[%s7169_s6 + $0x50] ss:$12 sps:$4 sm:$0xff]  }
 0x587   :  { %v2354_v37 = vpack.c.bf16 %v2214_v53, %v2211_v45  ;;  %v5841_v45 = vld [vmem:[%s7169_s6 + $0x4c] ss:$12 sps:$4 sm:$0xff]  }
 0x588   :  { %v5843_v53 = vld [vmem:[%s7169_s6 + $0x60] ss:$12 sps:$4 sm:$0xff]  }
 0x589   :  { %2641 = vmatprep.mubr.bf16.mxu1 %v2354_v37  ;;  %v5846_v37 = vld [vmem:[%s7169_s6 + $0x68] ss:$12 sps:$4 sm:$0xff]  }
 0x58a   :  { %2642 = vmatmul.mubr.bf16.vlgmr.msra.gmra.mrb[96].mxu1 %v2338_v31 }
 0x58b   :  { %2649 = vmatprep.mubr.bf16.mxu1 %v2355_v51  ;;  %v5488_v33 = vpop.f32.mrb[116].mxu0  ;;  %5515 = vmatpush3.bf16.msra.mxu1 %v5819_v23  ;;  %v5845_v51 = vld [vmem:[%s7169_s6 + $0x64] ss:$12 sps:$4 sm:$0xff]  }
 0x58c   :  { %v2227_v54 = vpop.f32.mrb[117].mxu0  ;;  %5516 = vmatprep.subr.bf16.mxu1 %v5820_v28 }
 0x58d   :  { %v5489_v59 = vpop.f32.mrb[118].mxu0 }
 0x58e   :  { %v2357_v60 = vpack.c.bf16 %v5489_v59, %v5488_v33  ;;  %v2230_v56 = vpop.f32.mrb[119].mxu0  ;;  %v5849_v33 = vld [vmem:[%s7169_s6 + $0x7c] ss:$12 sps:$4 sm:$0xff]  }
 0x58f   :  { %v2356_v58 = vpack.c.bf16 %v2230_v56, %v2227_v54  ;;  %5517 = vmatpush3.bf16.msra.mxu1 %v5820_v28  ;;  %v5847_v28 = vld [vmem:[%s7169_s6 + $0x78] ss:$12 sps:$4 sm:$0xff]   ;;  %v5850_v54 = vld [vmem:[%s7169_s6 + $0x80] ss:$12 sps:$4 sm:$0xff]   ;;  %v5851_v59 = vld [vmem:[%s7169_s6 + $0x90] ss:$12 sps:$4 sm:$0xff]  }
 0x590   :  { %5518 = vmatprep.subr.bf16.mxu1 %v5821_v57  ;;  %v5857_v56 = vld [vmem:[%s7169_s6 + $0xac] ss:$12 sps:$4 sm:$0xff]  }
 0x592   :  { %2650 = vmatmul.mubr.bf16.gmra.mrb[100].mxu1 %v2339_v29 }
 0x593   :  { %2657 = vmatprep.mubr.bf16.mxu1 %v2356_v58  ;;  %v5492_v48 = vpop.f32.mrb[120].mxu0  ;;  %5519 = vmatpush3.bf16.msra.mxu1 %v5821_v57  ;;  %v5853_v57 = vld [vmem:[%s7169_s6 + $0x94] ss:$12 sps:$4 sm:$0xff]  }
 0x594   :  { %v2243_v42 = vpop.f32.mrb[121].mxu0  ;;  %5520 = vmatprep.subr.bf16.mxu1 %v5822_v39  ;;  %v5855_v58 = vld [vmem:[%s7169_s6 + $0xa8] ss:$12 sps:$4 sm:$0xff]  }
 0x595   :  { %v5493_v62 = vpop.f32.mrb[122].mxu0 }
 0x596   :  { %v2359_v1 = vpack.c.bf16 %v5493_v62, %v5492_v48  ;;  %v2246_v2 = vpop.f32.mrb[123].mxu0  ;;  %v5931_v48 = vmov 0  }
 0x597   :  { %v2358_v63 = vpack.c.bf16 %v2246_v2, %v2243_v42  ;;  %5521 = vmatpush3.bf16.msra.mxu1 %v5822_v39  ;;  %v5858_v39 = vld [vmem:[%s7169_s6 + $0xb0] ss:$12 sps:$4 sm:$0xff]   ;;  %3019 = vmatprep.mubr.bf16.mxu0 %v5931_v48 }
 0x598   :  { %5522 = vmatprep.subr.bf16.mxu1 %v5823_v49 }
 0x59a   :  { %2658 = vmatmul.mubr.bf16.gmra.mrb[104].mxu1 %v2340_v40 }
 0x59b   :  { %2665 = vmatprep.mubr.bf16.mxu1 %v2357_v60  ;;  %v5496_v8 = vpop.f32.mrb[124].mxu0  ;;  %5523 = vmatpush3.bf16.msra.mxu1 %v5823_v49  ;;  %v5854_v60 = vld [vmem:[%s7169_s6 + $0x98] ss:$12 sps:$4 sm:$0xff]  }
 0x59c   :  { %v2259_v4 = vpop.f32.mrb[125].mxu0  ;;  %5524 = vmatprep.subr.bf16.mxu1 %v5824_v0 }
 0x59d   :  { %v5497_v61 = vpop.f32.mrb[126].mxu0 }
 0x59e   :  { %v2361_v6 = vpack.c.bf16 %v5497_v61, %v5496_v8  ;;  %v2262_v9 = vpop.f32.mrb[127].mxu0 }
 0x59f   :  { %v2360_v11 = vpack.c.bf16 %v2262_v9, %v2259_v4  ;;  %5525 = vmatpush3.bf16.msra.mxu1 %v5824_v0 }
 0x5a0   :  { %5526 = vmatprep.subr.bf16.mxu1 %v5825_v5 }
 0x5a2   :  { %2666 = vmatmul.mubr.bf16.gmra.mrb[108].mxu1 %v2341_v38 }
 0x5a3   :  { %2673 = vmatprep.mubr.bf16.mxu1 %v2358_v63  ;;  %v5500_v13 = vpop.f32.mrb[128].mxu0  ;;  %5527 = vmatpush3.bf16.msra.mxu1 %v5825_v5 }
 0x5a4   :  { %v2275_v10 = vpop.f32.mrb[129].mxu0  ;;  %5528 = vmatprep.subr.bf16.mxu1 %v5826_v3 }
 0x5a5   :  { %v5501_v14 = vpop.f32.mrb[130].mxu0 }
 0x5a6   :  { %v2371_v17 = vpack.c.bf16 %v5501_v14, %v5500_v13  ;;  %v2278_v7 = vpop.f32.mrb[131].mxu0 }
 0x5a7   :  { %v2370_v19 = vpack.c.bf16 %v2278_v7, %v2275_v10  ;;  %5529 = vmatpush3.bf16.msra.mxu1 %v5826_v3 }
 0x5aa   :  { %2674 = vmatmul.mubr.bf16.gmra.mrb[112].mxu1 %v2342_v44 }
 0x5ab   :  { %2681 = vmatprep.mubr.bf16.mxu1 %v2359_v1  ;;  %v5504_v21 = vpop.f32.mrb[132].mxu0 }
 0x5ac   :  { %v2291_v22 = vpop.f32.mrb[133].mxu0 }
 0x5ad   :  { %v5505_v23 = vpop.f32.mrb[134].mxu0 }
 0x5ae   :  { %v2373_v24 = vpack.c.bf16 %v5505_v23, %v5504_v21  ;;  %v2294_v26 = vpop.f32.mrb[135].mxu0 }
 0x5af   :  { %v2372_v18 = vpack.c.bf16 %v2294_v26, %v2291_v22 }
 0x5b2   :  { %2682 = vmatmul.mubr.bf16.gmra.mrb[116].mxu1 %v2343_v36  ;;  %v5830_v36 = vld [vmem:[%s7169_s6 + $0x8] ss:$12 sps:$4 sm:$0xff]  }
 0x5b3   :  { %2689 = vmatprep.mubr.bf16.mxu1 %v2360_v11  ;;  %v5508_v29 = vpop.f32.mrb[136].mxu0  ;;  %5546 = vmatprep.subr.bf16.mxu1 %v5830_v36 }
 0x5b4   :  { %v2307_v20 = vpop.f32.mrb[137].mxu0 }
 0x5b5   :  { %v5509_v31 = vpop.f32.mrb[138].mxu0 }
 0x5b6   :  { %v2375_v34 = vpack.c.bf16 %v5509_v31, %v5508_v29  ;;  %v2310_v35 = vpop.f32.mrb[139].mxu0 }
 0x5b7   :  { %v2374_v12 = vpack.c.bf16 %v2310_v35, %v2307_v20 }
 0x5ba   :  { %2690 = vmatmul.mubr.bf16.gmra.mrb[120].mxu1 %v2344_v52  ;;  %v5838_v52 = vld [vmem:[%s7169_s6 + $0x38] ss:$12 sps:$4 sm:$0xff]  }
 0x5bb   :  { %2697 = vmatprep.mubr.bf16.mxu1 %v2361_v6  ;;  %v5512_v38 = vpop.f32.mrb[140].mxu0 }
 0x5bc   :  { %v2323_v15 = vpop.f32.mrb[141].mxu0 }
 0x5bd   :  { %v5513_v40 = vpop.f32.mrb[142].mxu0 }
 0x5be   :  { %v2377_v27 = vpack.c.bf16 %v5513_v40, %v5512_v38  ;;  %v2326_v43 = vpop.f32.mrb[143].mxu0 }
 0x5bf   :  { %v2376_v44 = vpack.c.bf16 %v2326_v43, %v2323_v15 }
 0x5c2   :  { %2698 = vmatmul.mubr.bf16.gmra.mrb[124].mxu1 %v2345_v50  ;;  %v5837_v50 = vld [vmem:[%s7169_s6 + $0x34] ss:$12 sps:$4 sm:$0xff]  }
 0x5c3   :  { %5530 = vmatprep.mubr.bf16.mxu1 %v2370_v19  ;;  %2991 = vmatprep.subr.bf16.mxu0 %v5837_v50 }
 0x5c4   :  { %2992 = vmatpush1.bf16.msra.mxu0 %v5835_v32 }
 0x5c5   :  { %2993 = vmatprep.subr.bf16.mxu0 %v5841_v45 }
 0x5c8   :  { %2994 = vmatpush1.bf16.msra.mxu0 %v5839_v55  ;;  %v6771_v55 = vld [vmem:[%s7170_s10] ss:$0 sm:$0xff] }
 0x5c9   :  { %2995 = vmatprep.subr.bf16.mxu0 %v5845_v51 }
 0x5ca   :  { %5531 = vmatmul.mubr.bf16.vlgmr.msra.gmra.mrb[128].mxu1 %v2371_v17 }
 0x5cb   :  { %5534 = vmatprep.mubr.bf16.mxu1 %v2372_v18  ;;  %5547 = vmatpush3.bf16.msra.mxu1 %v5830_v36 }
 0x5cc   :  { %5548 = vmatprep.subr.bf16.mxu1 %v5834_v47  ;;  %2996 = vmatpush1.bf16.msra.mxu0 %v5843_v53 }
 0x5cd   :  { %2997 = vmatprep.subr.bf16.mxu0 %v5849_v33 }
 0x5cf   :  { %5549 = vmatpush3.bf16.msra.mxu1 %v5834_v47 }
 0x5d0   :  { %5550 = vmatprep.subr.bf16.mxu1 %v5838_v52  ;;  %2998 = vmatpush1.bf16.msra.mxu0 %v5847_v28 }
 0x5d1   :  { %2999 = vmatprep.subr.bf16.mxu0 %v5853_v57 }
 0x5d2   :  { %5535 = vmatmul.mubr.bf16.gmra.mrb[132].mxu1 %v2373_v24 }
 0x5d3   :  { %5538 = vmatprep.mubr.bf16.mxu1 %v2374_v12  ;;  %5551 = vmatpush3.bf16.msra.mxu1 %v5838_v52 }
 0x5d4   :  { %5552 = vmatprep.subr.bf16.mxu1 %v5842_v25  ;;  %3000 = vmatpush1.bf16.msra.mxu0 %v5851_v59 }
 0x5d5   :  { %3001 = vmatprep.subr.bf16.mxu0 %v5857_v56 }
 0x5d7   :  { %5553 = vmatpush3.bf16.msra.mxu1 %v5842_v25 }
 0x5d8   :  { %5554 = vmatprep.subr.bf16.mxu1 %v5846_v37  ;;  %3002 = vmatpush1.bf16.msra.mxu0 %v5855_v58 }
 0x5da   :  { %5539 = vmatmul.mubr.bf16.gmra.mrb[136].mxu1 %v2375_v34 }
 0x5db   :  { %5542 = vmatprep.mubr.bf16.mxu1 %v2376_v44  ;;  %5555 = vmatpush3.bf16.msra.mxu1 %v5846_v37 }
 0x5dc   :  { %5556 = vmatprep.subr.bf16.mxu1 %v5850_v54 }
 0x5df   :  { %5557 = vmatpush3.bf16.msra.mxu1 %v5850_v54 }
 0x5e0   :  { %5558 = vmatprep.subr.bf16.mxu1 %v5854_v60 }
 0x5e2   :  { %5543 = vmatmul.mubr.bf16.gmra.mrb[140].mxu1 %v2377_v27 }
 0x5e3   :  { %5559 = vmatpush3.bf16.msra.mxu1 %v5854_v60 }
 0x5e4   :  { %5560 = vmatprep.subr.bf16.mxu1 %v5858_v39 }
 0x5e7   :  { %5561 = vmatpush3.bf16.msra.mxu1 %v5858_v39 }
 0x65d   :  { %v5002_v42 = vpop.f32.mrb[96].mxu1 }
 0x65e   :  { %v5003_v49 = vpop.f32.mrb[97].mxu1 }
 0x65f   :  { %v5004_v62 = vadd.f32 %v5003_v49, %v5002_v42  ;;  %v5005_v1 = vpop.f32.mrb[98].mxu1 }
 0x660   :  { %v5006_v2 = vpop.f32.mrb[99].mxu1 }
 0x661   :  { %v5007_v63 = vadd.f32 %v5006_v2, %v5005_v1  ;;  %v2644_v51 = vadd.f32 %v5004_v62, %v6771_v55 }
 0x663   :  { %v2647_v57 = vadd.f32 %v5007_v63, %v6771_v55 }
 0x665   :  { %v5008_v0 = vpop.f32.mrb[100].mxu1 }
 0x666   :  { %v5009_v8 = vpop.f32.mrb[101].mxu1 }
 0x667   :  { %v5010_v4 = vadd.f32 %v5009_v8, %v5008_v0  ;;  %v5011_v5 = vpop.f32.mrb[102].mxu1 }
 0x668   :  { %v5012_v61 = vpop.f32.mrb[103].mxu1 }
 0x669   :  { %v5013_v6 = vadd.f32 %v5012_v61, %v5011_v5  ;;  %v2652_v45 = vadd.f32 %v5010_v4, %v6771_v55 }
 0x66b   :  { %v2655_v28 = vadd.f32 %v5013_v6, %v6771_v55 }
 0x66d   :  { %v5014_v9 = vpop.f32.mrb[104].mxu1 }
 0x66e   :  { %v5015_v11 = vpop.f32.mrb[105].mxu1 }
 0x66f   :  { %v5016_v3 = vadd.f32 %v5015_v11, %v5014_v9  ;;  %v5017_v13 = vpop.f32.mrb[106].mxu1 }
 0x670   :  { %v5018_v10 = vpop.f32.mrb[107].mxu1 }
 0x671   :  { %v5019_v14 = vadd.f32 %v5018_v10, %v5017_v13  ;;  %v2660_v8 = vadd.f32 %v5016_v3, %v6771_v55 }
 0x673   :  { %v2663_v9 = vadd.f32 %v5019_v14, %v6771_v55 }
 0x675   :  { %v5020_v17 = vpop.f32.mrb[108].mxu1 }
 0x676   :  { %v5021_v7 = vpop.f32.mrb[109].mxu1 }
 0x677   :  { %v5022_v19 = vadd.f32 %v5021_v7, %v5020_v17  ;;  %v5023_v21 = vpop.f32.mrb[110].mxu1 }
 0x678   :  { %v5024_v22 = vpop.f32.mrb[111].mxu1 }
 0x679   :  { %v5025_v23 = vadd.f32 %v5024_v22, %v5023_v21  ;;  %v2668_v2 = vadd.f32 %v5022_v19, %v6771_v55 }
 0x67b   :  { %v2671_v61 = vadd.f32 %v5025_v23, %v6771_v55 }
 0x67d   :  { %v5026_v24 = vpop.f32.mrb[112].mxu1 }
 0x67e   :  { %v5027_v26 = vpop.f32.mrb[113].mxu1 }
 0x67f   :  { %v6756_v18 = vadd.f32 %v5027_v26, %v5026_v24  ;;  %v5029_v29 = vpop.f32.mrb[114].mxu1 }
 0x680   :  { %v5030_v20 = vpop.f32.mrb[115].mxu1 }
 0x681   :  { %v6758_v31 = vadd.f32 %v5030_v20, %v5029_v29  ;;  %v2676_v26 = vadd.f32 %v6756_v18, %v6771_v55 }
 0x685   :  { %v5032_v34 = vpop.f32.mrb[116].mxu1 }
 0x686   :  { %v5033_v35 = vpop.f32.mrb[117].mxu1 }
 0x687   :  { %v5034_v12 = vadd.f32 %v5033_v35, %v5032_v34  ;;  %v5035_v38 = vpop.f32.mrb[118].mxu1 }
 0x688   :  { %v5036_v15 = vpop.f32.mrb[119].mxu1 }
 0x689   :  { %v5037_v40 = vadd.f32 %v5036_v15, %v5035_v38  ;;  %v2684_v22 = vadd.f32 %v5034_v12, %v6771_v55  ;;  %v2679_v38 = vadd.f32 %v6758_v31, %v6771_v55 }
 0x68b   :  { %v2687_v20 = vadd.f32 %v5037_v40, %v6771_v55 }
 0x68d   :  { %v5038_v27 = vpop.f32.mrb[120].mxu1 }
 0x68e   :  { %v5039_v43 = vpop.f32.mrb[121].mxu1 }
 0x68f   :  { %v6760_v44 = vadd.f32 %v5039_v43, %v5038_v27  ;;  %v5041_v41 = vpop.f32.mrb[122].mxu1 }
 0x690   :  { %v5042_v16 = vpop.f32.mrb[123].mxu1 }
 0x691   :  { %v6762_v36 = vadd.f32 %v5042_v16, %v5041_v41 }
 0x695   :  { %v5044_v46 = vpop.f32.mrb[124].mxu1 }
 0x696   :  { %v5045_v30 = vpop.f32.mrb[125].mxu1 }
 0x697   :  { %v6764_v47 = vadd.f32 %v5045_v30, %v5044_v46  ;;  %v5047_v50 = vpop.f32.mrb[126].mxu1 }
 0x698   :  { %v5048_v32 = vpop.f32.mrb[127].mxu1 }
 0x699   :  { %v6766_v52 = vadd.f32 %v5048_v32, %v5047_v50  ;;  %v2700_v40 = vadd.f32 %v6764_v47, %v6771_v55  ;;  %v2692_v32 = vadd.f32 %v6760_v44, %v6771_v55 }
 0x69d   :  { %v5532_v25 = vpop.f32.mrb[128].mxu1 }
 0x69e   :  { %v2749_v53 = vadd.f32 %v5532_v25, %v2652_v45  ;;  %v2740_v37 = vpop.f32.mrb[129].mxu1  ;;  %v2703_v25 = vadd.f32 %v6766_v52, %v6771_v55  ;;  %v5864_v52 = vld [vmem:[%s7171_s2 + $0x8] ss:$12 sps:$4 sm:$0xff]  }
 0x69f   :  { %v2741_v33 = vadd.f32 %v2740_v37, %v2644_v51  ;;  %v5533_v54 = vpop.f32.mrb[130].mxu1  ;;  %v2695_v37 = vadd.f32 %v6762_v36, %v6771_v55  ;;  %v6805_v36 = vld [vmem:[%s7171_s2 + $0x4] ss:$12 sps:$4 sm:$0xff]  }
 0x6a0   :  { %v2752_v59 = vadd.f32 %v5533_v54, %v2655_v28  ;;  %v2743_v60 = vpop.f32.mrb[131].mxu1  ;;  %v2805_v58 = vmax.f32 %v2749_v53, 0.0 }
 0x6a1   :  { %v2744_v56 = vadd.f32 %v2743_v60, %v2647_v57  ;;  %v2803_v42 = vmax.f32 %v2741_v33, 0.0 }
 0x6a2   :  { %v2806_v39 = vmax.f32 %v2752_v59, 0.0 }
 0x6a3   :  { %v2804_v49 = vmax.f32 %v2744_v56, 0.0 }
 0x6a4   :  { %v2820_v1 = vpack.c.bf16 %v2806_v39, %v2805_v58 }
 0x6a5   :  { %v2819_v0 = vpack.c.bf16 %v2804_v49, %v2803_v42  ;;  %v5536_v62 = vpop.f32.mrb[132].mxu1 }
 0x6a6   :  { %v2765_v4 = vadd.f32 %v5536_v62, %v2668_v2  ;;  %v2756_v5 = vpop.f32.mrb[133].mxu1 }
 0x6a7   :  { %v2757_v6 = vadd.f32 %v2756_v5, %v2660_v8  ;;  %v5537_v63 = vpop.f32.mrb[134].mxu1  ;;  %3020 = vmatmul.mubr.bf16.vlgmr.msra.gmra.mrb[144].mxu0 %v2819_v0  ;;  %5562 = vmatprep.mubr.bf16.mxu1 %v2819_v0 }
 0x6a8   :  { %v2768_v11 = vadd.f32 %v5537_v63, %v2671_v61  ;;  %v2759_v13 = vpop.f32.mrb[135].mxu1  ;;  %5563 = vmatmul.mubr.bf16.vlgmr.msra.gmra.mrb[144].mxu1 %v2820_v1  ;;  %3029 = vmatprep.mubr.bf16.mxu0 %v5931_v48  ;;  %v2809_v17 = vmax.f32 %v2765_v4, 0.0 }
 0x6a9   :  { %v2760_v10 = vadd.f32 %v2759_v13, %v2663_v9  ;;  %v2807_v19 = vmax.f32 %v2757_v6, 0.0 }
 0x6aa   :  { %v2810_v7 = vmax.f32 %v2768_v11, 0.0 }
 0x6ab   :  { %v2808_v3 = vmax.f32 %v2760_v10, 0.0 }
 0x6ac   :  { %v2822_v21 = vpack.c.bf16 %v2810_v7, %v2809_v17 }
 0x6ad   :  { %v2821_v23 = vpack.c.bf16 %v2808_v3, %v2807_v19  ;;  %v5540_v24 = vpop.f32.mrb[136].mxu1 }
 0x6ae   :  { %v2781_v29 = vadd.f32 %v5540_v24, %v2684_v22  ;;  %v2772_v14 = vpop.f32.mrb[137].mxu1 }
 0x6af   :  { %v2773_v34 = vadd.f32 %v2772_v14, %v2676_v26  ;;  %v5541_v35 = vpop.f32.mrb[138].mxu1  ;;  %3030 = vmatmul.mubr.bf16.gmra.mrb[148].mxu0 %v2820_v1  ;;  %5566 = vmatprep.mubr.bf16.mxu1 %v2821_v23 }
 0x6b0   :  { %v2784_v15 = vadd.f32 %v5541_v35, %v2687_v20  ;;  %v2775_v27 = vpop.f32.mrb[139].mxu1  ;;  %5567 = vmatmul.mubr.bf16.gmra.mrb[148].mxu1 %v2822_v21  ;;  %3039 = vmatprep.mubr.bf16.mxu0 %v5931_v48  ;;  %v2813_v43 = vmax.f32 %v2781_v29, 0.0 }
 0x6b1   :  { %v2776_v12 = vadd.f32 %v2775_v27, %v2679_v38  ;;  %v2811_v18 = vmax.f32 %v2773_v34, 0.0 }
 0x6b2   :  { %v2814_v41 = vmax.f32 %v2784_v15, 0.0 }
 0x6b3   :  { %v2812_v16 = vmax.f32 %v2776_v12, 0.0 }
 0x6b4   :  { %v2824_v46 = vpack.c.bf16 %v2814_v41, %v2813_v43 }
 0x6b5   :  { %v2823_v30 = vpack.c.bf16 %v2812_v16, %v2811_v18  ;;  %v5544_v50 = vpop.f32.mrb[140].mxu1 }
 0x6b6   :  { %v2797_v31 = vadd.f32 %v5544_v50, %v2700_v40  ;;  %v2788_v45 = vpop.f32.mrb[141].mxu1 }
 0x6b7   :  { %v2789_v51 = vadd.f32 %v2788_v45, %v2692_v32  ;;  %v5545_v53 = vpop.f32.mrb[142].mxu1  ;;  %3040 = vmatmul.mubr.bf16.gmra.mrb[152].mxu0 %v2821_v23  ;;  %5570 = vmatprep.mubr.bf16.mxu1 %v2823_v30 }
 0x6b8   :  { %v2800_v28 = vadd.f32 %v5545_v53, %v2703_v25  ;;  %v2791_v33 = vpop.f32.mrb[143].mxu1  ;;  %5571 = vmatmul.mubr.bf16.gmra.mrb[152].mxu1 %v2824_v46  ;;  %3049 = vmatprep.mubr.bf16.mxu0 %v5931_v48  ;;  %v2817_v54 = vmax.f32 %v2797_v31, 0.0  ;;  %v5893_v53 = vld [vmem:[%s7172_s7 + $0x4] ss:$12 sps:$4 sm:$0xff]  }
 0x6b9   :  { %v2792_v47 = vadd.f32 %v2791_v33, %v2695_v37  ;;  %v2815_v57 = vmax.f32 %v2789_v51, 0.0 }
 0x6ba   :  { %v2818_v44 = vmax.f32 %v2800_v28, 0.0 }
 0x6bb   :  { %v2816_v59 = vmax.f32 %v2792_v47, 0.0  ;;  %v5866_v47 = vld [vmem:[%s7171_s2 + $0x20] ss:$12 sps:$4 sm:$0xff]  }
 0x6bc   :  { %v2826_v60 = vpack.c.bf16 %v2818_v44, %v2817_v54  ;;  %v5872_v44 = vld [vmem:[%s7171_s2 + $0x38] ss:$12 sps:$4 sm:$0xff]  }
 0x6bd   :  { %v2825_v56 = vpack.c.bf16 %v2816_v59, %v2815_v57  ;;  %v5891_v57 = vld [vmem:[%s7172_s7] ss:$12 sps:$4 sm:$0xff]   ;;  %v5896_v59 = vld [vmem:[%s7172_s7 + $0x1c] ss:$12 sps:$4 sm:$0xff]  }
 0x6bf   :  { %3050 = vmatmul.mubr.bf16.gmra.mrb[156].mxu0 %v2822_v21  ;;  %5574 = vmatprep.mubr.bf16.mxu1 %v2825_v56 }
 0x6c0   :  { %5575 = vmatmul.mubr.bf16.gmra.mrb[156].mxu1 %v2826_v60  ;;  %3059 = vmatprep.mubr.bf16.mxu0 %v5931_v48 }
 0x6c1   :  { %3468 = vmatprep.mubr.bf16.mxu1 %v6805_v36 }
 0x6c7   :  { %3060 = vmatmul.mubr.bf16.gmra.mrb[160].mxu0 %v2823_v30 }
 0x6c8   :  { %3069 = vmatprep.mubr.bf16.mxu0 %v5931_v48 }
 0x6cf   :  { %3070 = vmatmul.mubr.bf16.gmra.mrb[164].mxu0 %v2824_v46 }
 0x6d0   :  { %3079 = vmatprep.mubr.bf16.mxu0 %v5931_v48 }
 0x6d7   :  { %3080 = vmatmul.mubr.bf16.gmra.mrb[168].mxu0 %v2825_v56  ;;  %v5894_v56 = vld [vmem:[%s7172_s7 + $0x18] ss:$12 sps:$4 sm:$0xff]  }
 0x6d8   :  { %3089 = vmatprep.mubr.bf16.mxu0 %v5931_v48 }
 0x6df   :  { %3090 = vmatmul.mubr.bf16.gmra.mrb[172].mxu0 %v2826_v60 }
 0x6e0   :  { %5594 = vmatprep.mubr.bf16.mxu0 %v5864_v52 }
 0x77a   :  { %v3021_v55 = vpop.f32.mrb[144].mxu0 }
 0x77b   :  { %v3023_v58 = vpop.f32.mrb[145].mxu0  ;;  %v5564_v39 = vpop.f32.mrb[144].mxu1 }
 0x77c   :  { %v3025_v42 = vpop.f32.mrb[146].mxu0  ;;  %v3134_v49 = vpop.f32.mrb[145].mxu1 }
 0x77d   :  { %v3197_v1 = vpack.c.bf16 %v3025_v42, %v3021_v55  ;;  %v3027_v2 = vpop.f32.mrb[147].mxu0  ;;  %v5565_v0 = vpop.f32.mrb[146].mxu1  ;;  %v5900_v55 = vld [vmem:[%s7172_s7 + $0x34] ss:$12 sps:$4 sm:$0xff]  }
 0x77e   :  { %v3213_v62 = vpack.c.bf16 %v3027_v2, %v3023_v58  ;;  %v3230_v8 = vpack.c.bf16 %v5565_v0, %v5564_v39  ;;  %v3137_v4 = vpop.f32.mrb[147].mxu1  ;;  %v5880_v2 = vld [vmem:[%s7171_s2 + $0x68] ss:$12 sps:$4 sm:$0xff]   ;;  %v5898_v0 = vld [vmem:[%s7172_s7 + $0x30] ss:$12 sps:$4 sm:$0xff]  }
 0x77f   :  { %v3229_v5 = vpack.c.bf16 %v3137_v4, %v3134_v49  ;;  %v5874_v49 = vld [vmem:[%s7171_s2 + $0x50] ss:$12 sps:$4 sm:$0xff]   ;;  %v5902_v4 = vld [vmem:[%s7172_s7 + $0x48] ss:$12 sps:$4 sm:$0xff]  }
 0x780   :  { %5082 = vmatprep.subr.bf16.mxu1 %v3213_v62  ;;  %v5904_v62 = vld [vmem:[%s7172_s7 + $0x4c] ss:$12 sps:$4 sm:$0xff]  }
 0x781   :  { %5083 = vmatpush3.bf16.msra.mxu1 %v3197_v1  ;;  %5578 = vmatprep.subr.bf16.mxu0 %v3229_v5 }
 0x782   :  { %v3031_v61 = vpop.f32.mrb[148].mxu0  ;;  %5579 = vmatpush3.bf16.msra.mxu0 %v3229_v5 }
 0x783   :  { %v3033_v6 = vpop.f32.mrb[149].mxu0  ;;  %v5568_v63 = vpop.f32.mrb[148].mxu1  ;;  %5580 = vmatprep.subr.bf16.mxu0 %v3230_v8 }
 0x784   :  { %v3035_v9 = vpop.f32.mrb[150].mxu0  ;;  %v3150_v11 = vpop.f32.mrb[149].mxu1 }
 0x785   :  { %v3198_v13 = vpack.c.bf16 %v3035_v9, %v3031_v61  ;;  %v3037_v10 = vpop.f32.mrb[151].mxu0  ;;  %v5569_v17 = vpop.f32.mrb[150].mxu1  ;;  %v5908_v61 = vld [vmem:[%s7172_s7 + $0x64] ss:$12 sps:$4 sm:$0xff]  }
 0x786   :  { %v3214_v7 = vpack.c.bf16 %v3037_v10, %v3033_v6  ;;  %v3232_v19 = vpack.c.bf16 %v5569_v17, %v5568_v63  ;;  %v3153_v3 = vpop.f32.mrb[151].mxu1  ;;  %5581 = vmatpush3.bf16.msra.mxu0 %v3230_v8  ;;  %v5888_v10 = vld [vmem:[%s7171_s2 + $0x98] ss:$12 sps:$4 sm:$0xff]   ;;  %v5906_v17 = vld [vmem:[%s7172_s7 + $0x60] ss:$12 sps:$4 sm:$0xff]  }
 0x787   :  { %v3231_v21 = vpack.c.bf16 %v3153_v3, %v3150_v11  ;;  %v5882_v11 = vld [vmem:[%s7171_s2 + $0x80] ss:$12 sps:$4 sm:$0xff]  }
 0x788   :  { %5084 = vmatprep.subr.bf16.mxu1 %v3214_v7 }
 0x789   :  { %5085 = vmatpush3.bf16.msra.mxu1 %v3198_v13  ;;  %5582 = vmatprep.subr.bf16.mxu0 %v3231_v21 }
 0x78a   :  { %v3041_v22 = vpop.f32.mrb[152].mxu0  ;;  %5583 = vmatpush3.bf16.msra.mxu0 %v3231_v21 }
 0x78b   :  { %v3043_v23 = vpop.f32.mrb[153].mxu0  ;;  %v5572_v24 = vpop.f32.mrb[152].mxu1  ;;  %5584 = vmatprep.subr.bf16.mxu0 %v3232_v19 }
 0x78c   :  { %v3045_v26 = vpop.f32.mrb[154].mxu0  ;;  %v3166_v29 = vpop.f32.mrb[153].mxu1 }
 0x78d   :  { %v3199_v14 = vpack.c.bf16 %v3045_v26, %v3041_v22  ;;  %v3047_v20 = vpop.f32.mrb[155].mxu0  ;;  %v5573_v34 = vpop.f32.mrb[154].mxu1  ;;  %v5897_v26 = vld [vmem:[%s7172_s7 + $0x8] ss:$12 sps:$4 sm:$0xff]  }
 0x78e   :  { %v3215_v35 = vpack.c.bf16 %v3047_v20, %v3043_v23  ;;  %v3234_v38 = vpack.c.bf16 %v5573_v34, %v5572_v24  ;;  %v3169_v15 = vpop.f32.mrb[155].mxu1  ;;  %5585 = vmatpush3.bf16.msra.mxu0 %v3232_v19  ;;  %v5890_v23 = vld [vmem:[%s7171_s2 + $0xb0] ss:$12 sps:$4 sm:$0xff]   ;;  %v5901_v20 = vld [vmem:[%s7172_s7 + $0x20] ss:$12 sps:$4 sm:$0xff]  }
 0x78f   :  { %v3233_v27 = vpack.c.bf16 %v3169_v15, %v3166_v29  ;;  %v6868_v29 = vld [vmem:[%s7171_s2] ss:$12 sps:$4 sm:$0xff]   ;;  %v5905_v34 = vld [vmem:[%s7172_s7 + $0x38] ss:$12 sps:$4 sm:$0xff]   ;;  %v5909_v15 = vld [vmem:[%s7172_s7 + $0x50] ss:$12 sps:$4 sm:$0xff]  }
 0x790   :  { %5086 = vmatprep.subr.bf16.mxu1 %v3215_v35  ;;  %v6887_v35 = vld [vmem:[%s7171_s2 + $0x18] ss:$12 sps:$4 sm:$0xff]  }
 0x791   :  { %5087 = vmatpush3.bf16.msra.mxu1 %v3199_v14  ;;  %5586 = vmatprep.subr.bf16.mxu0 %v3233_v27  ;;  %v6873_v14 = vld [vmem:[%s7171_s2 + $0x1c] ss:$12 sps:$4 sm:$0xff]  }
 0x792   :  { %v3051_v12 = vpop.f32.mrb[156].mxu0  ;;  %5587 = vmatpush3.bf16.msra.mxu0 %v3233_v27  ;;  %v6902_v27 = vld [vmem:[%s7171_s2 + $0x30] ss:$12 sps:$4 sm:$0xff]  }
 0x793   :  { %v3053_v43 = vpop.f32.mrb[157].mxu0  ;;  %v5576_v41 = vpop.f32.mrb[156].mxu1  ;;  %5588 = vmatprep.subr.bf16.mxu0 %v3234_v38 }
 0x794   :  { %v3055_v18 = vpop.f32.mrb[158].mxu0  ;;  %v3182_v16 = vpop.f32.mrb[157].mxu1 }
 0x795   :  { %v3200_v46 = vpack.c.bf16 %v3055_v18, %v3051_v12  ;;  %v3057_v40 = vpop.f32.mrb[159].mxu0  ;;  %v5577_v30 = vpop.f32.mrb[158].mxu1  ;;  %v6907_v12 = vld [vmem:[%s7171_s2 + $0x4c] ss:$12 sps:$4 sm:$0xff]  }
 0x796   :  { %v3216_v50 = vpack.c.bf16 %v3057_v40, %v3053_v43  ;;  %v3236_v32 = vpack.c.bf16 %v5577_v30, %v5576_v41  ;;  %v3185_v31 = vpop.f32.mrb[159].mxu1  ;;  %5589 = vmatpush3.bf16.msra.mxu0 %v3234_v38  ;;  %v6892_v38 = vld [vmem:[%s7171_s2 + $0x34] ss:$12 sps:$4 sm:$0xff]   ;;  %v6919_v41 = vld [vmem:[%s7171_s2 + $0x64] ss:$12 sps:$4 sm:$0xff]  }
 0x797   :  { %v3235_v45 = vpack.c.bf16 %v3185_v31, %v3182_v16  ;;  %v6914_v43 = vld [vmem:[%s7171_s2 + $0x48] ss:$12 sps:$4 sm:$0xff]   ;;  %v6926_v18 = vld [vmem:[%s7171_s2 + $0x60] ss:$12 sps:$4 sm:$0xff]   ;;  %v6950_v30 = vld [vmem:[%s7171_s2 + $0x90] ss:$12 sps:$4 sm:$0xff]  }
 0x798   :  { %5088 = vmatprep.subr.bf16.mxu1 %v3216_v50  ;;  %v6931_v16 = vld [vmem:[%s7171_s2 + $0x7c] ss:$12 sps:$4 sm:$0xff]   ;;  %v6943_v40 = vld [vmem:[%s7171_s2 + $0x94] ss:$12 sps:$4 sm:$0xff]   ;;  %v6955_v50 = vld [vmem:[%s7171_s2 + $0xac] ss:$12 sps:$4 sm:$0xff]  }
 0x799   :  { %5089 = vmatpush3.bf16.msra.mxu1 %v3200_v46  ;;  %5590 = vmatprep.subr.bf16.mxu0 %v3235_v45  ;;  %v6938_v46 = vld [vmem:[%s7171_s2 + $0x78] ss:$12 sps:$4 sm:$0xff]   ;;  %v5912_v31 = vld [vmem:[%s7172_s7 + $0x7c] ss:$12 sps:$4 sm:$0xff]  }
 0x79a   :  { %v3061_v25 = vpop.f32.mrb[160].mxu0  ;;  %5591 = vmatpush3.bf16.msra.mxu0 %v3235_v45  ;;  %v5910_v45 = vld [vmem:[%s7172_s7 + $0x78] ss:$12 sps:$4 sm:$0xff]  }
 0x79b   :  { %v3063_v51 = vpop.f32.mrb[161].mxu0  ;;  %5592 = vmatprep.subr.bf16.mxu0 %v3236_v32 }
 0x79c   :  { %v3065_v37 = vpop.f32.mrb[162].mxu0 }
 0x79d   :  { %v3201_v28 = vpack.c.bf16 %v3065_v37, %v3061_v25  ;;  %v3067_v33 = vpop.f32.mrb[163].mxu0  ;;  %v5913_v25 = vld [vmem:[%s7172_s7 + $0x68] ss:$12 sps:$4 sm:$0xff]   ;;  %v5917_v37 = vld [vmem:[%s7172_s7 + $0x80] ss:$12 sps:$4 sm:$0xff]  }
 0x79e   :  { %v3217_v54 = vpack.c.bf16 %v3067_v33, %v3063_v51  ;;  %5593 = vmatpush3.bf16.msra.mxu0 %v3236_v32  ;;  %v6962_v32 = vld [vmem:[%s7171_s2 + $0xa8] ss:$12 sps:$4 sm:$0xff]  }
 0x79f   :  { %3814 = vmatprep.subr.bf16.mxu0 %v5893_v53  ;;  %v5916_v51 = vld [vmem:[%s7172_s7 + $0x94] ss:$12 sps:$4 sm:$0xff]   ;;  %v5914_v53 = vld [vmem:[%s7172_s7 + $0x90] ss:$12 sps:$4 sm:$0xff]  }
 0x7a0   :  { %5090 = vmatprep.subr.bf16.mxu1 %v3217_v54  ;;  %v5918_v33 = vld [vmem:[%s7172_s7 + $0xa8] ss:$12 sps:$4 sm:$0xff]   ;;  %v5922_v54 = vld [vmem:[%s7172_s7 + $0xb0] ss:$12 sps:$4 sm:$0xff]  }
 0x7a1   :  { %5091 = vmatpush3.bf16.msra.mxu1 %v3201_v28  ;;  %5595 = vmatmul.mubr.bf16.vlgmr.msra.gmra.mrb[176].mxu0 %v5866_v47  ;;  %v5920_v28 = vld [vmem:[%s7172_s7 + $0xac] ss:$12 sps:$4 sm:$0xff]  }
 0x7a2   :  { %v3071_v60 = vpop.f32.mrb[164].mxu0  ;;  %5598 = vmatprep.mubr.bf16.mxu0 %v5872_v44  ;;  %3815 = vmatpush1.bf16.msra.mxu0 %v5891_v57  ;;  %v5921_v47 = vld [vmem:[%s7172_s7 + $0x98] ss:$12 sps:$4 sm:$0xff]  }
 0x7a3   :  { %v3073_v52 = vpop.f32.mrb[165].mxu0  ;;  %3816 = vmatprep.subr.bf16.mxu0 %v5896_v59 }
 0x7a4   :  { %v3075_v58 = vpop.f32.mrb[166].mxu0 }
 0x7a5   :  { %v3202_v39 = vpack.c.bf16 %v3075_v58, %v3071_v60  ;;  %v3077_v42 = vpop.f32.mrb[167].mxu0 }
 0x7a6   :  { %v3218_v1 = vpack.c.bf16 %v3077_v42, %v3073_v52  ;;  %3817 = vmatpush1.bf16.msra.mxu0 %v5894_v56 }
 0x7a7   :  { %3818 = vmatprep.subr.bf16.mxu0 %v5900_v55 }
 0x7a8   :  { %5092 = vmatprep.subr.bf16.mxu1 %v3218_v1 }
 0x7a9   :  { %5093 = vmatpush3.bf16.msra.mxu1 %v3202_v39  ;;  %5599 = vmatmul.mubr.bf16.gmra.mrb[180].mxu0 %v5874_v49 }
 0x7aa   :  { %v3081_v8 = vpop.f32.mrb[168].mxu0  ;;  %5602 = vmatprep.mubr.bf16.mxu0 %v5880_v2  ;;  %3819 = vmatpush1.bf16.msra.mxu0 %v5898_v0 }
 0x7ab   :  { %v3083_v5 = vpop.f32.mrb[169].mxu0  ;;  %3820 = vmatprep.subr.bf16.mxu0 %v5904_v62 }
 0x7ac   :  { %v3085_v6 = vpop.f32.mrb[170].mxu0 }
 0x7ad   :  { %v3203_v63 = vpack.c.bf16 %v3085_v6, %v3081_v8  ;;  %v3087_v9 = vpop.f32.mrb[171].mxu0 }
 0x7ae   :  { %v3219_v13 = vpack.c.bf16 %v3087_v9, %v3083_v5  ;;  %3821 = vmatpush1.bf16.msra.mxu0 %v5902_v4 }
 0x7af   :  { %3822 = vmatprep.subr.bf16.mxu0 %v5908_v61  ;;  %v7018_v61 = vld [vmem:[%s7173_s11] ss:$0 sm:$0xff] }
 0x7b0   :  { %5094 = vmatprep.subr.bf16.mxu1 %v3219_v13 }
 0x7b1   :  { %5095 = vmatpush3.bf16.msra.mxu1 %v3203_v63  ;;  %5603 = vmatmul.mubr.bf16.gmra.mrb[184].mxu0 %v5882_v11 }
 0x7b2   :  { %v3091_v7 = vpop.f32.mrb[172].mxu0  ;;  %5606 = vmatprep.mubr.bf16.mxu0 %v5888_v10  ;;  %3823 = vmatpush1.bf16.msra.mxu0 %v5906_v17 }
 0x7b3   :  { %v3093_v19 = vpop.f32.mrb[173].mxu0  ;;  %3824 = vmatprep.subr.bf16.mxu0 %v5912_v31 }
 0x7b4   :  { %v3095_v3 = vpop.f32.mrb[174].mxu0 }
 0x7b5   :  { %v3204_v21 = vpack.c.bf16 %v3095_v3, %v3091_v7  ;;  %v3097_v22 = vpop.f32.mrb[175].mxu0 }
 0x7b6   :  { %v3220_v24 = vpack.c.bf16 %v3097_v22, %v3093_v19  ;;  %3825 = vmatpush1.bf16.msra.mxu0 %v5910_v45 }
 0x7b7   :  { %3826 = vmatprep.subr.bf16.mxu0 %v5916_v51 }
 0x7b8   :  { %5096 = vmatprep.subr.bf16.mxu1 %v3220_v24 }
 0x7b9   :  { %5097 = vmatpush3.bf16.msra.mxu1 %v3204_v21  ;;  %5607 = vmatmul.mubr.bf16.gmra.mrb[188].mxu0 %v5890_v23 }
 0x7ba   :  { %5610 = vmatprep.subr.bf16.mxu1 %v5897_v26  ;;  %3846 = vmatprep.mubr.bf16.mxu0 %v5931_v48 }
 0x7bb   :  { %3827 = vmatpush1.bf16.msra.mxu0 %v5914_v53 }
 0x7bc   :  { %3469 = vmatmul.mubr.bf16.vlgmr.msra.gmra.mrb[160].mxu1 %v6868_v29  ;;  %3828 = vmatprep.subr.bf16.mxu0 %v5920_v28 }
 0x7bd   :  { %3476 = vmatprep.mubr.bf16.mxu1 %v6873_v14  ;;  %5611 = vmatpush3.bf16.msra.mxu1 %v5897_v26 }
 0x7be   :  { %5612 = vmatprep.subr.bf16.mxu1 %v5901_v20 }
 0x7bf   :  { %3829 = vmatpush1.bf16.msra.mxu0 %v5918_v33 }
 0x7c1   :  { %5613 = vmatpush3.bf16.msra.mxu1 %v5901_v20 }
 0x7c2   :  { %5614 = vmatprep.subr.bf16.mxu1 %v5905_v34 }
 0x7c4   :  { %3477 = vmatmul.mubr.bf16.gmra.mrb[164].mxu1 %v6887_v35 }
 0x7c5   :  { %3484 = vmatprep.mubr.bf16.mxu1 %v6892_v38  ;;  %5615 = vmatpush3.bf16.msra.mxu1 %v5905_v34 }
 0x7c6   :  { %5616 = vmatprep.subr.bf16.mxu1 %v5909_v15 }
 0x7c9   :  { %5617 = vmatpush3.bf16.msra.mxu1 %v5909_v15 }
 0x7ca   :  { %5618 = vmatprep.subr.bf16.mxu1 %v5913_v25 }
 0x7cc   :  { %3485 = vmatmul.mubr.bf16.gmra.mrb[168].mxu1 %v6902_v27 }
 0x7cd   :  { %3492 = vmatprep.mubr.bf16.mxu1 %v6907_v12  ;;  %5619 = vmatpush3.bf16.msra.mxu1 %v5913_v25 }
 0x7ce   :  { %5620 = vmatprep.subr.bf16.mxu1 %v5917_v37 }
 0x7d1   :  { %5621 = vmatpush3.bf16.msra.mxu1 %v5917_v37 }
 0x7d2   :  { %5622 = vmatprep.subr.bf16.mxu1 %v5921_v47 }
 0x7d4   :  { %3493 = vmatmul.mubr.bf16.gmra.mrb[172].mxu1 %v6914_v43 }
 0x7d5   :  { %3500 = vmatprep.mubr.bf16.mxu1 %v6919_v41  ;;  %5623 = vmatpush3.bf16.msra.mxu1 %v5921_v47 }
 0x7d6   :  { %5624 = vmatprep.subr.bf16.mxu1 %v5922_v54 }
 0x7d9   :  { %5625 = vmatpush3.bf16.msra.mxu1 %v5922_v54 }
 0x7dc   :  { %3501 = vmatmul.mubr.bf16.gmra.mrb[176].mxu1 %v6926_v18 }
 0x7dd   :  { %3508 = vmatprep.mubr.bf16.mxu1 %v6931_v16 }
 0x7e4   :  { %3509 = vmatmul.mubr.bf16.gmra.mrb[180].mxu1 %v6938_v46 }
 0x7e5   :  { %3516 = vmatprep.mubr.bf16.mxu1 %v6943_v40 }
 0x7ec   :  { %3517 = vmatmul.mubr.bf16.gmra.mrb[184].mxu1 %v6950_v30 }
 0x7ed   :  { %3524 = vmatprep.mubr.bf16.mxu1 %v6955_v50 }
 0x7f4   :  { %3525 = vmatmul.mubr.bf16.gmra.mrb[188].mxu1 %v6962_v32 }
 0x874   :  { %v5596_v44 = vpop.f32.mrb[176].mxu0 }
 0x875   :  { %v3567_v57 = vpop.f32.mrb[177].mxu0 }
 0x876   :  { %v5597_v59 = vpop.f32.mrb[178].mxu0 }
 0x877   :  { %v3570_v60 = vpop.f32.mrb[179].mxu0 }
 0x87c   :  { %v6995_v56 = vpop.f32.mrb[180].mxu0 }
 0x87d   :  { %v3583_v52 = vpop.f32.mrb[181].mxu0 }
 0x87e   :  { %v6997_v55 = vpop.f32.mrb[182].mxu0 }
 0x87f   :  { %v3586_v58 = vpop.f32.mrb[183].mxu0 }
 0x884   :  { %v6999_v39 = vpop.f32.mrb[184].mxu0 }
 0x885   :  { %v7001_v42 = vpop.f32.mrb[185].mxu0 }
 0x886   :  { %v7003_v49 = vpop.f32.mrb[186].mxu0 }
 0x887   :  { %v7005_v1 = vpop.f32.mrb[187].mxu0 }
 0x88c   :  { %v7007_v2 = vpop.f32.mrb[188].mxu0 }
 0x88d   :  { %v7009_v0 = vpop.f32.mrb[189].mxu0 }
 0x88e   :  { %v7011_v62 = vpop.f32.mrb[190].mxu0 }
 0x88f   :  { %v5098_v8 = vpop.f32.mrb[160].mxu1  ;;  %v7013_v4 = vpop.f32.mrb[191].mxu0 }
 0x890   :  { %v5099_v5 = vpop.f32.mrb[161].mxu1 }
 0x891   :  { %v5100_v6 = vadd.f32 %v5099_v5, %v5098_v8  ;;  %v5101_v63 = vpop.f32.mrb[162].mxu1 }
 0x892   :  { %v5102_v9 = vpop.f32.mrb[163].mxu1 }
 0x893   :  { %v5103_v11 = vadd.f32 %v5102_v9, %v5101_v63  ;;  %v3471_v13 = vadd.f32 %v5100_v6, %v7018_v61 }
 0x895   :  { %v3568_v10 = vadd.f32 %v3567_v57, %v3471_v13  ;;  %v3474_v17 = vadd.f32 %v5103_v11, %v7018_v61 }
 0x897   :  { %v5104_v7 = vpop.f32.mrb[164].mxu1  ;;  %v3571_v19 = vadd.f32 %v3570_v60, %v3474_v17  ;;  %v3630_v22 = vmax.f32 %v3568_v10, 0.0 }
 0x898   :  { %v5105_v3 = vpop.f32.mrb[165].mxu1 }
 0x899   :  { %v5106_v21 = vadd.f32 %v5105_v3, %v5104_v7  ;;  %v5107_v23 = vpop.f32.mrb[166].mxu1  ;;  %v3631_v24 = vmax.f32 %v3571_v19, 0.0 }
 0x89a   :  { %v5108_v26 = vpop.f32.mrb[167].mxu1 }
 0x89b   :  { %v3479_v20 = vadd.f32 %v5106_v21, %v7018_v61  ;;  %v5109_v34 = vadd.f32 %v5108_v26, %v5107_v23  ;;  %v3646_v15 = vpack.c.bf16 %v3631_v24, %v3630_v22 }
 0x89d   :  { %v3576_v31 = vadd.f32 %v5596_v44, %v3479_v20  ;;  %v3482_v45 = vadd.f32 %v5109_v34, %v7018_v61  ;;  %3847 = vmatmul.mubr.bf16.vlgmr.msra.gmra.mrb[192].mxu0 %v3646_v15  ;;  %5626 = vmatprep.mubr.bf16.mxu1 %v3646_v15 }
 0x89e   :  { %3856 = vmatprep.mubr.bf16.mxu0 %v5931_v48 }
 0x89f   :  { %v3579_v25 = vadd.f32 %v5597_v59, %v3482_v45  ;;  %v5110_v51 = vpop.f32.mrb[168].mxu1  ;;  %v3632_v37 = vmax.f32 %v3576_v31, 0.0 }
 0x8a0   :  { %v5111_v53 = vpop.f32.mrb[169].mxu1 }
 0x8a1   :  { %v3633_v28 = vmax.f32 %v3579_v25, 0.0  ;;  %v5112_v33 = vadd.f32 %v5111_v53, %v5110_v51  ;;  %v5113_v47 = vpop.f32.mrb[170].mxu1 }
 0x8a2   :  { %v5114_v54 = vpop.f32.mrb[171].mxu1 }
 0x8a3   :  { %v3647_v57 = vpack.c.bf16 %v3633_v28, %v3632_v37  ;;  %v5115_v60 = vadd.f32 %v5114_v54, %v5113_v47  ;;  %v3487_v8 = vadd.f32 %v5112_v33, %v7018_v61 }
 0x8a5   :  { %5627 = vmatmul.mubr.bf16.vlgmr.msra.gmra.mrb[192].mxu1 %v3647_v57  ;;  %v3584_v44 = vadd.f32 %v3583_v52, %v3487_v8  ;;  %3857 = vmatmul.mubr.bf16.gmra.mrb[196].mxu0 %v3647_v57  ;;  %v3490_v5 = vadd.f32 %v5115_v60, %v7018_v61 }
 0x8a6   :  { %3866 = vmatprep.mubr.bf16.mxu0 %v5931_v48 }
 0x8a7   :  { %v5116_v6 = vpop.f32.mrb[172].mxu1  ;;  %v3587_v59 = vadd.f32 %v3586_v58, %v3490_v5  ;;  %v3634_v11 = vmax.f32 %v3584_v44, 0.0 }
 0x8a8   :  { %v5117_v63 = vpop.f32.mrb[173].mxu1 }
 0x8a9   :  { %v5118_v9 = vadd.f32 %v5117_v63, %v5116_v6  ;;  %v5119_v13 = vpop.f32.mrb[174].mxu1  ;;  %v3635_v10 = vmax.f32 %v3587_v59, 0.0 }
 0x8aa   :  { %v5120_v17 = vpop.f32.mrb[175].mxu1 }
 0x8ab   :  { %v3495_v7 = vadd.f32 %v5118_v9, %v7018_v61  ;;  %v5121_v19 = vadd.f32 %v5120_v17, %v5119_v13  ;;  %v3648_v3 = vpack.c.bf16 %v3635_v10, %v3634_v11 }
 0x8ad   :  { %v3592_v21 = vadd.f32 %v6995_v56, %v3495_v7  ;;  %v3498_v52 = vadd.f32 %v5121_v19, %v7018_v61  ;;  %3867 = vmatmul.mubr.bf16.gmra.mrb[200].mxu0 %v3648_v3  ;;  %5630 = vmatprep.mubr.bf16.mxu1 %v3648_v3 }
 0x8ae   :  { %3876 = vmatprep.mubr.bf16.mxu0 %v5931_v48 }
 0x8af   :  { %v3595_v58 = vadd.f32 %v6997_v55, %v3498_v52  ;;  %v5122_v22 = vpop.f32.mrb[176].mxu1  ;;  %v3636_v24 = vmax.f32 %v3592_v21, 0.0 }
 0x8b0   :  { %v5123_v23 = vpop.f32.mrb[177].mxu1 }
 0x8b1   :  { %v3637_v26 = vmax.f32 %v3595_v58, 0.0  ;;  %v5124_v20 = vadd.f32 %v5123_v23, %v5122_v22  ;;  %v5125_v34 = vpop.f32.mrb[178].mxu1 }
 0x8b2   :  { %v5126_v15 = vpop.f32.mrb[179].mxu1 }
 0x8b3   :  { %v3649_v31 = vpack.c.bf16 %v3637_v26, %v3636_v24  ;;  %v5127_v45 = vadd.f32 %v5126_v15, %v5125_v34  ;;  %v3503_v25 = vadd.f32 %v5124_v20, %v7018_v61 }
 0x8b5   :  { %5631 = vmatmul.mubr.bf16.gmra.mrb[196].mxu1 %v3649_v31  ;;  %v3600_v56 = vadd.f32 %v7001_v42, %v3503_v25  ;;  %3877 = vmatmul.mubr.bf16.gmra.mrb[204].mxu0 %v3649_v31  ;;  %v3506_v51 = vadd.f32 %v5127_v45, %v7018_v61 }
 0x8b6   :  { %3886 = vmatprep.mubr.bf16.mxu0 %v5931_v48 }
 0x8b7   :  { %v5128_v55 = vpop.f32.mrb[180].mxu1  ;;  %v3603_v53 = vadd.f32 %v7005_v1, %v3506_v51  ;;  %v3638_v33 = vmax.f32 %v3600_v56, 0.0  ;;  %v5923_v51 = vld [vmem:[%s7171_s2 + $0x8] ss:$12 sps:$4 sm:$0xff]  }
 0x8b8   :  { %v5129_v37 = vpop.f32.mrb[181].mxu1 }
 0x8b9   :  { %v5130_v28 = vadd.f32 %v5129_v37, %v5128_v55  ;;  %v5131_v47 = vpop.f32.mrb[182].mxu1  ;;  %v3639_v54 = vmax.f32 %v3603_v53, 0.0 }
 0x8ba   :  { %v5132_v57 = vpop.f32.mrb[183].mxu1 }
 0x8bb   :  { %v3511_v60 = vadd.f32 %v5130_v28, %v7018_v61  ;;  %v5133_v8 = vadd.f32 %v5132_v57, %v5131_v47  ;;  %v3650_v44 = vpack.c.bf16 %v3639_v54, %v3638_v33 }
 0x8bd   :  { %v3608_v42 = vadd.f32 %v6999_v39, %v3511_v60  ;;  %v3514_v5 = vadd.f32 %v5133_v8, %v7018_v61  ;;  %3887 = vmatmul.mubr.bf16.gmra.mrb[208].mxu0 %v3650_v44  ;;  %5634 = vmatprep.mubr.bf16.mxu1 %v3650_v44 }
 0x8be   :  { %3896 = vmatprep.mubr.bf16.mxu0 %v5931_v48 }
 0x8bf   :  { %v3611_v1 = vadd.f32 %v7003_v49, %v3514_v5  ;;  %v5134_v6 = vpop.f32.mrb[184].mxu1  ;;  %v3640_v63 = vmax.f32 %v3608_v42, 0.0 }
 0x8c0   :  { %v5135_v59 = vpop.f32.mrb[185].mxu1 }
 0x8c1   :  { %v3641_v9 = vmax.f32 %v3611_v1, 0.0  ;;  %v5136_v11 = vadd.f32 %v5135_v59, %v5134_v6  ;;  %v5137_v13 = vpop.f32.mrb[186].mxu1 }
 0x8c2   :  { %v5138_v10 = vpop.f32.mrb[187].mxu1 }
 0x8c3   :  { %v3651_v17 = vpack.c.bf16 %v3641_v9, %v3640_v63  ;;  %v5139_v7 = vadd.f32 %v5138_v10, %v5137_v13  ;;  %v3519_v19 = vadd.f32 %v5136_v11, %v7018_v61 }
 0x8c5   :  { %5635 = vmatmul.mubr.bf16.gmra.mrb[200].mxu1 %v3651_v17  ;;  %v3616_v39 = vadd.f32 %v7009_v0, %v3519_v19  ;;  %3897 = vmatmul.mubr.bf16.gmra.mrb[212].mxu0 %v3651_v17  ;;  %v3522_v3 = vadd.f32 %v5139_v7, %v7018_v61 }
 0x8c6   :  { %3906 = vmatprep.mubr.bf16.mxu0 %v5931_v48 }
 0x8c7   :  { %v5140_v49 = vpop.f32.mrb[188].mxu1  ;;  %v3619_v21 = vadd.f32 %v7013_v4, %v3522_v3  ;;  %v3642_v22 = vmax.f32 %v3616_v39, 0.0 }
 0x8c8   :  { %v5141_v52 = vpop.f32.mrb[189].mxu1 }
 0x8c9   :  { %v5142_v58 = vadd.f32 %v5141_v52, %v5140_v49  ;;  %v5143_v23 = vpop.f32.mrb[190].mxu1  ;;  %v3643_v24 = vmax.f32 %v3619_v21, 0.0 }
 0x8ca   :  { %v5144_v26 = vpop.f32.mrb[191].mxu1 }
 0x8cb   :  { %v3527_v20 = vadd.f32 %v5142_v58, %v7018_v61  ;;  %v5145_v34 = vadd.f32 %v5144_v26, %v5143_v23  ;;  %v3652_v15 = vpack.c.bf16 %v3643_v24, %v3642_v22 }
 0x8cd   :  { %v3624_v0 = vadd.f32 %v7007_v2, %v3527_v20  ;;  %v3530_v31 = vadd.f32 %v5145_v34, %v7018_v61  ;;  %3907 = vmatmul.mubr.bf16.gmra.mrb[216].mxu0 %v3652_v15  ;;  %5638 = vmatprep.mubr.bf16.mxu1 %v3652_v15 }
 0x8ce   :  { %3916 = vmatprep.mubr.bf16.mxu0 %v5931_v48 }
 0x8cf   :  { %v3627_v4 = vadd.f32 %v7011_v62, %v3530_v31  ;;  %v3644_v45 = vmax.f32 %v3624_v0, 0.0 }
 0x8d1   :  { %v3645_v25 = vmax.f32 %v3627_v4, 0.0 }
 0x8d3   :  { %v3653_v56 = vpack.c.bf16 %v3645_v25, %v3644_v45 }
 0x8d5   :  { %5639 = vmatmul.mubr.bf16.gmra.mrb[204].mxu1 %v3653_v56  ;;  %3917 = vmatmul.mubr.bf16.gmra.mrb[220].mxu0 %v3653_v56 }
 0x8d6   :  { %4295 = vmatprep.mubr.bf16.mxu1 %v6805_v36  ;;  %5658 = vmatprep.mubr.bf16.mxu0 %v5923_v51 }
 0x970   :  { %v3848_v2 = vpop.f32.mrb[192].mxu0 }
 0x971   :  { %v3850_v61 = vpop.f32.mrb[193].mxu0 }
 0x972   :  { %v3852_v55 = vpop.f32.mrb[194].mxu0 }
 0x973   :  { %v4024_v53 = vpack.c.bf16 %v3852_v55, %v3848_v2  ;;  %v3854_v37 = vpop.f32.mrb[195].mxu0 }
 0x974   :  { %v4040_v48 = vpack.c.bf16 %v3854_v37, %v3850_v61 }
 0x976   :  { %5178 = vmatprep.subr.bf16.mxu1 %v4040_v48 }
 0x977   :  { %5179 = vmatpush3.bf16.msra.mxu1 %v4024_v53 }
 0x978   :  { %v5628_v62 = vpop.f32.mrb[192].mxu1  ;;  %v3858_v28 = vpop.f32.mrb[196].mxu0 }
 0x979   :  { %v3961_v33 = vpop.f32.mrb[193].mxu1  ;;  %v3860_v47 = vpop.f32.mrb[197].mxu0 }
 0x97a   :  { %v5629_v54 = vpop.f32.mrb[194].mxu1  ;;  %v3862_v57 = vpop.f32.mrb[198].mxu0 }
 0x97b   :  { %v4057_v36 = vpack.c.bf16 %v5629_v54, %v5628_v62  ;;  %v3964_v60 = vpop.f32.mrb[195].mxu1  ;;  %v4025_v8 = vpack.c.bf16 %v3862_v57, %v3858_v28  ;;  %v3864_v44 = vpop.f32.mrb[199].mxu0 }
 0x97c   :  { %v4056_v42 = vpack.c.bf16 %v3964_v60, %v3961_v33  ;;  %v4041_v5 = vpack.c.bf16 %v3864_v44, %v3860_v47 }
 0x97e   :  { %5642 = vmatprep.subr.bf16.mxu0 %v4056_v42  ;;  %5180 = vmatprep.subr.bf16.mxu1 %v4041_v5 }
 0x97f   :  { %5643 = vmatpush3.bf16.msra.mxu0 %v4056_v42  ;;  %5181 = vmatpush3.bf16.msra.mxu1 %v4025_v8 }
 0x980   :  { %5644 = vmatprep.subr.bf16.mxu0 %v4057_v36  ;;  %v3868_v1 = vpop.f32.mrb[200].mxu0 }
 0x981   :  { %v3870_v6 = vpop.f32.mrb[201].mxu0 }
 0x982   :  { %v3872_v59 = vpop.f32.mrb[202].mxu0 }
 0x983   :  { %5645 = vmatpush3.bf16.msra.mxu0 %v4057_v36  ;;  %v4026_v63 = vpack.c.bf16 %v3872_v59, %v3868_v1  ;;  %v3874_v9 = vpop.f32.mrb[203].mxu0 }
 0x984   :  { %v4042_v11 = vpack.c.bf16 %v3874_v9, %v3870_v6 }
 0x986   :  { %5182 = vmatprep.subr.bf16.mxu1 %v4042_v11  ;;  %v5924_v11 = vld [vmem:[%s7171_s2 + $0x20] ss:$12 sps:$4 sm:$0xff]  }
 0x987   :  { %5183 = vmatpush3.bf16.msra.mxu1 %v4026_v63 }
 0x988   :  { %v5632_v13 = vpop.f32.mrb[196].mxu1  ;;  %v3878_v10 = vpop.f32.mrb[204].mxu0 }
 0x989   :  { %v3977_v17 = vpop.f32.mrb[197].mxu1  ;;  %v3880_v7 = vpop.f32.mrb[205].mxu0 }
 0x98a   :  { %v5633_v19 = vpop.f32.mrb[198].mxu1  ;;  %v3882_v39 = vpop.f32.mrb[206].mxu0 }
 0x98b   :  { %v4059_v3 = vpack.c.bf16 %v5633_v19, %v5632_v13  ;;  %v3980_v49 = vpop.f32.mrb[199].mxu1  ;;  %v4027_v21 = vpack.c.bf16 %v3882_v39, %v3878_v10  ;;  %v3884_v52 = vpop.f32.mrb[207].mxu0  ;;  %v5925_v13 = vld [vmem:[%s7171_s2 + $0x38] ss:$12 sps:$4 sm:$0xff]   ;;  %v5926_v10 = vld [vmem:[%s7171_s2 + $0x50] ss:$12 sps:$4 sm:$0xff]  }
 0x98c   :  { %v4058_v58 = vpack.c.bf16 %v3980_v49, %v3977_v17  ;;  %v4043_v22 = vpack.c.bf16 %v3884_v52, %v3880_v7 }
 0x98e   :  { %5646 = vmatprep.subr.bf16.mxu0 %v4058_v58  ;;  %5184 = vmatprep.subr.bf16.mxu1 %v4043_v22 }
 0x98f   :  { %5647 = vmatpush3.bf16.msra.mxu0 %v4058_v58  ;;  %5185 = vmatpush3.bf16.msra.mxu1 %v4027_v21 }
 0x990   :  { %5648 = vmatprep.subr.bf16.mxu0 %v4059_v3  ;;  %v3888_v23 = vpop.f32.mrb[208].mxu0 }
 0x991   :  { %v3890_v24 = vpop.f32.mrb[209].mxu0 }
 0x992   :  { %v3892_v26 = vpop.f32.mrb[210].mxu0 }
 0x993   :  { %5649 = vmatpush3.bf16.msra.mxu0 %v4059_v3  ;;  %v4028_v20 = vpack.c.bf16 %v3892_v26, %v3888_v23  ;;  %v3894_v34 = vpop.f32.mrb[211].mxu0 }
 0x994   :  { %v4044_v15 = vpack.c.bf16 %v3894_v34, %v3890_v24 }
 0x996   :  { %5186 = vmatprep.subr.bf16.mxu1 %v4044_v15 }
 0x997   :  { %5187 = vmatpush3.bf16.msra.mxu1 %v4028_v20 }
 0x998   :  { %v5636_v0 = vpop.f32.mrb[200].mxu1  ;;  %v3898_v31 = vpop.f32.mrb[212].mxu0 }
 0x999   :  { %v3993_v4 = vpop.f32.mrb[201].mxu1  ;;  %v3900_v45 = vpop.f32.mrb[213].mxu0 }
 0x99a   :  { %v5637_v25 = vpop.f32.mrb[202].mxu1  ;;  %v3902_v56 = vpop.f32.mrb[214].mxu0 }
 0x99b   :  { %v4061_v51 = vpack.c.bf16 %v5637_v25, %v5636_v0  ;;  %v3996_v2 = vpop.f32.mrb[203].mxu1  ;;  %v4029_v61 = vpack.c.bf16 %v3902_v56, %v3898_v31  ;;  %v3904_v55 = vpop.f32.mrb[215].mxu0 }
 0x99c   :  { %v4060_v53 = vpack.c.bf16 %v3996_v2, %v3993_v4  ;;  %v4045_v37 = vpack.c.bf16 %v3904_v55, %v3900_v45 }
 0x99e   :  { %5650 = vmatprep.subr.bf16.mxu0 %v4060_v53  ;;  %5188 = vmatprep.subr.bf16.mxu1 %v4045_v37 }
 0x99f   :  { %5651 = vmatpush3.bf16.msra.mxu0 %v4060_v53  ;;  %5189 = vmatpush3.bf16.msra.mxu1 %v4029_v61 }
 0x9a0   :  { %5652 = vmatprep.subr.bf16.mxu0 %v4061_v51  ;;  %v3908_v48 = vpop.f32.mrb[216].mxu0 }
 0x9a1   :  { %v3910_v62 = vpop.f32.mrb[217].mxu0 }
 0x9a2   :  { %v3912_v28 = vpop.f32.mrb[218].mxu0 }
 0x9a3   :  { %5653 = vmatpush3.bf16.msra.mxu0 %v4061_v51  ;;  %v4030_v33 = vpack.c.bf16 %v3912_v28, %v3908_v48  ;;  %v3914_v47 = vpop.f32.mrb[219].mxu0 }
 0x9a4   :  { %v4046_v54 = vpack.c.bf16 %v3914_v47, %v3910_v62 }
 0x9a6   :  { %5190 = vmatprep.subr.bf16.mxu1 %v4046_v54 }
 0x9a7   :  { %5191 = vmatpush3.bf16.msra.mxu1 %v4030_v33 }
 0x9a8   :  { %v5640_v57 = vpop.f32.mrb[204].mxu1  ;;  %v3918_v36 = vpop.f32.mrb[220].mxu0 }
 0x9a9   :  { %v4009_v60 = vpop.f32.mrb[205].mxu1  ;;  %v3920_v8 = vpop.f32.mrb[221].mxu0 }
 0x9aa   :  { %v5641_v44 = vpop.f32.mrb[206].mxu1  ;;  %v3922_v42 = vpop.f32.mrb[222].mxu0 }
 0x9ab   :  { %v4063_v5 = vpack.c.bf16 %v5641_v44, %v5640_v57  ;;  %v4012_v1 = vpop.f32.mrb[207].mxu1  ;;  %v4031_v6 = vpack.c.bf16 %v3922_v42, %v3918_v36  ;;  %v3924_v59 = vpop.f32.mrb[223].mxu0 }
 0x9ac   :  { %v4062_v63 = vpack.c.bf16 %v4012_v1, %v4009_v60  ;;  %v4047_v9 = vpack.c.bf16 %v3924_v59, %v3920_v8 }
 0x9ae   :  { %5654 = vmatprep.subr.bf16.mxu0 %v4062_v63  ;;  %5192 = vmatprep.subr.bf16.mxu1 %v4047_v9 }
 0x9af   :  { %5655 = vmatpush3.bf16.msra.mxu0 %v4062_v63  ;;  %5193 = vmatpush3.bf16.msra.mxu1 %v4031_v6 }
 0x9b0   :  { %5656 = vmatprep.subr.bf16.mxu0 %v4063_v5 }
 0x9b2   :  { %4296 = vmatmul.mubr.bf16.vlgmr.msra.gmra.mrb[208].mxu1 %v6868_v29  ;;  %v5927_v29 = vld [vmem:[%s7171_s2 + $0x68] ss:$12 sps:$4 sm:$0xff]  }
 0x9b3   :  { %5657 = vmatpush3.bf16.msra.mxu0 %v4063_v5  ;;  %4303 = vmatprep.mubr.bf16.mxu1 %v6873_v14  ;;  %v5928_v14 = vld [vmem:[%s7171_s2 + $0x80] ss:$12 sps:$4 sm:$0xff]  }
 0x9b6   :  { %5659 = vmatmul.mubr.bf16.vlgmr.msra.gmra.mrb[224].mxu0 %v5924_v11 }
 0x9b7   :  { %5662 = vmatprep.mubr.bf16.mxu0 %v5925_v13 }
 0x9ba   :  { %4304 = vmatmul.mubr.bf16.gmra.mrb[212].mxu1 %v6887_v35  ;;  %v5929_v35 = vld [vmem:[%s7171_s2 + $0x98] ss:$12 sps:$4 sm:$0xff]  }
 0x9bb   :  { %4311 = vmatprep.mubr.bf16.mxu1 %v6892_v38  ;;  %v5930_v38 = vld [vmem:[%s7171_s2 + $0xb0] ss:$12 sps:$4 sm:$0xff]  }
 0x9be   :  { %5663 = vmatmul.mubr.bf16.gmra.mrb[228].mxu0 %v5926_v10 }
 0x9bf   :  { %5666 = vmatprep.mubr.bf16.mxu0 %v5927_v29 }
 0x9c2   :  { %4312 = vmatmul.mubr.bf16.gmra.mrb[216].mxu1 %v6902_v27 }
 0x9c3   :  { %4319 = vmatprep.mubr.bf16.mxu1 %v6907_v12 }
 0x9c6   :  { %5667 = vmatmul.mubr.bf16.gmra.mrb[232].mxu0 %v5928_v14 }
 0x9c7   :  { %5670 = vmatprep.mubr.bf16.mxu0 %v5929_v35 }
 0x9ca   :  { %4320 = vmatmul.mubr.bf16.gmra.mrb[220].mxu1 %v6914_v43  ;;  %v7096_v43 = vld [vmem:[%s7174_s12] ss:$0 sm:$0xff] }
 0x9cb   :  { %4327 = vmatprep.mubr.bf16.mxu1 %v6919_v41 }
 0x9ce   :  { %5671 = vmatmul.mubr.bf16.gmra.mrb[236].mxu0 %v5930_v38 }
 0x9d2   :  { %4328 = vmatmul.mubr.bf16.gmra.mrb[224].mxu1 %v6926_v18 }
 0x9d3   :  { %4335 = vmatprep.mubr.bf16.mxu1 %v6931_v16 }
 0x9da   :  { %4336 = vmatmul.mubr.bf16.gmra.mrb[228].mxu1 %v6938_v46 }
 0x9db   :  { %4343 = vmatprep.mubr.bf16.mxu1 %v6943_v40 }
 0x9e2   :  { %4344 = vmatmul.mubr.bf16.gmra.mrb[232].mxu1 %v6950_v30 }
 0x9e3   :  { %4351 = vmatprep.mubr.bf16.mxu1 %v6955_v50 }
 0x9ea   :  { %4352 = vmatmul.mubr.bf16.gmra.mrb[236].mxu1 %v6962_v32 }
 0xa85   :  { %v5194_v27 = vpop.f32.mrb[208].mxu1 }
 0xa86   :  { %v5195_v12 = vpop.f32.mrb[209].mxu1 }
 0xa87   :  { %v5196_v41 = vadd.f32 %v5195_v12, %v5194_v27  ;;  %v5197_v18 = vpop.f32.mrb[210].mxu1 }
 0xa88   :  { %v5198_v16 = vpop.f32.mrb[211].mxu1 }
 0xa89   :  { %v5199_v17 = vadd.f32 %v5198_v16, %v5197_v18  ;;  %v5660_v46 = vpop.f32.mrb[224].mxu0  ;;  %v4298_v40 = vadd.f32 %v5196_v41, %v7096_v43 }
 0xa8a   :  { %v4394_v7 = vpop.f32.mrb[225].mxu0 }
 0xa8b   :  { %v4395_v30 = vadd.f32 %v4394_v7, %v4298_v40  ;;  %v5661_v19 = vpop.f32.mrb[226].mxu0  ;;  %v4301_v50 = vadd.f32 %v5199_v17, %v7096_v43 }
 0xa8c   :  { %v4397_v32 = vpop.f32.mrb[227].mxu0 }
 0xa8d   :  { %4457 = vst [vmem:[%s7175_s13] sm:$0xff] %v4395_v30  ;;  %v4398_v39 = vadd.f32 %v4397_v32, %v4301_v50  ;;  %v5200_v3 = vpop.f32.mrb[212].mxu1 }
 0xa8e   :  { %v5201_v49 = vpop.f32.mrb[213].mxu1 }
 0xa8f   :  { %4458 = vst [vmem:[%s7175_s13 + $0x8] sm:$0xff] %v4398_v39  ;;  %v5202_v21 = vadd.f32 %v5201_v49, %v5200_v3  ;;  %v5203_v52 = vpop.f32.mrb[214].mxu1 }
 0xa90   :  { %v5204_v58 = vpop.f32.mrb[215].mxu1 }
 0xa91   :  { %v4306_v22 = vadd.f32 %v5202_v21, %v7096_v43  ;;  %v5205_v23 = vadd.f32 %v5204_v58, %v5203_v52  ;;  %v5664_v24 = vpop.f32.mrb[228].mxu0 }
 0xa92   :  { %v4410_v26 = vpop.f32.mrb[229].mxu0 }
 0xa93   :  { %v4403_v20 = vadd.f32 %v5660_v46, %v4306_v22  ;;  %v4309_v34 = vadd.f32 %v5205_v23, %v7096_v43  ;;  %v5665_v15 = vpop.f32.mrb[230].mxu0 }
 0xa94   :  { %v4413_v0 = vpop.f32.mrb[231].mxu0 }
 0xa95   :  { %4459 = vst [vmem:[%s7175_s13 + $0x10] sm:$0xff] %v4403_v20  ;;  %v4406_v31 = vadd.f32 %v5661_v19, %v4309_v34  ;;  %v5206_v4 = vpop.f32.mrb[216].mxu1 }
 0xa96   :  { %v5207_v45 = vpop.f32.mrb[217].mxu1 }
 0xa97   :  { %4460 = vst [vmem:[%s7175_s13 + $0x18] sm:$0xff] %v4406_v31  ;;  %v5208_v25 = vadd.f32 %v5207_v45, %v5206_v4  ;;  %v5209_v56 = vpop.f32.mrb[218].mxu1 }
 0xa98   :  { %v5210_v51 = vpop.f32.mrb[219].mxu1 }
 0xa99   :  { %v5211_v2 = vadd.f32 %v5210_v51, %v5209_v56  ;;  %v4314_v61 = vadd.f32 %v5208_v25, %v7096_v43  ;;  %v5668_v55 = vpop.f32.mrb[232].mxu0 }
 0xa9a   :  { %v4426_v53 = vpop.f32.mrb[233].mxu0 }
 0xa9b   :  { %v4411_v37 = vadd.f32 %v4410_v26, %v4314_v61  ;;  %v4317_v48 = vadd.f32 %v5211_v2, %v7096_v43  ;;  %v5669_v62 = vpop.f32.mrb[234].mxu0 }
 0xa9c   :  { %v4429_v28 = vpop.f32.mrb[235].mxu0 }
 0xa9d   :  { %4461 = vst [vmem:[%s7175_s13 + $0x20] sm:$0xff] %v4411_v37  ;;  %v4414_v33 = vadd.f32 %v4413_v0, %v4317_v48  ;;  %v5212_v47 = vpop.f32.mrb[220].mxu1 }
 0xa9e   :  { %v5213_v54 = vpop.f32.mrb[221].mxu1 }
 0xa9f   :  { %4462 = vst [vmem:[%s7175_s13 + $0x28] sm:$0xff] %v4414_v33  ;;  %v5214_v57 = vadd.f32 %v5213_v54, %v5212_v47  ;;  %v5215_v36 = vpop.f32.mrb[222].mxu1 }
 0xaa0   :  { %v5216_v60 = vpop.f32.mrb[223].mxu1 }
 0xaa1   :  { %v4322_v8 = vadd.f32 %v5214_v57, %v7096_v43  ;;  %v5217_v44 = vadd.f32 %v5216_v60, %v5215_v36  ;;  %v5672_v42 = vpop.f32.mrb[236].mxu0 }
 0xaa2   :  { %v4442_v5 = vpop.f32.mrb[237].mxu0 }
 0xaa3   :  { %v4419_v1 = vadd.f32 %v5664_v24, %v4322_v8  ;;  %v4325_v6 = vadd.f32 %v5217_v44, %v7096_v43  ;;  %v5673_v59 = vpop.f32.mrb[238].mxu0 }
 0xaa4   :  { %v4445_v63 = vpop.f32.mrb[239].mxu0 }
 0xaa5   :  { %4463 = vst [vmem:[%s7175_s13 + $0x30] sm:$0xff] %v4419_v1  ;;  %v4422_v9 = vadd.f32 %v5665_v15, %v4325_v6  ;;  %v5218_v11 = vpop.f32.mrb[224].mxu1 }
 0xaa6   :  { %v5219_v13 = vpop.f32.mrb[225].mxu1 }
 0xaa7   :  { %4464 = vst [vmem:[%s7175_s13 + $0x38] sm:$0xff] %v4422_v9  ;;  %v5220_v10 = vadd.f32 %v5219_v13, %v5218_v11  ;;  %v5221_v29 = vpop.f32.mrb[226].mxu1 }
 0xaa8   :  { %v5222_v14 = vpop.f32.mrb[227].mxu1 }
 0xaa9   :  { %v5223_v35 = vadd.f32 %v5222_v14, %v5221_v29  ;;  %v4330_v38 = vadd.f32 %v5220_v10, %v7096_v43 }
 0xaab   :  { %v4427_v27 = vadd.f32 %v4426_v53, %v4330_v38  ;;  %v4333_v12 = vadd.f32 %v5223_v35, %v7096_v43 }
 0xaad   :  { %4465 = vst [vmem:[%s7175_s13 + $0x40] sm:$0xff] %v4427_v27  ;;  %v4430_v41 = vadd.f32 %v4429_v28, %v4333_v12  ;;  %v5224_v18 = vpop.f32.mrb[228].mxu1 }
 0xaae   :  { %v5225_v16 = vpop.f32.mrb[229].mxu1 }
 0xaaf   :  { %4466 = vst [vmem:[%s7175_s13 + $0x48] sm:$0xff] %v4430_v41  ;;  %v5226_v17 = vadd.f32 %v5225_v16, %v5224_v18  ;;  %v5227_v46 = vpop.f32.mrb[230].mxu1 }
 0xab0   :  { %v5228_v40 = vpop.f32.mrb[231].mxu1 }
 0xab1   :  { %v4338_v7 = vadd.f32 %v5226_v17, %v7096_v43  ;;  %v5229_v30 = vadd.f32 %v5228_v40, %v5227_v46 }
 0xab3   :  { %v4435_v19 = vadd.f32 %v5668_v55, %v4338_v7  ;;  %v4341_v50 = vadd.f32 %v5229_v30, %v7096_v43 }
 0xab5   :  { %4467 = vst [vmem:[%s7175_s13 + $0x50] sm:$0xff] %v4435_v19  ;;  %v4438_v32 = vadd.f32 %v5669_v62, %v4341_v50  ;;  %v5230_v39 = vpop.f32.mrb[232].mxu1 }
 0xab6   :  { %v5231_v3 = vpop.f32.mrb[233].mxu1 }
 0xab7   :  { %4468 = vst [vmem:[%s7175_s13 + $0x58] sm:$0xff] %v4438_v32  ;;  %v5232_v49 = vadd.f32 %v5231_v3, %v5230_v39  ;;  %v5233_v21 = vpop.f32.mrb[234].mxu1 }
 0xab8   :  { %v5234_v52 = vpop.f32.mrb[235].mxu1 }
 0xab9   :  { %v5235_v58 = vadd.f32 %v5234_v52, %v5233_v21  ;;  %v4346_v22 = vadd.f32 %v5232_v49, %v7096_v43 }
 0xabb   :  { %v4443_v23 = vadd.f32 %v4442_v5, %v4346_v22  ;;  %v4349_v24 = vadd.f32 %v5235_v58, %v7096_v43 }
 0xabd   :  { %4469 = vst [vmem:[%s7175_s13 + $0x60] sm:$0xff] %v4443_v23  ;;  %v4446_v26 = vadd.f32 %v4445_v63, %v4349_v24  ;;  %v5236_v20 = vpop.f32.mrb[236].mxu1 }
 0xabe   :  { %v5237_v34 = vpop.f32.mrb[237].mxu1 }
 0xabf   :  { %4470 = vst [vmem:[%s7175_s13 + $0x68] sm:$0xff] %v4446_v26  ;;  %v5238_v15 = vadd.f32 %v5237_v34, %v5236_v20  ;;  %v5239_v0 = vpop.f32.mrb[238].mxu1 }
 0xac0   :  { %v5240_v31 = vpop.f32.mrb[239].mxu1 }
 0xac1   :  { %v4354_v4 = vadd.f32 %v5238_v15, %v7096_v43  ;;  %v5241_v45 = vadd.f32 %v5240_v31, %v5239_v0 }
 0xac3   :  { %v4451_v25 = vadd.f32 %v5672_v42, %v4354_v4  ;;  %v4357_v56 = vadd.f32 %v5241_v45, %v7096_v43 }
 0xac5   :  { %4471 = vst [vmem:[%s7175_s13 + $0x70] sm:$0xff] %v4451_v25  ;;  %v4454_v51 = vadd.f32 %v5673_v59, %v4357_v56 }
 0xac7   :  { %4472 = vst [vmem:[%s7175_s13 + $0x78] sm:$0xff] %v4454_v51 }

</bundles_post_ra>
